<compile_context>
chip_gen: v7x
topology: tpu7x:2x2x1
jax: 0.10.0
libtpu: 0.0.40
codegen_flags: <defaults>
</compile_context>

<pallas_src>
import jax
import jax.numpy as jnp
import numpy as np
from jax import lax
from jax.experimental import pallas as pl
from jax.experimental.pallas import tpu as pltpu

WINDOW = 10          # `window` global in the PyTorch file
IN_CH = 6            # input_channels
HID = 64             # conv hidden channels
KSIZE = 3            # kernel_size (padding = 1)
OUT_DIM = 1
OUT_CHUNK = 10       # output_chunk_length
N_OUT = OUT_DIM * OUT_CHUNK
N_PAD = 128          # lane-dense output width (>= N_OUT, multiple of 128)


def _dpc_kernel(x_ref, w1_ref, b1_ref, w2_ref, b2_ref, w3_ref, b3_ref,
                wfc_ref, bfc_ref, o_ref):
    # x_ref block: (1, b_tile, WINDOW*IN_CH); lane index = t*IN_CH + cin.
    h = x_ref[0]                                                     # (bt, 60)

    # Conv layers as banded-dense matmuls (bias pre-tiled over time).
    h = jnp.dot(h, w1_ref[...], preferred_element_type=jnp.float32) + b1_ref[...]
    h = jnp.maximum(h, 0.0)                                          # (bt, 640)
    h = jnp.dot(h, w2_ref[...], preferred_element_type=jnp.float32) + b2_ref[...]
    h = jnp.maximum(h, 0.0)                                          # (bt, 640)
    h = jnp.dot(h, w3_ref[...], preferred_element_type=jnp.float32) + b3_ref[...]
    h = jnp.maximum(h, 0.0)                                          # (bt, 640)

    # FC (torch channel-major flatten folded into wfc in the wrapper),
    # zero-padded to 128 lanes so the store is unmasked / lane-dense.
    y = jnp.dot(h, wfc_ref[...], preferred_element_type=jnp.float32) + bfc_ref[...]
    o_ref[0] = y                                                     # (bt, 128)


def _band_conv_weight(Wc):
    """(Cout, Cin, K) conv weight -> (WINDOW*Cin, WINDOW*Cout) banded dense.

    out[b, t_out*Cout + co] = sum_{k, ci} W[co, ci, k] * in[b, (t_out+k-1)*Cin + ci]
    (zero rows outside [0, WINDOW) implement the 'same' padding).
    """
    cout, cin, K = Wc.shape
    Wd = jnp.zeros((WINDOW * cin, WINDOW * cout), jnp.float32)
    for t_out in range(WINDOW):
        for k in range(K):
            t_in = t_out + k - 1
            if 0 <= t_in < WINDOW:
                Wd = Wd.at[t_in * cin:(t_in + 1) * cin,
                           t_out * cout:(t_out + 1) * cout].set(Wc[:, :, k].T)
    return Wd


def dpc_policy_cnn_forward(x, x_fut, c_fut, params, *, b_tile=None):
    """x, x_fut, c_fut: (B, WINDOW, 2) each -> output (B, OUT_CHUNK, OUT_DIM, 1)."""
    B = x.shape[0]
    x_all = jnp.concatenate([x, x_fut, c_fut], axis=2).astype(jnp.float32)  # (B, L, 6)
    # Batch-major lane layout (t*IN_CH + cin) == contiguous reshape: free.
    x_flat = x_all.reshape(B, WINDOW * IN_CH)                               # (B, 60)

    # Batch tile: big (amortizes ~0.35us/step grid overhead, fills the MXU),
    # multiple of 8 for sublane alignment, capped at 256 so VMEM stays small
    # on v5e and B > 256 yields >= 2 parallel grid steps for v7x's two TCs.
    if b_tile is None:
        b_pad8 = -(-B // 8) * 8
        b_tile = min(256, b_pad8)
    n_tiles = -(-B // b_tile)
    b_pad = n_tiles * b_tile
    if b_pad != B:
        x_flat = jnp.pad(x_flat, ((0, b_pad - B), (0, 0)))
    x_tiles = x_flat.reshape(n_tiles, b_tile, WINDOW * IN_CH)

    (W1, b1), (W2, b2), (W3, b3) = params["convs"]
    Wfc, bfc = params["fc"]

    # Banded dense conv weights + time-tiled biases.
    W1d, W2d, W3d = _band_conv_weight(W1), _band_conv_weight(W2), _band_conv_weight(W3)
    b1t = jnp.tile(b1, WINDOW).reshape(1, WINDOW * HID)
    b2t = jnp.tile(b2, WINDOW).reshape(1, WINDOW * HID)
    b3t = jnp.tile(b3, WINDOW).reshape(1, WINDOW * HID)

    # fc weight (N_OUT, 64*L) with torch flat index c*L + t  ->  rows t*HID + c,
    # then zero-pad output lanes to N_PAD for a dense store.
    Wfc_flat = jnp.transpose(Wfc.reshape(N_OUT, HID, WINDOW), (2, 1, 0)).reshape(
        WINDOW * HID, N_OUT)
    Wfc_pad = jnp.pad(Wfc_flat, ((0, 0), (0, N_PAD - N_OUT)))
    bfc_pad = jnp.pad(bfc, (0, N_PAD - N_OUT)).reshape(1, N_PAD)

    out = pl.pallas_call(
        _dpc_kernel,
        out_shape=jax.ShapeDtypeStruct((n_tiles, b_tile, N_PAD), jnp.float32),
        grid=(n_tiles,),
        in_specs=[
            pl.BlockSpec((1, b_tile, WINDOW * IN_CH), lambda i: (i, 0, 0)),   # x tile
            pl.BlockSpec((WINDOW * IN_CH, WINDOW * HID), lambda i: (0, 0)),   # W1 banded
            pl.BlockSpec((1, WINDOW * HID), lambda i: (0, 0)),                # b1 tiled
            pl.BlockSpec((WINDOW * HID, WINDOW * HID), lambda i: (0, 0)),     # W2 banded
            pl.BlockSpec((1, WINDOW * HID), lambda i: (0, 0)),                # b2 tiled
            pl.BlockSpec((WINDOW * HID, WINDOW * HID), lambda i: (0, 0)),     # W3 banded
            pl.BlockSpec((1, WINDOW * HID), lambda i: (0, 0)),                # b3 tiled
            pl.BlockSpec((WINDOW * HID, N_PAD), lambda i: (0, 0)),            # Wfc padded
            pl.BlockSpec((1, N_PAD), lambda i: (0, 0)),                       # bfc padded
        ],
        out_specs=pl.BlockSpec((1, b_tile, N_PAD), lambda i: (i, 0, 0)),
        compiler_params=pltpu.CompilerParams(dimension_semantics=("parallel",)),
    )(x_tiles, W1d, b1t, W2d, b2t, W3d, b3t, Wfc_pad, bfc_pad)

    out = out.reshape(b_pad, N_PAD)[:B, :N_OUT]
    return out.reshape(B, OUT_CHUNK, OUT_DIM, 1)


def init_params(key):
    """Deterministic synthetic parameters matching nn.Module shapes."""
    ks = jax.random.split(key, 8)
    W1 = 0.1 * jax.random.normal(ks[0], (HID, IN_CH, KSIZE), jnp.float32)
    b1 = 0.1 * jax.random.normal(ks[1], (HID,), jnp.float32)
    W2 = 0.1 * jax.random.normal(ks[2], (HID, HID, KSIZE), jnp.float32)
    b2 = 0.1 * jax.random.normal(ks[3], (HID,), jnp.float32)
    W3 = 0.1 * jax.random.normal(ks[4], (HID, HID, KSIZE), jnp.float32)
    b3 = 0.1 * jax.random.normal(ks[5], (HID,), jnp.float32)
    Wfc = 0.1 * jax.random.normal(ks[6], (N_OUT, HID * WINDOW), jnp.float32)
    bfc = 0.1 * jax.random.normal(ks[7], (N_OUT,), jnp.float32)
    return {"convs": [(W1, b1), (W2, b2), (W3, b3)], "fc": (Wfc, bfc)}


def reference_forward(x, x_fut, c_fut, params):
    """Pure-JAX replica of the PyTorch forward (for verification)."""
    B = x.shape[0]
    x_all = jnp.concatenate([x, x_fut, c_fut], axis=2)
    h = jnp.transpose(x_all, (0, 2, 1))  # (B, C, L)
    for (W, b) in params["convs"]:
        h = lax.conv_general_dilated(h, W, window_strides=(1,), padding=[(1, 1)],
                                     dimension_numbers=("NCH", "OIH", "NCH"))
        h = jax.nn.relu(h + b[None, :, None])
    flat = h.reshape(B, -1)              # same (channel-major) order as torch Flatten
    Wfc, bfc = params["fc"]
    y = flat @ Wfc.T + bfc
    return y.reshape(B, OUT_CHUNK, OUT_DIM, 1)


if __name__ == "__main__":
    key = jax.random.PRNGKey(0)
    k_in, k_par = jax.random.split(key)
    kx, kf, kc = jax.random.split(k_in, 3)

    B = 2
    # The three tensors concatenated on the feature axis must total 6 channels.
    x = jax.random.normal(kx, (B, WINDOW, 2), jnp.float32)
    x_fut = jax.random.normal(kf, (B, WINDOW, 2), jnp.float32)
    c_fut = jax.random.normal(kc, (B, WINDOW, 2), jnp.float32)
    # 4th element of x_in is unused by the PyTorch forward, so it is not passed.

    params = init_params(k_par)

    out = dpc_policy_cnn_forward(x, x_fut, c_fut, params)
    out = jax.block_until_ready(out)
    assert out.shape == (B, OUT_CHUNK, OUT_DIM, 1)

    ref = reference_forward(x, x_fut, c_fut, params)
    np.testing.assert_allclose(np.asarray(out), np.asarray(ref), rtol=1e-4, atol=1e-4)

    print("KERNEL_OK")
</pallas_src>

<mosaic_0001>
module attributes {stable_mosaic.version = 11 : i64} {
  func.func @_dpc_kernel(%arg0: i32, %arg1: memref<1x8x60xf32, #tpu.memory_space<vmem>>, %arg2: memref<60x640xf32, #tpu.memory_space<vmem>>, %arg3: memref<1x640xf32, #tpu.memory_space<vmem>>, %arg4: memref<640x640xf32, #tpu.memory_space<vmem>>, %arg5: memref<1x640xf32, #tpu.memory_space<vmem>>, %arg6: memref<640x640xf32, #tpu.memory_space<vmem>>, %arg7: memref<1x640xf32, #tpu.memory_space<vmem>>, %arg8: memref<640x128xf32, #tpu.memory_space<vmem>>, %arg9: memref<1x128xf32, #tpu.memory_space<vmem>>, %arg10: memref<1x8x128xf32, #tpu.memory_space<vmem>>) attributes {dimension_semantics = [#tpu.dimension_semantics<parallel>], iteration_bounds = array<i64: 1>, scalar_prefetch = 0 : i64, scratch_operands = 0 : i64, tpu.core_type = #tpu.core_type<tc>, window_params = [{transform_indices = @transform_0, window_bounds = array<i64: 1, 8, 60>}, {pipeline_mode = #tpu.pipeline_mode<synchronous>, transform_indices = @transform_1, window_bounds = array<i64: 60, 640>}, {pipeline_mode = #tpu.pipeline_mode<synchronous>, transform_indices = @transform_2, window_bounds = array<i64: 1, 640>}, {pipeline_mode = #tpu.pipeline_mode<synchronous>, transform_indices = @transform_3, window_bounds = array<i64: 640, 640>}, {pipeline_mode = #tpu.pipeline_mode<synchronous>, transform_indices = @transform_4, window_bounds = array<i64: 1, 640>}, {pipeline_mode = #tpu.pipeline_mode<synchronous>, transform_indices = @transform_5, window_bounds = array<i64: 640, 640>}, {pipeline_mode = #tpu.pipeline_mode<synchronous>, transform_indices = @transform_6, window_bounds = array<i64: 1, 640>}, {pipeline_mode = #tpu.pipeline_mode<synchronous>, transform_indices = @transform_7, window_bounds = array<i64: 640, 128>}, {pipeline_mode = #tpu.pipeline_mode<synchronous>, transform_indices = @transform_8, window_bounds = array<i64: 1, 128>}, {transform_indices = @transform_9, window_bounds = array<i64: 1, 8, 128>}]} {
    %c0 = arith.constant 0 : index
    %c0_0 = arith.constant 0 : index
    %c0_1 = arith.constant 0 : index
    %0 = vector.load %arg1[%c0, %c0_0, %c0_1] : memref<1x8x60xf32, #tpu.memory_space<vmem>>, vector<1x8x60xf32>
    %1 = vector.shape_cast %0 : vector<1x8x60xf32> to vector<8x60xf32>
    %c0_2 = arith.constant 0 : index
    %c0_3 = arith.constant 0 : index
    %2 = vector.load %arg2[%c0_2, %c0_3] : memref<60x640xf32, #tpu.memory_space<vmem>>, vector<60x640xf32>
    %cst = arith.constant dense<0.000000e+00> : vector<8x640xf32>
    %3 = tpu.matmul %1, %2, %cst {dimension_numbers = #tpu.dot_dimension_numbers<[1], [0], [0], [1], [0, 0, 1, 1], [], []>} : vector<8x60xf32>, vector<60x640xf32>, vector<8x640xf32> -> vector<8x640xf32>
    %c0_4 = arith.constant 0 : index
    %c0_5 = arith.constant 0 : index
    %4 = vector.load %arg3[%c0_4, %c0_5] : memref<1x640xf32, #tpu.memory_space<vmem>>, vector<1x640xf32>
    %5 = vector.broadcast %4 : vector<1x640xf32> to vector<8x640xf32>
    %6 = arith.addf %3, %5 : vector<8x640xf32>
    %cst_6 = arith.constant 0.000000e+00 : f32
    %7 = vector.broadcast %cst_6 : f32 to vector<8x640xf32>
    %8 = arith.maximumf %6, %7 : vector<8x640xf32>
    %c0_7 = arith.constant 0 : index
    %c0_8 = arith.constant 0 : index
    %9 = vector.load %arg4[%c0_7, %c0_8] : memref<640x640xf32, #tpu.memory_space<vmem>>, vector<640x640xf32>
    %cst_9 = arith.constant dense<0.000000e+00> : vector<8x640xf32>
    %10 = tpu.matmul %8, %9, %cst_9 {dimension_numbers = #tpu.dot_dimension_numbers<[1], [0], [0], [1], [0, 0, 1, 1], [], []>} : vector<8x640xf32>, vector<640x640xf32>, vector<8x640xf32> -> vector<8x640xf32>
    %c0_10 = arith.constant 0 : index
    %c0_11 = arith.constant 0 : index
    %11 = vector.load %arg5[%c0_10, %c0_11] : memref<1x640xf32, #tpu.memory_space<vmem>>, vector<1x640xf32>
    %12 = vector.broadcast %11 : vector<1x640xf32> to vector<8x640xf32>
    %13 = arith.addf %10, %12 : vector<8x640xf32>
    %cst_12 = arith.constant 0.000000e+00 : f32
    %14 = vector.broadcast %cst_12 : f32 to vector<8x640xf32>
    %15 = arith.maximumf %13, %14 : vector<8x640xf32>
    %c0_13 = arith.constant 0 : index
    %c0_14 = arith.constant 0 : index
    %16 = vector.load %arg6[%c0_13, %c0_14] : memref<640x640xf32, #tpu.memory_space<vmem>>, vector<640x640xf32>
    %cst_15 = arith.constant dense<0.000000e+00> : vector<8x640xf32>
    %17 = tpu.matmul %15, %16, %cst_15 {dimension_numbers = #tpu.dot_dimension_numbers<[1], [0], [0], [1], [0, 0, 1, 1], [], []>} : vector<8x640xf32>, vector<640x640xf32>, vector<8x640xf32> -> vector<8x640xf32>
    %c0_16 = arith.constant 0 : index
    %c0_17 = arith.constant 0 : index
    %18 = vector.load %arg7[%c0_16, %c0_17] : memref<1x640xf32, #tpu.memory_space<vmem>>, vector<1x640xf32>
    %19 = vector.broadcast %18 : vector<1x640xf32> to vector<8x640xf32>
    %20 = arith.addf %17, %19 : vector<8x640xf32>
    %cst_18 = arith.constant 0.000000e+00 : f32
    %21 = vector.broadcast %cst_18 : f32 to vector<8x640xf32>
    %22 = arith.maximumf %20, %21 : vector<8x640xf32>
    %c0_19 = arith.constant 0 : index
    %c0_20 = arith.constant 0 : index
    %23 = vector.load %arg8[%c0_19, %c0_20] : memref<640x128xf32, #tpu.memory_space<vmem>>, vector<640x128xf32>
    %cst_21 = arith.constant dense<0.000000e+00> : vector<8x128xf32>
    %24 = tpu.matmul %22, %23, %cst_21 {dimension_numbers = #tpu.dot_dimension_numbers<[1], [0], [0], [1], [0, 0, 1, 1], [], []>} : vector<8x640xf32>, vector<640x128xf32>, vector<8x128xf32> -> vector<8x128xf32>
    %c0_22 = arith.constant 0 : index
    %c0_23 = arith.constant 0 : index
    %25 = vector.load %arg9[%c0_22, %c0_23] : memref<1x128xf32, #tpu.memory_space<vmem>>, vector<1x128xf32>
    %26 = vector.broadcast %25 : vector<1x128xf32> to vector<8x128xf32>
    %27 = arith.addf %24, %26 : vector<8x128xf32>
    %c0_24 = arith.constant 0 : index
    %c0_25 = arith.constant 0 : index
    %c0_26 = arith.constant 0 : index
    %28 = vector.load %arg10[%c0_24, %c0_25, %c0_26] : memref<1x8x128xf32, #tpu.memory_space<vmem>>, vector<1x8x128xf32>
    %29 = vector.shape_cast %28 : vector<1x8x128xf32> to vector<8x128xf32>
    %30 = vector.shape_cast %27 : vector<8x128xf32> to vector<1x8x128xf32>
    tpu.vector_store %arg10[%c0_24, %c0_25, %c0_26], %30 {strides = array<i32>} : memref<1x8x128xf32, #tpu.memory_space<vmem>>, vector<1x8x128xf32>,
    return
  }
  func.func @transform_0(%arg0: i32) -> (i32, i32, i32) {
    %c0_i32 = arith.constant 0 : i32
    %c0_i32_0 = arith.constant 0 : i32
    %c0_i32_1 = arith.constant 0 : i32
    return %arg0, %c0_i32, %c0_i32_0 : i32, i32, i32
  }
  func.func @transform_1(%arg0: i32) -> (i32, i32) {
    %c0_i32 = arith.constant 0 : i32
    %c0_i32_0 = arith.constant 0 : i32
    %c0_i32_1 = arith.constant 0 : i32
    return %c0_i32, %c0_i32_0 : i32, i32
  }
  func.func @transform_2(%arg0: i32) -> (i32, i32) {
    %c0_i32 = arith.constant 0 : i32
    %c0_i32_0 = arith.constant 0 : i32
    %c0_i32_1 = arith.constant 0 : i32
    return %c0_i32, %c0_i32_0 : i32, i32
  }
  func.func @transform_3(%arg0: i32) -> (i32, i32) {
    %c0_i32 = arith.constant 0 : i32
    %c0_i32_0 = arith.constant 0 : i32
    %c0_i32_1 = arith.constant 0 : i32
    return %c0_i32, %c0_i32_0 : i32, i32
  }
  func.func @transform_4(%arg0: i32) -> (i32, i32) {
    %c0_i32 = arith.constant 0 : i32
    %c0_i32_0 = arith.constant 0 : i32
    %c0_i32_1 = arith.constant 0 : i32
    return %c0_i32, %c0_i32_0 : i32, i32
  }
  func.func @transform_5(%arg0: i32) -> (i32, i32) {
    %c0_i32 = arith.constant 0 : i32
    %c0_i32_0 = arith.constant 0 : i32
    %c0_i32_1 = arith.constant 0 : i32
    return %c0_i32, %c0_i32_0 : i32, i32
  }
  func.func @transform_6(%arg0: i32) -> (i32, i32) {
    %c0_i32 = arith.constant 0 : i32
    %c0_i32_0 = arith.constant 0 : i32
    %c0_i32_1 = arith.constant 0 : i32
    return %c0_i32, %c0_i32_0 : i32, i32
  }
  func.func @transform_7(%arg0: i32) -> (i32, i32) {
    %c0_i32 = arith.constant 0 : i32
    %c0_i32_0 = arith.constant 0 : i32
    %c0_i32_1 = arith.constant 0 : i32
    return %c0_i32, %c0_i32_0 : i32, i32
  }
  func.func @transform_8(%arg0: i32) -> (i32, i32) {
    %c0_i32 = arith.constant 0 : i32
    %c0_i32_0 = arith.constant 0 : i32
    %c0_i32_1 = arith.constant 0 : i32
    return %c0_i32, %c0_i32_0 : i32, i32
  }
  func.func @transform_9(%arg0: i32) -> (i32, i32, i32) {
    %c0_i32 = arith.constant 0 : i32
    %c0_i32_0 = arith.constant 0 : i32
    %c0_i32_1 = arith.constant 0 : i32
    return %arg0, %c0_i32, %c0_i32_0 : i32, i32, i32
  }
}

</mosaic_0001>

<bundles_post_ra>
// kernel: tpu_custom_call.1
= control target key start
LH: loop header
LB: loop body
LE: loop exit
PB: predicated region body
PF: predicated region fallthrough
CT: control target
= control target key end

     0   :  { %14 = vsyncpa [#allocation3], 0  ;;  %s4913_s0 = inlined_call_operand.hbm [shape: f32[1,8,60], index: 0, kind: input, shape index: {}]   ;;  %s4914_s1 = inlined_call_operand.hbm [shape: f32[60,640], index: 1, kind: input, shape index: {}]   ;;  %s4915_s2 = inlined_call_operand.hbm [shape: f32[1,640], index: 2, kind: input, shape index: {}]   ;;  %s4916_s3 = inlined_call_operand.hbm [shape: f32[640,640], index: 3, kind: input, shape index: {}]   ;;  %s4917_s4 = inlined_call_operand.hbm [shape: f32[1,640], index: 4, kind: input, shape index: {}]   ;;  %s4918_s5 = inlined_call_operand.hbm [shape: f32[640,640], index: 5, kind: input, shape index: {}]   ;;  %s4919_s6 = inlined_call_operand.hbm [shape: f32[1,640], index: 6, kind: input, shape index: {}]   ;;  %s4920_s7 = inlined_call_operand.hbm [shape: f32[640,128], index: 7, kind: input, shape index: {}]   ;;  %s4921_s8 = inlined_call_operand.hbm [shape: f32[1,128], index: 8, kind: input, shape index: {}]   ;;  %s4922_s9 = inlined_call_operand.hbm [shape: f32[1,8,128], index: 9, kind: output, shape index: {}]  }
   0x1   :  { %15 = vsyncpa [#allocation6], 0 }
   0x2   :  { %16 = vsyncpa [#allocation9], 0 }
   0x3   :  { %17 = vsyncpa [#allocation12], 0 }
   0x4   :  { %18 = vsyncpa [#allocation15], 0 }
   0x5   :  { %19 = vsyncpa [#allocation4], 0  ;;  %s4533_s30 = smov [#allocation5]   ;;  %s4301_s13 = scalar_lea.hbm %s4914_s1, 5120 }
   0x6   :  { %s35_s10 = sshll.u32 %s4533_s30, 4  ;;  %p4302_p0 = scmp.ne.s32.totalorder %s4914_s1, %s4301_s13  ;;  %s36_s10 = int_to_ptr.vmem [resolvable:$true] %s35_s10 }
   0x7   :  { %p4305_p1 = scmp.lt.u32.totalorder %s4301_s13, %s4914_s1 }
   0x9   :  { %p4307_p2 = pnand %p4305_p1, %p4302_p0 }
   0xb   :  { %4310 = shalt.err (!%p4307_p2)
}
   0xc   :  { %s4311_s18 = scalar_lea.vmem %s36_s10, 5120  ;;  %p4316_p4 = scmp.lt.s32.totalorder %s36_s10, %s36_s10 }
   0xd   :  { %p4312_p3 = scmp.ne.s32.totalorder %s36_s10, %s4311_s18  ;;  %p4317_p5 = scmp.lt.s32.totalorder %s4311_s18, %s4311_s18 }
   0xf   :  { %p4318_p6 = por %p4317_p5, %p4316_p4 }
  0x11   :  { %p4319_p7 = pnand %p4318_p6, %p4312_p3 }
  0x13   :  { %4322 = shalt.err (!%p4319_p7)
}
  0x14   :  { %s4534_s19 = smov 640   ;;  %s4535_s20 = smov 40  }
  0x15   :  { %41 = dma.hbm_to_vmem [thread:$0]  %s4914_s1, 5120, %s36_s10, [#allocation6], %s4534_s19, %s4534_s19, %s4535_s20  }
  0x16   :  { %s4536_s23 = smov [#allocation8]   ;;  %s4537_s25 = smov [#allocation11]  }
  0x17   :  { %s57_s24 = sshll.u32 %s4536_s23, 4  ;;  %s79_s26 = sshll.u32 %s4537_s25, 4  ;;  %s58_s24 = int_to_ptr.vmem [resolvable:$true] %s57_s24  ;;  %s80_s26 = int_to_ptr.vmem [resolvable:$true] %s79_s26 }
  0x18   :  { %s4323_s29 = scalar_lea.hbm %s4916_s3, 51200 }
  0x19   :  { %p4324_p8 = scmp.ne.s32.totalorder %s4916_s3, %s4323_s29  ;;  %p4327_p9 = scmp.lt.u32.totalorder %s4323_s29, %s4916_s3 }
  0x1b   :  { %p4329_p10 = pnand %p4327_p9, %p4324_p8 }
  0x1d   :  { %4332 = shalt.err (!%p4329_p10)
}
  0x1e   :  { %s4333_s1 = scalar_lea.vmem %s58_s24, 51200  ;;  %p4338_p12 = scmp.lt.s32.totalorder %s58_s24, %s58_s24 }
  0x1f   :  { %p4334_p11 = scmp.ne.s32.totalorder %s58_s24, %s4333_s1  ;;  %p4339_p13 = scmp.lt.s32.totalorder %s4333_s1, %s4333_s1 }
  0x21   :  { %p4340_p0 = por %p4339_p13, %p4338_p12 }
  0x23   :  { %p4341_p1 = pnand %p4340_p0, %p4334_p11 }
  0x25   :  { %4344 = shalt.err (!%p4341_p1)
}
  0x26   :  { %63 = dma.hbm_to_vmem [thread:$0]  %s4916_s3, 51200, %s58_s24, [#allocation9], %s4534_s19, %s4534_s19, %s4535_s20  }
  0x27   :  { %s4345_s17 = scalar_lea.hbm %s4918_s5, 51200 }
  0x28   :  { %p4346_p2 = scmp.ne.s32.totalorder %s4918_s5, %s4345_s17  ;;  %p4349_p3 = scmp.lt.u32.totalorder %s4345_s17, %s4918_s5 }
  0x2a   :  { %p4351_p4 = pnand %p4349_p3, %p4346_p2 }
  0x2c   :  { %4354 = shalt.err (!%p4351_p4)
}
  0x2d   :  { %s4355_s25 = scalar_lea.vmem %s80_s26, 51200  ;;  %p4360_p6 = scmp.lt.s32.totalorder %s80_s26, %s80_s26 }
  0x2e   :  { %p4356_p5 = scmp.ne.s32.totalorder %s80_s26, %s4355_s25  ;;  %p4361_p7 = scmp.lt.s32.totalorder %s4355_s25, %s4355_s25 }
  0x30   :  { %p4362_p8 = por %p4361_p7, %p4360_p6 }
  0x32   :  { %p4363_p9 = pnand %p4362_p8, %p4356_p5 }
  0x34   :  { %4366 = shalt.err (!%p4363_p9)
}
  0x35   :  { %85 = dma.hbm_to_vmem [thread:$0]  %s4918_s5, 51200, %s80_s26, [#allocation12], %s4534_s19, %s4534_s19, %s4535_s20  }
  0x36   :  { %s4538_s27 = smov [#allocation14]   ;;  %s4367_s11 = scalar_lea.hbm %s4920_s7, 10240 }
  0x37   :  { %s101_s28 = sshll.u32 %s4538_s27, 4  ;;  %p4368_p10 = scmp.ne.s32.totalorder %s4920_s7, %s4367_s11  ;;  %s102_s28 = int_to_ptr.vmem [resolvable:$true] %s101_s28 }
  0x38   :  { %p4371_p11 = scmp.lt.u32.totalorder %s4367_s11, %s4920_s7 }
  0x3a   :  { %p4373_p12 = pnand %p4371_p11, %p4368_p10 }
  0x3c   :  { %4376 = shalt.err (!%p4373_p12)
}
  0x3d   :  { %s4377_s14 = scalar_lea.vmem %s102_s28, 10240  ;;  %p4382_p0 = scmp.lt.s32.totalorder %s102_s28, %s102_s28 }
  0x3e   :  { %p4378_p13 = scmp.ne.s32.totalorder %s102_s28, %s4377_s14  ;;  %p4383_p1 = scmp.lt.s32.totalorder %s4377_s14, %s4377_s14 }
  0x40   :  { %p4384_p2 = por %p4383_p1, %p4382_p0 }
  0x42   :  { %p4385_p3 = pnand %p4384_p2, %p4378_p13 }
  0x44   :  { %4388 = shalt.err (!%p4385_p3)
}
  0x45   :  { %s4539_s5 = smov 128   ;;  %s4540_s19 = smov 8  }
  0x46   :  { %107 = dma.hbm_to_vmem [thread:$0]  %s4920_s7, 10240, %s102_s28, [#allocation15], %s4539_s5, %s4539_s5, %s4540_s19  }
  0x47   :  { %s4541_s15 = smov [#allocation2]   ;;  %s4542_s17 = smov [#allocation7]  }
  0x48   :  { %s26_s16 = sshll.u32 %s4541_s15, 4  ;;  %s48_s18 = sshll.u32 %s4542_s17, 4  ;;  %s27_s16 = int_to_ptr.vmem [resolvable:$true] %s26_s16  ;;  %s49_s18 = int_to_ptr.vmem [resolvable:$true] %s48_s18 }
  0x49   :  { %s4389_s23 = scalar_lea.hbm %s4913_s0, 128 }
  0x4a   :  { %p4390_p4 = scmp.ne.s32.totalorder %s4913_s0, %s4389_s23  ;;  %p4393_p5 = scmp.lt.u32.totalorder %s4389_s23, %s4913_s0 }
  0x4c   :  { %p4395_p6 = pnand %p4393_p5, %p4390_p4 }
  0x4e   :  { %4398 = shalt.err (!%p4395_p6)
}
  0x4f   :  { %s4399_s7 = scalar_lea.vmem %s27_s16, 128  ;;  %p4404_p8 = scmp.lt.s32.totalorder %s27_s16, %s27_s16 }
  0x50   :  { %p4400_p7 = scmp.ne.s32.totalorder %s27_s16, %s4399_s7  ;;  %p4405_p9 = scmp.lt.s32.totalorder %s4399_s7, %s4399_s7 }
  0x52   :  { %p4406_p10 = por %p4405_p9, %p4404_p8 }
  0x54   :  { %p4407_p11 = pnand %p4406_p10, %p4400_p7 }
  0x56   :  { %4410 = shalt.err (!%p4407_p11)
}
  0x57   :  { %29 = dma.hbm_to_vmem [thread:$0]  %s4913_s0, 128, %s27_s16, [#allocation3]  }
  0x58   :  { %s4411_s12 = scalar_lea.hbm %s4915_s2, 80 }
  0x59   :  { %p4412_p12 = scmp.ne.s32.totalorder %s4915_s2, %s4411_s12  ;;  %p4415_p13 = scmp.lt.u32.totalorder %s4411_s12, %s4915_s2 }
  0x5b   :  { %p4417_p0 = pnand %p4415_p13, %p4412_p12 }
  0x5d   :  { %4420 = shalt.err (!%p4417_p0)
}
  0x5e   :  { %s4421_s5 = scalar_lea.vmem %s49_s18, 80  ;;  %s4425_s19 = scalar_lea.vmem %s49_s18, 96 }
  0x5f   :  { %p4422_p1 = scmp.ne.s32.totalorder %s49_s18, %s4421_s5  ;;  %p4426_p2 = scmp.lt.s32.totalorder %s49_s18, %s49_s18 }
  0x60   :  { %p4427_p3 = scmp.lt.s32.totalorder %s4425_s19, %s4421_s5 }
  0x62   :  { %p4428_p4 = por %p4427_p3, %p4426_p2 }
  0x64   :  { %p4429_p5 = pnand %p4428_p4, %p4422_p1 }
  0x66   :  { %4432 = shalt.err (!%p4429_p5)
}
  0x67   :  { %51 = dma.hbm_to_vmem [thread:$0]  %s4915_s2, 80, %s49_s18, [#allocation6]  }
  0x68   :  { %s4543_s26 = smov [#allocation10]   ;;  %s4544_s16 = smov [#allocation13]  }
  0x69   :  { %s70_s15 = sshll.u32 %s4543_s26, 4  ;;  %s92_s17 = sshll.u32 %s4544_s16, 4  ;;  %s71_s15 = int_to_ptr.vmem [resolvable:$true] %s70_s15  ;;  %s93_s17 = int_to_ptr.vmem [resolvable:$true] %s92_s17 }
  0x6a   :  { %s4433_s23 = scalar_lea.hbm %s4917_s4, 80 }
  0x6b   :  { %p4434_p6 = scmp.ne.s32.totalorder %s4917_s4, %s4433_s23  ;;  %p4437_p7 = scmp.lt.u32.totalorder %s4433_s23, %s4917_s4 }
  0x6d   :  { %p4439_p8 = pnand %p4437_p7, %p4434_p6 }
  0x6f   :  { %4442 = shalt.err (!%p4439_p8)
}
  0x70   :  { %s4443_s2 = scalar_lea.vmem %s71_s15, 80  ;;  %s4447_s18 = scalar_lea.vmem %s71_s15, 96 }
  0x71   :  { %p4444_p9 = scmp.ne.s32.totalorder %s71_s15, %s4443_s2  ;;  %p4448_p10 = scmp.lt.s32.totalorder %s71_s15, %s71_s15 }
  0x72   :  { %p4449_p11 = scmp.lt.s32.totalorder %s4447_s18, %s4443_s2 }
  0x74   :  { %p4450_p12 = por %p4449_p11, %p4448_p10 }
  0x76   :  { %p4451_p13 = pnand %p4450_p12, %p4444_p9 }
  0x78   :  { %4454 = shalt.err (!%p4451_p13)
}
  0x79   :  { %73 = dma.hbm_to_vmem [thread:$0]  %s4917_s4, 80, %s71_s15, [#allocation9]  }
  0x7a   :  { %s4455_s11 = scalar_lea.hbm %s4919_s6, 80 }
  0x7b   :  { %p4456_p0 = scmp.ne.s32.totalorder %s4919_s6, %s4455_s11  ;;  %p4459_p1 = scmp.lt.u32.totalorder %s4455_s11, %s4919_s6 }
  0x7d   :  { %p4461_p2 = pnand %p4459_p1, %p4456_p0 }
  0x7f   :  { %4464 = shalt.err (!%p4461_p2)
}
  0x80   :  { %s4465_s14 = scalar_lea.vmem %s93_s17, 80  ;;  %s4469_s5 = scalar_lea.vmem %s93_s17, 96 }
  0x81   :  { %p4466_p3 = scmp.ne.s32.totalorder %s93_s17, %s4465_s14  ;;  %p4470_p4 = scmp.lt.s32.totalorder %s93_s17, %s93_s17 }
  0x82   :  { %p4471_p5 = scmp.lt.s32.totalorder %s4469_s5, %s4465_s14 }
  0x84   :  { %p4472_p6 = por %p4471_p5, %p4470_p4 }
  0x86   :  { %p4473_p7 = pnand %p4472_p6, %p4466_p3 }
  0x88   :  { %4476 = shalt.err (!%p4473_p7)
}
  0x89   :  { %95 = dma.hbm_to_vmem [thread:$0]  %s4919_s6, 80, %s93_s17, [#allocation12]  }
  0x8a   :  { %s4545_s0 = smov [#allocation16]   ;;  %s4477_s16 = scalar_lea.hbm %s4921_s8, 16 }
  0x8b   :  { %s114_s20 = sshll.u32 %s4545_s0, 4  ;;  %p4478_p8 = scmp.ne.s32.totalorder %s4921_s8, %s4477_s16  ;;  %s115_s20 = int_to_ptr.vmem [resolvable:$true] %s114_s20 }
  0x8c   :  { %p4481_p9 = scmp.lt.u32.totalorder %s4477_s16, %s4921_s8 }
  0x8e   :  { %p4483_p10 = pnand %p4481_p9, %p4478_p8 }
  0x90   :  { %4486 = shalt.err (!%p4483_p10)
}
  0x91   :  { %s4487_s3 = scalar_lea.vmem %s115_s20, 16  ;;  %s4491_s6 = scalar_lea.vmem %s115_s20, 32 }
  0x92   :  { %p4488_p11 = scmp.ne.s32.totalorder %s115_s20, %s4487_s3  ;;  %p4492_p12 = scmp.lt.s32.totalorder %s115_s20, %s115_s20 }
  0x93   :  { %p4493_p13 = scmp.lt.s32.totalorder %s4491_s6, %s4487_s3 }
  0x95   :  { %p4494_p0 = por %p4493_p13, %p4492_p12 }
  0x97   :  { %p4495_p1 = pnand %p4494_p0, %p4488_p11 }
  0x99   :  { %4498 = shalt.err (!%p4495_p1)
}
  0x9a   :  { %117 = dma.hbm_to_vmem [thread:$0]  %s4921_s8, 16, %s115_s20, [#allocation15]  }
  0x9b   :  { %4521 = dma.done.wait [#allocation3], 128  }
  0x9c   :  { %4522 = vsyncadd [#allocation3], 4294967168 }
  0x9d   :  { %4523 = dma.done.wait [#allocation6], 5200  }
  0x9e   :  { %4524 = vsyncadd [#allocation6], 4294962096 }
  0x9f   :  { %4525 = dma.done.wait [#allocation9], 51280  }
  0xa0   :  { %4526 = vsyncadd [#allocation9], 4294916016 }
  0xa1   :  { %4527 = dma.done.wait [#allocation12], 51280  }
  0xa2   :  { %4528 = vsyncadd [#allocation12], 4294916016 }
  0xa3   :  { %4529 = dma.done.wait [#allocation15], 10256  }
  0xa4   :  { %4530 = vsyncadd [#allocation15], 4294957040  ;;  %v4546_v0 = vmov 0.0   ;;  %v147_v1 = vld [vmem:[#allocation5 + $0x8] sm:$0xff]  ;;  %v152_v2 = vld [vmem:[#allocation5 + $0x30] sm:$0xff]  ;;  %vm217_vm0 = vcmask 1043456  }
  0xa5   :  { %297 = vmatprep.mubr.f32.mxu0 %v4546_v0  ;;  %368 = vmatprep.mubr.f32.mxu1 %v4546_v0  ;;  %v146_v3 = vld [vmem:[#allocation5] sm:$0xff]  ;;  %v3306_v4 = vpack.c.bf16 %v152_v2, %v147_v1  ;;  %v151_v5 = vld [vmem:[#allocation5 + $0x28] sm:$0xff]  ;;  %v157_v6 = vld [vmem:[#allocation5 + $0x58] sm:$0xff]  ;;  %vm4547_vm1 = vmmov 1   ;;  %vm213_vm3 = vcmask 490496   ;;  %v4548_v55 = vmov 0.0|0.0  }
  0xa6   :  { %v162_v7 = vld [vmem:[#allocation5 + $0x80] sm:$0xff]  ;;  %v3308_v8 = vpack.c.bf16 %v151_v5, %v146_v3  ;;  %v156_v10 = vld [vmem:[#allocation5 + $0x50] sm:$0xff]  ;;  %v161_v11 = vld [vmem:[#allocation5 + $0x78] sm:$0xff]  ;;  %vm4549_vm4 = vmmov 0   ;;  %s4550_s8 = smov [#allocation17]  }
  0xa7   :  { %v3310_v9 = vpack.c.bf16 %v162_v7, %v157_v6  ;;  %v167_v12 = vld [vmem:[#allocation5 + $0xa8] sm:$0xff]  ;;  %3307 = vmatprep.subr.bf16.mxu0 %v3306_v4  ;;  %v172_v13 = vld [vmem:[#allocation5 + $0xd0] sm:$0xff]  ;;  %v3312_v14 = vpack.c.bf16 %v161_v11, %v156_v10  ;;  %v166_v15 = vld [vmem:[#allocation5 + $0xa0] sm:$0xff]  ;;  %s2890_s27 = sshll.u32 %s4550_s8, 4  ;;  %s2891_s27 = int_to_ptr.vmem [resolvable:$true] %s2890_s27 }
  0xa8   :  { %3309 = vmatpush1.bf16.msra.mxu0 %v3308_v8  ;;  %v171_v16 = vld [vmem:[#allocation5 + $0xc8] sm:$0xff]  ;;  %v3314_v17 = vpack.c.bf16 %v172_v13, %v167_v12  ;;  %v177_v18 = vld [vmem:[#allocation5 + $0xf8] sm:$0xff]  ;;  %v182_v19 = vld [vmem:[#allocation5 + $0x120] sm:$0xf]  ;;  %s4499_s2 = scalar_lea.vmem %s2891_s27, 128  ;;  %p4504_p3 = scmp.lt.s32.totalorder %s2891_s27, %s2891_s27 }
  0xa9   :  { %3311 = vmatprep.subr.bf16.mxu0 %v3310_v9  ;;  %v149_v20 = vld [vmem:[#allocation5 + $0x18] sm:$0xff]  ;;  %v154_v21 = vld [vmem:[#allocation5 + $0x40] sm:$0xff]  ;;  %v148_v22 = vld [vmem:[#allocation5 + $0x10] sm:$0xff]  ;;  %v3316_v29 = vpack.c.bf16 %v171_v16, %v166_v15  ;;  %v3318_v34 = vpack.c.bf16 %v182_v19, %v177_v18  ;;  %p4500_p2 = scmp.ne.s32.totalorder %s2891_s27, %s4499_s2  ;;  %p4505_p4 = scmp.lt.s32.totalorder %s4499_s2, %s4499_s2 }
  0xaa   :  { %v153_v23 = vld [vmem:[#allocation5 + $0x38] sm:$0xff]  ;;  %v3324_v24 = vpack.c.bf16 %v154_v21, %v149_v20  ;;  %v159_v26 = vld [vmem:[#allocation5 + $0x68] sm:$0xff]  ;;  %v164_v27 = vld [vmem:[#allocation5 + $0x90] sm:$0xff] }
  0xab   :  { %v3326_v25 = vpack.c.bf16 %v153_v23, %v148_v22  ;;  %v158_v28 = vld [vmem:[#allocation5 + $0x60] sm:$0xff]  ;;  %v3328_v30 = vpack.c.bf16 %v164_v27, %v159_v26  ;;  %v163_v31 = vld [vmem:[#allocation5 + $0x88] sm:$0xff]  ;;  %v169_v32 = vld [vmem:[#allocation5 + $0xb8] sm:$0xff]  ;;  %p4506_p5 = por %p4505_p4, %p4504_p3 }
  0xac   :  { %3313 = vmatpush1.bf16.msra.mxu0 %v3312_v14  ;;  %v174_v33 = vld [vmem:[#allocation5 + $0xe0] sm:$0xff]  ;;  %v176_v35 = vld [vmem:[#allocation5 + $0xf0] sm:$0xff]  ;;  %v181_v36 = vld [vmem:[#allocation5 + $0x118] sm:$0xf]  ;;  %3325 = vmatprep.subr.bf16.mxu1 %v3324_v24  ;;  %v3330_v38 = vpack.c.bf16 %v163_v31, %v158_v28 }
  0xad   :  { %3315 = vmatprep.subr.bf16.mxu0 %v3314_v17  ;;  %vm4721_vm2 = vmpackc.low %vm217_vm0, %vm4547_vm1  ;;  %3327 = vmatpush1.bf16.msra.mxu1 %v3326_v25  ;;  %v3332_v39 = vpack.c.bf16 %v174_v33, %v169_v32  ;;  %v168_v40 = vld [vmem:[#allocation5 + $0xb0] sm:$0xff]  ;;  %v173_v41 = vld [vmem:[#allocation5 + $0xd8] sm:$0xff]  ;;  %v3321_v42 = vpack.c.bf16 %v181_v36, %v176_v35  ;;  %p4507_p6 = pnand %p4506_p5, %p4500_p2 }
  0xae   :  { %3329 = vmatprep.subr.bf16.mxu1 %v3328_v30  ;;  %v179_v43 = vld [vmem:[#allocation5 + $0x108] sm:$0xff]  ;;  %v184_v44 = vld [vmem:[#allocation5 + $0x130] sm:$0xf]  ;;  %v150_v45 = vld [vmem:[#allocation5 + $0x20] sm:$0xff]  ;;  %v3334_v47 = vpack.c.bf16 %v173_v41, %v168_v40 }
  0xaf   :  { %v155_v46 = vld [vmem:[#allocation5 + $0x48] sm:$0xff]  ;;  %v3336_v48 = vpack.c.bf16 %v184_v44, %v179_v43  ;;  %v178_v49 = vld [vmem:[#allocation5 + $0x100] sm:$0xff]  ;;  %v4729_v51 = vld [vmem:[#allocation2] sm:$0xff] }
  0xb0   :  { %3317 = vmatpush1.bf16.msra.mxu0 %v3316_v29  ;;  %v183_v50 = vld [vmem:[#allocation5 + $0x128] sm:$0xf]  ;;  %v3343_v52 = vpack.c.bf16 %v155_v46, %v150_v45  ;;  %v451_v53 = vld [vmem:[#allocation8 + $0x8] sm:$0xff]  ;;  %v456_v54 = vld [vmem:[#allocation8 + $0x30] sm:$0xff] }
  0xb1   :  { %3320 = vmatprep.subr.msk.bf16.mxu0 %vm4721_vm2, %v3318_v34  ;;  %3331 = vmatpush1.bf16.msra.mxu1 %v3330_v38  ;;  %v160_v56 = vld [vmem:[#allocation5 + $0x70] sm:$0xff]  ;;  %v165_v57 = vld [vmem:[#allocation5 + $0x98] sm:$0xff]  ;;  %v3339_v58 = vpack.c.bf16 %v183_v50, %v178_v49  ;;  %v3355_v59 = vpack.c.bf16 %v456_v54, %v451_v53  ;;  %v450_v60 = vld [vmem:[#allocation8] sm:$0xff] }
  0xb2   :  { %3333 = vmatprep.subr.bf16.mxu1 %v3332_v39  ;;  %v455_v61 = vld [vmem:[#allocation8 + $0x28] sm:$0xff]  ;;  %v3346_v62 = vpack.c.bf16 %v165_v57, %v160_v56  ;;  %v461_v63 = vld [vmem:[#allocation8 + $0x58] sm:$0xff]  ;;  %v466_v1 = vld [vmem:[#allocation8 + $0x80] sm:$0xff] }
  0xb3   :  { %v170_v2 = vld [vmem:[#allocation5 + $0xc0] sm:$0xff]  ;;  %v175_v3 = vld [vmem:[#allocation5 + $0xe8] sm:$0xff]  ;;  %v3357_v4 = vpack.c.bf16 %v455_v61, %v450_v60  ;;  %v3359_v5 = vpack.c.bf16 %v466_v1, %v461_v63  ;;  %v460_v6 = vld [vmem:[#allocation8 + $0x50] sm:$0xff] }
  0xb4   :  { %3323 = vmatpush1.bf16.msk.msra.mxu0 %vm4721_vm2, %v3321_v42  ;;  %v465_v7 = vld [vmem:[#allocation8 + $0x78] sm:$0xff]  ;;  %v3349_v8 = vpack.c.bf16 %v175_v3, %v170_v2  ;;  %v471_v9 = vld [vmem:[#allocation8 + $0xa8] sm:$0xff]  ;;  %v476_v10 = vld [vmem:[#allocation8 + $0xd0] sm:$0xff] }
  0xb5   :  { %3342 = vmatprep.subr.bf16.mxu0 %v4548_v55  ;;  %3335 = vmatpush1.bf16.msra.mxu1 %v3334_v47  ;;  %v180_v11 = vld [vmem:[#allocation5 + $0x110] sm:$0xff]  ;;  %v185_v12 = vld [vmem:[#allocation5 + $0x138] sm:$0xf]  ;;  %v453_v13 = vld [vmem:[#allocation8 + $0x18] sm:$0xff]  ;;  %v3361_v15 = vpack.c.bf16 %v465_v7, %v460_v6  ;;  %v3363_v16 = vpack.c.bf16 %v476_v10, %v471_v9 }
  0xb6   :  { %3338 = vmatprep.subr.msk.bf16.mxu1 %vm4721_vm2, %v3336_v48  ;;  %v458_v14 = vld [vmem:[#allocation8 + $0x40] sm:$0xff]  ;;  %v475_v18 = vld [vmem:[#allocation8 + $0xc8] sm:$0xff]  ;;  %v3352_v19 = vpack.c.bf16 %v185_v12, %v180_v11  ;;  %v481_v20 = vld [vmem:[#allocation8 + $0xf8] sm:$0xff] }
  0xb7   :  { %2905 = vmatmul.mubr.msk.f32.vlgmr.msra.gmra.mrb[0].mxu0 %vm213_vm3, %v4729_v51  ;;  %v470_v17 = vld [vmem:[#allocation8 + $0xa0] sm:$0xff]  ;;  %v3515_v22 = vpack.c.bf16 %v458_v14, %v453_v13  ;;  %v452_v23 = vld [vmem:[#allocation8 + $0x10] sm:$0xff]  ;;  %v457_v24 = vld [vmem:[#allocation8 + $0x38] sm:$0xff] }
  0xb8   :  { %3344 = vmatpush3.bf16.msra.mxu0 %v3343_v52  ;;  %3198 = vmatprep.mubr.msk.f32.mxu0 %vm4549_vm4, %v4546_v0  ;;  %v486_v21 = vld [vmem:[#allocation8 + $0x120] sm:$0xff]  ;;  %v463_v25 = vld [vmem:[#allocation8 + $0x68] sm:$0xff]  ;;  %v468_v26 = vld [vmem:[#allocation8 + $0x90] sm:$0xff]  ;;  %v3365_v27 = vpack.c.bf16 %v475_v18, %v470_v17  ;;  %v3517_v31 = vpack.c.bf16 %v457_v24, %v452_v23 }
  0xb9   :  { %3345 = vmatprep.subr.bf16.mxu0 %v4548_v55  ;;  %3341 = vmatpush1.bf16.msk.msra.mxu1 %vm4721_vm2, %v3339_v58  ;;  %v3367_v28 = vpack.c.bf16 %v486_v21, %v481_v20  ;;  %v480_v29 = vld [vmem:[#allocation8 + $0xf0] sm:$0xff]  ;;  %v485_v30 = vld [vmem:[#allocation8 + $0x118] sm:$0xff]  ;;  %v491_v32 = vld [vmem:[#allocation8 + $0x148] sm:$0xff]  ;;  %v3519_v34 = vpack.c.bf16 %v468_v26, %v463_v25 }
  0xba   :  { %3356 = vmatprep.subr.bf16.mxu1 %v3355_v59  ;;  %v496_v33 = vld [vmem:[#allocation8 + $0x170] sm:$0xff]  ;;  %v462_v35 = vld [vmem:[#allocation8 + $0x60] sm:$0xff]  ;;  %v467_v36 = vld [vmem:[#allocation8 + $0x88] sm:$0xff]  ;;  %v3369_v40 = vpack.c.bf16 %v485_v30, %v480_v29 }
  0xbb   :  { %v473_v38 = vld [vmem:[#allocation8 + $0xb8] sm:$0xff]  ;;  %v478_v39 = vld [vmem:[#allocation8 + $0xe0] sm:$0xff]  ;;  %v3371_v41 = vpack.c.bf16 %v496_v33, %v491_v32  ;;  %v495_v43 = vld [vmem:[#allocation8 + $0x168] sm:$0xff]  ;;  %v3521_v37 = vpack.c.bf16 %v467_v36, %v462_v35 }
  0xbc   :  { %3347 = vmatpush3.bf16.msra.mxu0 %v3346_v62  ;;  %2908 = vmatmul.mubr.msk.f32.vlgmr.msra.gmra.mrb[0].mxu1 %vm213_vm3, %v4729_v51  ;;  %v490_v42 = vld [vmem:[#allocation8 + $0x140] sm:$0xff]  ;;  %v501_v44 = vld [vmem:[#allocation8 + $0x198] sm:$0xff]  ;;  %v3523_v46 = vpack.c.bf16 %v478_v39, %v473_v38  ;;  %v472_v47 = vld [vmem:[#allocation8 + $0xb0] sm:$0xff] }
  0xbd   :  { %3348 = vmatprep.subr.bf16.mxu0 %v4548_v55  ;;  %3358 = vmatpush1.bf16.msra.mxu1 %v3357_v4  ;;  %v506_v45 = vld [vmem:[#allocation8 + $0x1c0] sm:$0xff]  ;;  %v477_v48 = vld [vmem:[#allocation8 + $0xd8] sm:$0xff]  ;;  %v483_v49 = vld [vmem:[#allocation8 + $0x108] sm:$0xff]  ;;  %v3373_v52 = vpack.c.bf16 %v495_v43, %v490_v42 }
  0xbe   :  { %3360 = vmatprep.subr.bf16.mxu1 %v3359_v5  ;;  %v488_v50 = vld [vmem:[#allocation8 + $0x130] sm:$0xff]  ;;  %v3375_v53 = vpack.c.bf16 %v506_v45, %v501_v44  ;;  %v3525_v56 = vpack.c.bf16 %v477_v48, %v472_v47  ;;  %v511_v57 = vld [vmem:[#allocation8 + $0x1e8] sm:$0xff]  ;;  %v482_v60 = vld [vmem:[#allocation8 + $0x100] sm:$0xff] }
  0xbf   :  { %v500_v54 = vld [vmem:[#allocation8 + $0x190] sm:$0xff]  ;;  %v3527_v59 = vpack.c.bf16 %v488_v50, %v483_v49  ;;  %v487_v61 = vld [vmem:[#allocation8 + $0x128] sm:$0xff]  ;;  %v493_v62 = vld [vmem:[#allocation8 + $0x158] sm:$0xff] }
  0xc0   :  { %3350 = vmatpush3.bf16.msra.mxu0 %v3349_v8  ;;  %v516_v58 = vld [vmem:[#allocation8 + $0x210] sm:$0xff]  ;;  %v498_v63 = vld [vmem:[#allocation8 + $0x180] sm:$0xff]  ;;  %v515_v4 = vld [vmem:[#allocation8 + $0x208] sm:$0xff]  ;;  %v3529_v5 = vpack.c.bf16 %v487_v61, %v482_v60 }
  0xc1   :  { %3351 = vmatprep.subr.bf16.mxu0 %v4548_v55  ;;  %3362 = vmatpush1.bf16.msra.mxu1 %v3361_v15  ;;  %v3379_v2 = vpack.c.bf16 %v516_v58, %v511_v57  ;;  %v510_v3 = vld [vmem:[#allocation8 + $0x1e0] sm:$0xff]  ;;  %v521_v6 = vld [vmem:[#allocation8 + $0x238] sm:$0xff]  ;;  %v3531_v8 = vpack.c.bf16 %v498_v63, %v493_v62  ;;  %v492_v9 = vld [vmem:[#allocation8 + $0x150] sm:$0xff] }
  0xc2   :  { %3364 = vmatprep.subr.bf16.mxu1 %v3363_v16  ;;  %v526_v7 = vld [vmem:[#allocation8 + $0x260] sm:$0xff]  ;;  %v497_v10 = vld [vmem:[#allocation8 + $0x178] sm:$0xff]  ;;  %v503_v11 = vld [vmem:[#allocation8 + $0x1a8] sm:$0xff]  ;;  %v3381_v13 = vpack.c.bf16 %v515_v4, %v510_v3 }
  0xc3   :  { %v508_v12 = vld [vmem:[#allocation8 + $0x1d0] sm:$0xff]  ;;  %v3383_v14 = vpack.c.bf16 %v526_v7, %v521_v6  ;;  %v525_v16 = vld [vmem:[#allocation8 + $0x258] sm:$0xff]  ;;  %v3533_v17 = vpack.c.bf16 %v497_v10, %v492_v9  ;;  %v531_v18 = vld [vmem:[#allocation8 + $0x288] sm:$0xff] }
  0xc4   :  { %3354 = vmatpush3.bf16.msk.msra.mxu0 %vm4721_vm2, %v3352_v19  ;;  %v520_v15 = vld [vmem:[#allocation8 + $0x230] sm:$0xff]  ;;  %v3535_v20 = vpack.c.bf16 %v508_v12, %v503_v11  ;;  %v502_v21 = vld [vmem:[#allocation8 + $0x1a0] sm:$0xff]  ;;  %v513_v23 = vld [vmem:[#allocation8 + $0x1f8] sm:$0xff] }
  0xc5   :  { %3516 = vmatprep.subr.bf16.mxu0 %v3515_v22  ;;  %3366 = vmatpush1.bf16.msra.mxu1 %v3365_v27  ;;  %v536_v19 = vld [vmem:[#allocation8 + $0x2b0] sm:$0xff]  ;;  %v507_v22 = vld [vmem:[#allocation8 + $0x1c8] sm:$0xff]  ;;  %v518_v24 = vld [vmem:[#allocation8 + $0x220] sm:$0xff]  ;;  %v3385_v25 = vpack.c.bf16 %v525_v16, %v520_v15 }
  0xc6   :  { %3368 = vmatprep.subr.bf16.mxu1 %v3367_v28  ;;  %v3387_v26 = vpack.c.bf16 %v536_v19, %v531_v18  ;;  %v530_v27 = vld [vmem:[#allocation8 + $0x280] sm:$0xff]  ;;  %v535_v28 = vld [vmem:[#allocation8 + $0x2a8] sm:$0xff]  ;;  %v3537_v29 = vpack.c.bf16 %v507_v22, %v502_v21  ;;  %v541_v30 = vld [vmem:[#allocation8 + $0x2d8] sm:$0xff]  ;;  %v3539_v32 = vpack.c.bf16 %v518_v24, %v513_v23 }
  0xc7   :  { %3199 = vmatmul.mubr.msk.f32.vlgmr.msra.gmra.mrb[2].mxu0 %vm213_vm3, %v4729_v51  ;;  %v505_v51 = vld [vmem:[#allocation8 + $0x1b8] sm:$0xff]  ;;  %v512_v33 = vld [vmem:[#allocation8 + $0x1f0] sm:$0xff]  ;;  %v523_v35 = vld [vmem:[#allocation8 + $0x248] sm:$0xff]  ;;  %v3389_v38 = vpack.c.bf16 %v535_v28, %v530_v27 }
  0xc8   :  { %3518 = vmatpush1.bf16.msra.mxu0 %v3517_v31  ;;  %v3377_v1 = vpack.c.bf16 %v505_v51, %v500_v54  ;;  %v546_v31 = vld [vmem:[#allocation8 + $0x300] sm:$0xff]  ;;  %v528_v36 = vld [vmem:[#allocation8 + $0x270] sm:$0xff]  ;;  %v551_v43 = vld [vmem:[#allocation8 + $0x328] sm:$0xff] }
  0xc9   :  { %3520 = vmatprep.subr.bf16.mxu0 %v3519_v34  ;;  %3370 = vmatpush1.bf16.msra.mxu1 %v3369_v40  ;;  %v517_v34 = vld [vmem:[#allocation8 + $0x218] sm:$0xff]  ;;  %v3391_v39 = vpack.c.bf16 %v546_v31, %v541_v30  ;;  %v540_v40 = vld [vmem:[#allocation8 + $0x2d0] sm:$0xff]  ;;  %v3543_v44 = vpack.c.bf16 %v528_v36, %v523_v35  ;;  %v522_v45 = vld [vmem:[#allocation8 + $0x240] sm:$0xff] }
  0xca   :  { %3372 = vmatprep.subr.bf16.mxu1 %v3371_v41  ;;  %v545_v41 = vld [vmem:[#allocation8 + $0x2f8] sm:$0xff]  ;;  %v3541_v42 = vpack.c.bf16 %v517_v34, %v512_v33  ;;  %v538_v48 = vld [vmem:[#allocation8 + $0x2c0] sm:$0xff]  ;;  %v532_v58 = vld [vmem:[#allocation8 + $0x290] sm:$0xff] }
  0xcb   :  { %v533_v47 = vld [vmem:[#allocation8 + $0x298] sm:$0xff]  ;;  %v3393_v49 = vpack.c.bf16 %v545_v41, %v540_v40  ;;  %v543_v60 = vld [vmem:[#allocation8 + $0x2e8] sm:$0xff]  ;;  %v548_v61 = vld [vmem:[#allocation8 + $0x310] sm:$0xff] }
  0xcc   :  { %3522 = vmatpush1.bf16.msra.mxu0 %v3521_v37  ;;  %v556_v37 = vld [vmem:[#allocation8 + $0x350] sm:$0xff]  ;;  %v561_v51 = vld [vmem:[#allocation8 + $0x378] sm:$0xff]  ;;  %v3547_v57 = vpack.c.bf16 %v538_v48, %v533_v47  ;;  %v571_v4 = vld [vmem:[#allocation8 + $0x3c8] sm:$0xff]  ;;  %v3551_v6 = vpack.c.bf16 %v548_v61, %v543_v60 }
  0xcd   :  { %3524 = vmatprep.subr.bf16.mxu0 %v3523_v46  ;;  %3374 = vmatpush1.bf16.msra.mxu1 %v3373_v52  ;;  %v527_v46 = vld [vmem:[#allocation8 + $0x268] sm:$0xff]  ;;  %v3395_v50 = vpack.c.bf16 %v556_v37, %v551_v43  ;;  %v550_v52 = vld [vmem:[#allocation8 + $0x320] sm:$0xff]  ;;  %v553_v9 = vld [vmem:[#allocation8 + $0x338] sm:$0xff] }
  0xce   :  { %3376 = vmatprep.subr.bf16.mxu1 %v3375_v53  ;;  %v555_v53 = vld [vmem:[#allocation8 + $0x348] sm:$0xff]  ;;  %v3545_v54 = vpack.c.bf16 %v527_v46, %v522_v45  ;;  %v542_v7 = vld [vmem:[#allocation8 + $0x2e0] sm:$0xff]  ;;  %v581_v16 = vld [vmem:[#allocation8 + $0x418] sm:$0xff] }
  0xcf   :  { %v3397_v62 = vpack.c.bf16 %v555_v53, %v550_v52  ;;  %v558_v10 = vld [vmem:[#allocation8 + $0x360] sm:$0xff]  ;;  %v552_v19 = vld [vmem:[#allocation8 + $0x330] sm:$0xff]  ;;  %v563_v21 = vld [vmem:[#allocation8 + $0x388] sm:$0xff] }
  0xd0   :  { %3526 = vmatpush1.bf16.msra.mxu0 %v3525_v56  ;;  %v566_v56 = vld [vmem:[#allocation8 + $0x3a0] sm:$0xff]  ;;  %v3555_v18 = vpack.c.bf16 %v558_v10, %v553_v9  ;;  %v568_v22 = vld [vmem:[#allocation8 + $0x3b0] sm:$0xff]  ;;  %v591_v28 = vld [vmem:[#allocation8 + $0x468] sm:$0xff] }
  0xd1   :  { %3528 = vmatprep.subr.bf16.mxu0 %v3527_v59  ;;  %3378 = vmatpush1.bf16.msra.mxu1 %v3377_v1  ;;  %v537_v59 = vld [vmem:[#allocation8 + $0x2b8] sm:$0xff]  ;;  %v3399_v63 = vpack.c.bf16 %v566_v56, %v561_v51  ;;  %v560_v1 = vld [vmem:[#allocation8 + $0x370] sm:$0xff]  ;;  %v3559_v30 = vpack.c.bf16 %v568_v22, %v563_v21  ;;  %v562_v31 = vld [vmem:[#allocation8 + $0x380] sm:$0xff] }
  0xd2   :  { %3380 = vmatprep.subr.bf16.mxu1 %v3379_v2  ;;  %v565_v2 = vld [vmem:[#allocation8 + $0x398] sm:$0xff]  ;;  %v3549_v3 = vpack.c.bf16 %v537_v59, %v532_v58  ;;  %v578_v34 = vld [vmem:[#allocation8 + $0x400] sm:$0xff]  ;;  %v583_v37 = vld [vmem:[#allocation8 + $0x428] sm:$0xff] }
  0xd3   :  { %v3401_v11 = vpack.c.bf16 %v565_v2, %v560_v1  ;;  %v573_v33 = vld [vmem:[#allocation8 + $0x3d8] sm:$0xff]  ;;  %v582_v48 = vld [vmem:[#allocation8 + $0x420] sm:$0xff]  ;;  %v592_v51 = vld [vmem:[#allocation8 + $0x470] sm:$0xff] }
  0xd4   :  { %3530 = vmatpush1.bf16.msra.mxu0 %v3529_v5  ;;  %v576_v5 = vld [vmem:[#allocation8 + $0x3f0] sm:$0xff]  ;;  %v3563_v41 = vpack.c.bf16 %v578_v34, %v573_v33  ;;  %v577_v43 = vld [vmem:[#allocation8 + $0x3f8] sm:$0xff]  ;;  %v598_v52 = vld [vmem:[#allocation8 + $0x4a0] sm:$0xff] }
  0xd5   :  { %3532 = vmatprep.subr.bf16.mxu0 %v3531_v8  ;;  %3382 = vmatpush1.bf16.msra.mxu1 %v3381_v13  ;;  %v547_v8 = vld [vmem:[#allocation8 + $0x308] sm:$0xff]  ;;  %v3403_v12 = vpack.c.bf16 %v576_v5, %v571_v4  ;;  %v570_v13 = vld [vmem:[#allocation8 + $0x3c0] sm:$0xff]  ;;  %v597_v56 = vld [vmem:[#allocation8 + $0x498] sm:$0xff] }
  0xd6   :  { %3384 = vmatprep.subr.bf16.mxu1 %v3383_v14  ;;  %v575_v14 = vld [vmem:[#allocation8 + $0x3e8] sm:$0xff]  ;;  %v3553_v15 = vpack.c.bf16 %v547_v8, %v542_v7  ;;  %v601_v58 = vld [vmem:[#allocation8 + $0x4b8] sm:$0xff]  ;;  %v606_v59 = vld [vmem:[#allocation8 + $0x4e0] sm:$0xff] }
  0xd7   :  { %v3405_v23 = vpack.c.bf16 %v575_v14, %v570_v13  ;;  %v603_v60 = vld [vmem:[#allocation8 + $0x4c8] sm:$0xff]  ;;  %v3415_v61 = vpack.c.bf16 %v606_v59, %v601_v58  ;;  %v605_v1 = vld [vmem:[#allocation8 + $0x4d8] sm:$0xff]  ;;  %v602_v4 = vld [vmem:[#allocation8 + $0x4c0] sm:$0xff]  ;;  %v188_v13 = vlaneseq }
  0xd8   :  { %3534 = vmatpush1.bf16.msra.mxu0 %v3533_v17  ;;  %v586_v17 = vld [vmem:[#allocation8 + $0x440] sm:$0xff]  ;;  %v607_v5 = vld [vmem:[#allocation8 + $0x4e8] sm:$0xff]  ;;  %v616_v8 = vld [vmem:[#allocation8 + $0x530] sm:$0xff] }
  0xd9   :  { %3536 = vmatprep.subr.bf16.mxu0 %v3535_v20  ;;  %3386 = vmatpush1.bf16.msra.mxu1 %v3385_v25  ;;  %v557_v20 = vld [vmem:[#allocation8 + $0x358] sm:$0xff]  ;;  %v3407_v24 = vpack.c.bf16 %v586_v17, %v581_v16  ;;  %v580_v25 = vld [vmem:[#allocation8 + $0x410] sm:$0xff]  ;;  %v611_v7 = vld [vmem:[#allocation8 + $0x508] sm:$0xff]  ;;  %v4749_v14 = vshrl.u32 %v188_v13, 7 }
  0xda   :  { %3388 = vmatprep.subr.bf16.mxu1 %v3387_v26  ;;  %v585_v26 = vld [vmem:[#allocation8 + $0x438] sm:$0xff]  ;;  %v3557_v27 = vpack.c.bf16 %v557_v20, %v552_v19  ;;  %v3419_v10 = vpack.c.bf16 %v616_v8, %v611_v7  ;;  %v610_v21 = vld [vmem:[#allocation8 + $0x500] sm:$0xff]  ;;  %v615_v22 = vld [vmem:[#allocation8 + $0x528] sm:$0xff] }
  0xdb   :  { %v3409_v35 = vpack.c.bf16 %v585_v26, %v580_v25  ;;  %v613_v9 = vld [vmem:[#allocation8 + $0x518] sm:$0xff]  ;;  %v4757_v17 = vsub.s32 1, %v4749_v14  ;;  %v612_v26 = vld [vmem:[#allocation8 + $0x510] sm:$0xff]  ;;  %v3421_v34 = vpack.c.bf16 %v615_v22, %v610_v21  ;;  %v642_v8 = vld [vmem:[#allocation8 + $0x600] sm:$0xff] }
  0xdc   :  { %3538 = vmatpush1.bf16.msra.mxu0 %v3537_v29  ;;  %v596_v29 = vld [vmem:[#allocation8 + $0x490] sm:$0xff]  ;;  %v4754_v16 = vld [vmem:[#allocation7] sm:$0x1f]  ;;  %v658_v13 = vld [vmem:[#allocation8 + $0x680] sm:$0xff] }
  0xdd   :  { %3540 = vmatprep.subr.bf16.mxu0 %v3539_v32  ;;  %3390 = vmatpush1.bf16.msra.mxu1 %v3389_v38  ;;  %v567_v32 = vld [vmem:[#allocation8 + $0x3a8] sm:$0xff]  ;;  %v3411_v36 = vpack.c.bf16 %v596_v29, %v591_v28  ;;  %v590_v38 = vld [vmem:[#allocation8 + $0x460] sm:$0xff]  ;;  %v195_v19 = vrot.slane %v4754_v16, %v4757_v17  ;;  %v621_v28 = vld [vmem:[#allocation8 + $0x558] sm:$0xff] }
  0xde   :  { %3392 = vmatprep.subr.bf16.mxu1 %v3391_v39  ;;  %v595_v39 = vld [vmem:[#allocation8 + $0x488] sm:$0xff]  ;;  %v3561_v40 = vpack.c.bf16 %v567_v32, %v562_v31  ;;  %v628_v32 = vld [vmem:[#allocation8 + $0x590] sm:$0xff]  ;;  %v637_v59 = vld [vmem:[#allocation8 + $0x5d8] sm:$0xff] }
  0xdf   :  { %v3413_v45 = vpack.c.bf16 %v595_v39, %v590_v38  ;;  %v623_v31 = vld [vmem:[#allocation8 + $0x568] sm:$0xff]  ;;  %v625_v38 = vld [vmem:[#allocation8 + $0x578] sm:$0xff]  ;;  %v632_v58 = vld [vmem:[#allocation8 + $0x5b0] sm:$0xff] }
  0xe0   :  { %3542 = vmatpush1.bf16.msra.mxu0 %v3541_v42  ;;  %v572_v42 = vld [vmem:[#allocation8 + $0x3d0] sm:$0xff]  ;;  %v655_v21 = vld [vmem:[#allocation8 + $0x668] sm:$0xff] }
  0xe1   :  { %3544 = vmatprep.subr.bf16.mxu0 %v3543_v44  ;;  %3394 = vmatpush1.bf16.msra.mxu1 %v3393_v49  ;;  %v588_v44 = vld [vmem:[#allocation8 + $0x450] sm:$0xff]  ;;  %v3565_v46 = vpack.c.bf16 %v577_v43, %v572_v42  ;;  %v587_v49 = vld [vmem:[#allocation8 + $0x448] sm:$0xff]  ;;  %v3583_v42 = vpack.c.bf16 %v628_v32, %v623_v31  ;;  %v622_v43 = vld [vmem:[#allocation8 + $0x560] sm:$0xff] }
  0xe2   :  { %3396 = vmatprep.subr.bf16.mxu1 %v3395_v50  ;;  %v3567_v47 = vpack.c.bf16 %v588_v44, %v583_v37  ;;  %v593_v50 = vld [vmem:[#allocation8 + $0x478] sm:$0xff]  ;;  %v3569_v53 = vpack.c.bf16 %v587_v49, %v582_v48  ;;  %v627_v37 = vld [vmem:[#allocation8 + $0x588] sm:$0xff]  ;;  %v668_v32 = vld [vmem:[#allocation8 + $0x6d0] sm:$0xff] }
  0xe3   :  { %v631_v44 = vld [vmem:[#allocation8 + $0x5a8] sm:$0xff] }
  0xe4   :  { %3546 = vmatpush1.bf16.msra.mxu0 %v3545_v54  ;;  %v3571_v54 = vpack.c.bf16 %v598_v52, %v593_v50  ;;  %v3585_v52 = vpack.c.bf16 %v627_v37, %v622_v43  ;;  %v663_v31 = vld [vmem:[#allocation8 + $0x6a8] sm:$0xff] }
  0xe5   :  { %3548 = vmatprep.subr.bf16.mxu0 %v3547_v57  ;;  %3398 = vmatpush1.bf16.msra.mxu1 %v3397_v62  ;;  %v3573_v57 = vpack.c.bf16 %v597_v56, %v592_v51  ;;  %v608_v62 = vld [vmem:[#allocation8 + $0x4f0] sm:$0xff]  ;;  %v667_v43 = vld [vmem:[#allocation8 + $0x6c8] sm:$0xff] }
  0xe6   :  { %3400 = vmatprep.subr.bf16.mxu1 %v3399_v63  ;;  %v600_v63 = vld [vmem:[#allocation8 + $0x4b0] sm:$0xff]  ;;  %v3575_v2 = vpack.c.bf16 %v608_v62, %v603_v60  ;;  %v641_v60 = vld [vmem:[#allocation8 + $0x5f8] sm:$0xff]  ;;  %v643_v62 = vld [vmem:[#allocation8 + $0x608] sm:$0xff] }
  0xe7   :  { %v671_v37 = vld [vmem:[#allocation8 + $0x6e8] sm:$0xff] }
  0xe8   :  { %3550 = vmatpush1.bf16.msra.mxu0 %v3549_v3  ;;  %v3417_v3 = vpack.c.bf16 %v605_v1, %v600_v63  ;;  %v648_v63 = vld [vmem:[#allocation8 + $0x630] sm:$0xff] }
  0xe9   :  { %3552 = vmatprep.subr.bf16.mxu0 %v3551_v6  ;;  %3402 = vmatpush1.bf16.msra.mxu1 %v3401_v11  ;;  %v3577_v6 = vpack.c.bf16 %v607_v5, %v602_v4  ;;  %v618_v11 = vld [vmem:[#allocation8 + $0x540] sm:$0xff]  ;;  %v640_v4 = vld [vmem:[#allocation8 + $0x5f0] sm:$0xff]  ;;  %v645_v5 = vld [vmem:[#allocation8 + $0x618] sm:$0xff]  ;;  %v3591_v7 = vpack.c.bf16 %v648_v63, %v643_v62 }
  0xea   :  { %3404 = vmatprep.subr.bf16.mxu1 %v3403_v12  ;;  %v3579_v12 = vpack.c.bf16 %v618_v11, %v613_v9  ;;  %v647_v9 = vld [vmem:[#allocation8 + $0x628] sm:$0xff]  ;;  %v656_v11 = vld [vmem:[#allocation8 + $0x670] sm:$0xff] }
  0xeb   :  { %v680_v63 = vld [vmem:[#allocation8 + $0x730] sm:$0xff] }
  0xec   :  { %3554 = vmatpush1.bf16.msra.mxu0 %v3553_v15  ;;  %v4752_v15 = vsub.s32 0, %v4749_v14 }
  0xed   :  { %3556 = vmatprep.subr.bf16.mxu0 %v3555_v18  ;;  %3406 = vmatpush1.bf16.msra.mxu1 %v3405_v23  ;;  %v4764_v23 = vsub.s32 3, %v4749_v14 }
  0xee   :  { %3408 = vmatprep.subr.bf16.mxu1 %v3407_v24  ;;  %v191_v18 = vrot.slane %v4754_v16, %v4752_v15 }
  0xef   :  { %v203_v39 = vrot.slane %v4754_v16, %v4764_v23 }
  0xf0   :  { %3558 = vmatpush1.bf16.msra.mxu0 %v3557_v27  ;;  %v617_v27 = vld [vmem:[#allocation8 + $0x538] sm:$0xff] }
  0xf1   :  { %3560 = vmatprep.subr.bf16.mxu0 %v3559_v30  ;;  %3410 = vmatpush1.bf16.msra.mxu1 %v3409_v35  ;;  %v626_v30 = vld [vmem:[#allocation8 + $0x580] sm:$0xff]  ;;  %v3581_v35 = vpack.c.bf16 %v617_v27, %v612_v26  ;;  %v652_v26 = vld [vmem:[#allocation8 + $0x650] sm:$0xff]  ;;  %v657_v27 = vld [vmem:[#allocation8 + $0x678] sm:$0xff] }
  0xf2   :  { %3412 = vmatprep.subr.bf16.mxu1 %v3411_v36  ;;  %v620_v36 = vld [vmem:[#allocation8 + $0x550] sm:$0xff] }
  0xf3   :  { %v3425_v50 = vpack.c.bf16 %v625_v38, %v620_v36  ;;  %v660_v36 = vld [vmem:[#allocation8 + $0x690] sm:$0xff]  ;;  %v665_v38 = vld [vmem:[#allocation8 + $0x6b8] sm:$0xff] }
  0xf4   :  { %3562 = vmatpush1.bf16.msra.mxu0 %v3561_v40 }
  0xf5   :  { %3564 = vmatprep.subr.bf16.mxu0 %v3563_v41  ;;  %3414 = vmatpush1.bf16.msra.mxu1 %v3413_v45  ;;  %v3423_v41 = vpack.c.bf16 %v626_v30, %v621_v28  ;;  %v636_v45 = vld [vmem:[#allocation8 + $0x5d0] sm:$0xff]  ;;  %v661_v28 = vld [vmem:[#allocation8 + $0x698] sm:$0xff]  ;;  %v666_v30 = vld [vmem:[#allocation8 + $0x6c0] sm:$0xff] }
  0xf6   :  { %3416 = vmatprep.subr.bf16.mxu1 %v3415_v61  ;;  %v3427_v56 = vpack.c.bf16 %v636_v45, %v631_v44  ;;  %v646_v61 = vld [vmem:[#allocation8 + $0x620] sm:$0xff]  ;;  %v676_v44 = vld [vmem:[#allocation8 + $0x710] sm:$0xff]  ;;  %v673_v45 = vld [vmem:[#allocation8 + $0x6f8] sm:$0xff] }
  0xf8   :  { %3566 = vmatpush1.bf16.msra.mxu0 %v3565_v46  ;;  %v633_v46 = vld [vmem:[#allocation8 + $0x5b8] sm:$0xff] }
  0xf9   :  { %3568 = vmatprep.subr.bf16.mxu0 %v3567_v47  ;;  %3418 = vmatpush1.bf16.msra.mxu1 %v3417_v3  ;;  %v638_v47 = vld [vmem:[#allocation8 + $0x5e0] sm:$0xff]  ;;  %v3589_v3 = vpack.c.bf16 %v637_v59, %v632_v58  ;;  %v683_v59 = vld [vmem:[#allocation8 + $0x748] sm:$0xff] }
  0xfa   :  { %3420 = vmatprep.subr.bf16.mxu1 %v3419_v10  ;;  %v651_v10 = vld [vmem:[#allocation8 + $0x648] sm:$0xff]  ;;  %v686_v58 = vld [vmem:[#allocation8 + $0x760] sm:$0xff] }
  0xfc   :  { %3570 = vmatpush1.bf16.msra.mxu0 %v3569_v53  ;;  %v630_v53 = vld [vmem:[#allocation8 + $0x5a0] sm:$0xff] }
  0xfd   :  { %3572 = vmatprep.subr.bf16.mxu0 %v3571_v54  ;;  %v635_v54 = vld [vmem:[#allocation8 + $0x5c8] sm:$0xff] }
 0x100   :  { %3574 = vmatpush1.bf16.msra.mxu0 %v3573_v57  ;;  %v3587_v57 = vpack.c.bf16 %v638_v47, %v633_v46  ;;  %v678_v46 = vld [vmem:[#allocation8 + $0x720] sm:$0xff]  ;;  %v3441_v47 = vpack.c.bf16 %v665_v38, %v660_v36  ;;  %v707_v38 = vld [vmem:[#allocation8 + $0x808] sm:$0xff] }
 0x101   :  { %3576 = vmatprep.subr.bf16.mxu0 %v3575_v2  ;;  %v3429_v2 = vpack.c.bf16 %v635_v54, %v630_v53  ;;  %v3443_v53 = vpack.c.bf16 %v676_v44, %v671_v37  ;;  %v3603_v54 = vpack.c.bf16 %v678_v46, %v673_v45  ;;  %v702_v36 = vld [vmem:[#allocation8 + $0x7e0] sm:$0xff]  ;;  %v715_v46 = vld [vmem:[#allocation8 + $0x848] sm:$0xff] }
 0x102   :  { %v3617_v44 = vpack.c.bf16 %v707_v38, %v702_v36  ;;  %v710_v45 = vld [vmem:[#allocation8 + $0x820] sm:$0xff]  ;;  %v753_v36 = vld [vmem:[#allocation8 + $0x978] sm:$0xff] }
 0x103   :  { %v758_v38 = vld [vmem:[#allocation8 + $0x9a0] sm:$0xff] }
 0x104   :  { %3578 = vmatpush1.bf16.msra.mxu0 %v3577_v6  ;;  %v3431_v6 = vpack.c.bf16 %v646_v61, %v641_v60  ;;  %v688_v60 = vld [vmem:[#allocation8 + $0x770] sm:$0xff] }
 0x105   :  { %3580 = vmatprep.subr.bf16.mxu0 %v3579_v12  ;;  %v653_v12 = vld [vmem:[#allocation8 + $0x658] sm:$0xff] }
 0x18a   :  { %v299_v20 = vpop.f32.mrb[0].mxu0 }
 0x18b   :  { %v300_v24 = vadd.f32 %v299_v20, %v191_v18  ;;  %v301_v25 = vpop.f32.mrb[1].mxu0  ;;  %v3433_v18 = vpack.c.bf16 %v645_v5, %v640_v4  ;;  %v650_v20 = vld [vmem:[#allocation8 + $0x640] sm:$0xff]  ;;  %v3607_v4 = vpack.c.bf16 %v688_v60, %v683_v59  ;;  %v720_v59 = vld [vmem:[#allocation8 + $0x870] sm:$0xff]  ;;  %v725_v60 = vld [vmem:[#allocation8 + $0x898] sm:$0xff] }
 0x18c   :  { %v302_v29 = vadd.f32 %v301_v25, %v195_v19  ;;  %v3593_v19 = vpack.c.bf16 %v647_v9, %v642_v8  ;;  %v3595_v25 = vpack.c.bf16 %v658_v13, %v653_v12  ;;  %v682_v5 = vld [vmem:[#allocation8 + $0x740] sm:$0xff]  ;;  %v696_v8 = vld [vmem:[#allocation8 + $0x7b0] sm:$0xff]  ;;  %v693_v9 = vld [vmem:[#allocation8 + $0x798] sm:$0xff] }
 0x18d   :  { %v4770_v40 = vmax.f32 %v300_v24, 0.0  ;;  %v3435_v24 = vpack.c.bf16 %v656_v11, %v651_v10  ;;  %v698_v10 = vld [vmem:[#allocation8 + $0x7c0] sm:$0xff] }
 0x18e   :  { %v4766_v33 = vmax.f32 %v302_v29, 0.0  ;;  %v690_v13 = vld [vmem:[#allocation8 + $0x780] sm:$0xff] }
 0x18f   :  { %v4774_v48 = vpop.f32.mrb[0].mxu1 }
 0x190   :  { %941 = vmatprep.mubr.f32.mxu1 %v4766_v33  ;;  %1154 = vmatprep.mubr.f32.mxu0 %v4766_v33  ;;  %v372_v49 = vpop.f32.mrb[1].mxu1 }
 0x191   :  { %942 = vmatmul.mubr.f32.vlgmr.msra.gmra.mrb[2].mxu1 %v4770_v40  ;;  %1155 = vmatmul.mubr.f32.vlgmr.msra.gmra.mrb[4].mxu0 %v4770_v40  ;;  %v373_v51 = vadd.f32 %v372_v49, %v203_v39  ;;  %v3439_v39 = vpack.c.bf16 %v666_v30, %v661_v28  ;;  %v708_v28 = vld [vmem:[#allocation8 + $0x810] sm:$0xff] }
 0x192   :  { %3422 = vmatpush1.bf16.msra.mxu1 %v3421_v34  ;;  %3582 = vmatpush1.bf16.msra.mxu0 %v3581_v35  ;;  %v3437_v34 = vpack.c.bf16 %v655_v21, %v650_v20  ;;  %v3597_v35 = vpack.c.bf16 %v657_v27, %v652_v26  ;;  %v3611_v20 = vpack.c.bf16 %v698_v10, %v693_v9  ;;  %v692_v21 = vld [vmem:[#allocation8 + $0x790] sm:$0xff]  ;;  %v706_v26 = vld [vmem:[#allocation8 + $0x800] sm:$0xff]  ;;  %v703_v27 = vld [vmem:[#allocation8 + $0x7e8] sm:$0xff] }
 0x193   :  { %3424 = vmatprep.subr.bf16.mxu1 %v3423_v41  ;;  %3584 = vmatprep.subr.bf16.mxu0 %v3583_v42  ;;  %v4778_v1 = vmax.f32 %v373_v51, 0.0  ;;  %v3599_v41 = vpack.c.bf16 %v668_v32, %v663_v31  ;;  %v662_v42 = vld [vmem:[#allocation8 + $0x6a0] sm:$0xff]  ;;  %v672_v51 = vld [vmem:[#allocation8 + $0x6f0] sm:$0xff]  ;;  %v705_v32 = vld [vmem:[#allocation8 + $0x7f8] sm:$0xff] }
 0x194   :  { %v3601_v49 = vpack.c.bf16 %v667_v43, %v662_v42  ;;  %v700_v31 = vld [vmem:[#allocation8 + $0x7d0] sm:$0xff]  ;;  %v713_v42 = vld [vmem:[#allocation8 + $0x838] sm:$0xff]  ;;  %v718_v43 = vld [vmem:[#allocation8 + $0x860] sm:$0xff] }
 0x195   :  { %1012 = vmatprep.mubr.f32.mxu1 %v4778_v1  ;;  %1225 = vmatprep.mubr.f32.mxu0 %v4778_v1  ;;  %v3457_v37 = vpack.c.bf16 %v705_v32, %v700_v31  ;;  %v730_v9 = vld [vmem:[#allocation8 + $0x8c0] sm:$0xff]  ;;  %v735_v10 = vld [vmem:[#allocation8 + $0x8e8] sm:$0xff] }
 0x196   :  { %3426 = vmatpush1.bf16.msra.mxu1 %v3425_v50  ;;  %3586 = vmatpush1.bf16.msra.mxu0 %v3585_v52  ;;  %v670_v50 = vld [vmem:[#allocation8 + $0x6e0] sm:$0xff]  ;;  %v675_v52 = vld [vmem:[#allocation8 + $0x708] sm:$0xff] }
 0x197   :  { %3428 = vmatprep.subr.bf16.mxu1 %v3427_v56  ;;  %3588 = vmatprep.subr.bf16.mxu0 %v3587_v57  ;;  %v677_v56 = vld [vmem:[#allocation8 + $0x718] sm:$0xff]  ;;  %v3445_v61 = vpack.c.bf16 %v675_v52, %v670_v50  ;;  %v712_v50 = vld [vmem:[#allocation8 + $0x830] sm:$0xff]  ;;  %v742_v31 = vld [vmem:[#allocation8 + $0x920] sm:$0xff] }
 0x198   :  { %v681_v57 = vld [vmem:[#allocation8 + $0x738] sm:$0xff]  ;;  %v3605_v62 = vpack.c.bf16 %v677_v56, %v672_v51  ;;  %v723_v51 = vld [vmem:[#allocation8 + $0x888] sm:$0xff]  ;;  %v728_v56 = vld [vmem:[#allocation8 + $0x8b0] sm:$0xff] }
 0x199   :  { %v717_v52 = vld [vmem:[#allocation8 + $0x858] sm:$0xff]  ;;  %v747_v32 = vld [vmem:[#allocation8 + $0x948] sm:$0xff] }
 0x19a   :  { %3430 = vmatpush1.bf16.msra.mxu1 %v3429_v2  ;;  %3590 = vmatpush1.bf16.msra.mxu0 %v3589_v3  ;;  %v4782_v22 = vpop.f32.mrb[2].mxu0  ;;  %v685_v2 = vld [vmem:[#allocation8 + $0x758] sm:$0xff]  ;;  %v3447_v3 = vpack.c.bf16 %v686_v58, %v681_v57  ;;  %v3461_v57 = vpack.c.bf16 %v715_v46, %v710_v45  ;;  %v3621_v58 = vpack.c.bf16 %v717_v52, %v712_v50  ;;  %v752_v46 = vld [vmem:[#allocation8 + $0x970] sm:$0xff]  ;;  %v766_v50 = vld [vmem:[#allocation8 + $0x9e0] sm:$0xff] }
 0x19b   :  { %3432 = vmatprep.subr.bf16.mxu1 %v3431_v6  ;;  %3592 = vmatprep.subr.bf16.mxu0 %v3591_v7  ;;  %v3200_v29 = vpop.f32.mrb[3].mxu0  ;;  %v687_v6 = vld [vmem:[#allocation8 + $0x768] sm:$0xff]  ;;  %v3449_v11 = vpack.c.bf16 %v685_v2, %v680_v63  ;;  %v722_v63 = vld [vmem:[#allocation8 + $0x880] sm:$0xff]  ;;  %v3635_v45 = vpack.c.bf16 %v758_v38, %v753_v36 }
 0x19c   :  { %v691_v7 = vld [vmem:[#allocation8 + $0x788] sm:$0xff]  ;;  %v3609_v12 = vpack.c.bf16 %v687_v6, %v682_v5  ;;  %v733_v5 = vld [vmem:[#allocation8 + $0x8d8] sm:$0xff]  ;;  %v738_v6 = vld [vmem:[#allocation8 + $0x900] sm:$0xff] }
 0x19d   :  { %v727_v2 = vld [vmem:[#allocation8 + $0x8a8] sm:$0xff]  ;;  %v798_v36 = vld [vmem:[#allocation8 + $0xae0] sm:$0xff] }
 0x19e   :  { %3434 = vmatpush1.bf16.msra.mxu1 %v3433_v18  ;;  %3594 = vmatpush1.bf16.msra.mxu0 %v3593_v19  ;;  %v695_v18 = vld [vmem:[#allocation8 + $0x7a8] sm:$0xff]  ;;  %v3451_v19 = vpack.c.bf16 %v696_v8, %v691_v7  ;;  %v3465_v7 = vpack.c.bf16 %v725_v60, %v720_v59  ;;  %v3625_v8 = vpack.c.bf16 %v727_v2, %v722_v63  ;;  %v776_v2 = vld [vmem:[#allocation8 + $0xa30] sm:$0xff] }
 0x19f   :  { %3436 = vmatprep.subr.bf16.mxu1 %v3435_v24  ;;  %3596 = vmatprep.subr.bf16.mxu0 %v3595_v25  ;;  %v697_v24 = vld [vmem:[#allocation8 + $0x7b8] sm:$0xff]  ;;  %v3453_v29 = vpack.c.bf16 %v695_v18, %v690_v13  ;;  %v732_v13 = vld [vmem:[#allocation8 + $0x8d0] sm:$0xff]  ;;  %v763_v52 = vld [vmem:[#allocation8 + $0x9c8] sm:$0xff] }
 0x1a0   :  { %v701_v25 = vld [vmem:[#allocation8 + $0x7d8] sm:$0xff]  ;;  %v3613_v30 = vpack.c.bf16 %v697_v24, %v692_v21  ;;  %v743_v21 = vld [vmem:[#allocation8 + $0x928] sm:$0xff]  ;;  %v748_v24 = vld [vmem:[#allocation8 + $0x950] sm:$0xff] }
 0x1a1   :  { %v737_v18 = vld [vmem:[#allocation8 + $0x8f8] sm:$0xff]  ;;  %v771_v63 = vld [vmem:[#allocation8 + $0xa08] sm:$0xff] }
 0x1a2   :  { %3438 = vmatpush1.bf16.msra.mxu1 %v3437_v34  ;;  %3598 = vmatpush1.bf16.msra.mxu0 %v3597_v35  ;;  %v3455_v34 = vpack.c.bf16 %v706_v26, %v701_v25  ;;  %v3615_v35 = vpack.c.bf16 %v708_v28, %v703_v27  ;;  %v3469_v25 = vpack.c.bf16 %v735_v10, %v730_v9  ;;  %v740_v27 = vld [vmem:[#allocation8 + $0x910] sm:$0xff]  ;;  %v745_v28 = vld [vmem:[#allocation8 + $0x938] sm:$0xff]  ;;  %v775_v9 = vld [vmem:[#allocation8 + $0xa28] sm:$0xff] }
 0x1a3   :  { %3440 = vmatprep.subr.bf16.mxu1 %v3439_v39  ;;  %3600 = vmatprep.subr.bf16.mxu0 %v3599_v41  ;;  %v711_v39 = vld [vmem:[#allocation8 + $0x828] sm:$0xff]  ;;  %v716_v41 = vld [vmem:[#allocation8 + $0x850] sm:$0xff]  ;;  %v3629_v26 = vpack.c.bf16 %v737_v18, %v732_v13  ;;  %v3483_v10 = vpack.c.bf16 %v776_v2, %v771_v63  ;;  %v777_v13 = vld [vmem:[#allocation8 + $0xa38] sm:$0xff] }
 0x1a4   :  { %v781_v18 = vld [vmem:[#allocation8 + $0xa58] sm:$0xff]  ;;  %v818_v2 = vld [vmem:[#allocation8 + $0xb80] sm:$0xff] }
 0x1a5   :  { %v813_v63 = vld [vmem:[#allocation8 + $0xb58] sm:$0xff] }
 0x1a6   :  { %3442 = vmatpush1.bf16.msra.mxu1 %v3441_v47  ;;  %3602 = vmatpush1.bf16.msra.mxu0 %v3601_v49  ;;  %v3459_v47 = vpack.c.bf16 %v716_v41, %v711_v39  ;;  %v3619_v49 = vpack.c.bf16 %v718_v43, %v713_v42  ;;  %v4785_v39 = vsub.s32 2, %v4749_v14  ;;  %v3473_v41 = vpack.c.bf16 %v745_v28, %v740_v27  ;;  %v750_v43 = vld [vmem:[#allocation8 + $0x960] sm:$0xff]  ;;  %v785_v27 = vld [vmem:[#allocation8 + $0xa78] sm:$0xff] }
 0x1a7   :  { %3444 = vmatprep.subr.bf16.mxu1 %v3443_v53  ;;  %3604 = vmatprep.subr.bf16.mxu0 %v3603_v54  ;;  %v721_v53 = vld [vmem:[#allocation8 + $0x878] sm:$0xff]  ;;  %v726_v54 = vld [vmem:[#allocation8 + $0x8a0] sm:$0xff]  ;;  %v3633_v42 = vpack.c.bf16 %v747_v32, %v742_v31  ;;  %v787_v31 = vld [vmem:[#allocation8 + $0xa88] sm:$0xff] }
 0x1a8   :  { %v791_v32 = vld [vmem:[#allocation8 + $0xaa8] sm:$0xff] }
 0x1aa   :  { %3446 = vmatpush1.bf16.msra.mxu1 %v3445_v61  ;;  %3606 = vmatpush1.bf16.msra.mxu0 %v3605_v62  ;;  %v3463_v61 = vpack.c.bf16 %v726_v54, %v721_v53  ;;  %v3623_v62 = vpack.c.bf16 %v728_v56, %v723_v51  ;;  %v768_v53 = vld [vmem:[#allocation8 + $0x9f0] sm:$0xff]  ;;  %v199_v54 = vrot.slane %v4754_v16, %v4785_v39 }
 0x1ab   :  { %3448 = vmatprep.subr.bf16.mxu1 %v3447_v3  ;;  %3608 = vmatprep.subr.bf16.mxu0 %v3607_v4  ;;  %v731_v3 = vld [vmem:[#allocation8 + $0x8c8] sm:$0xff]  ;;  %v736_v4 = vld [vmem:[#allocation8 + $0x8f0] sm:$0xff]  ;;  %v3639_v60 = vpack.c.bf16 %v768_v53, %v763_v52 }
 0x1ac   :  { %v808_v52 = vld [vmem:[#allocation8 + $0xb30] sm:$0xff] }
 0x1ae   :  { %3450 = vmatpush1.bf16.msra.mxu1 %v3449_v11  ;;  %3610 = vmatpush1.bf16.msra.mxu0 %v3609_v12  ;;  %v3467_v11 = vpack.c.bf16 %v736_v4, %v731_v3  ;;  %v3627_v12 = vpack.c.bf16 %v738_v6, %v733_v5  ;;  %v773_v3 = vld [vmem:[#allocation8 + $0xa18] sm:$0xff]  ;;  %v778_v4 = vld [vmem:[#allocation8 + $0xa40] sm:$0xff]  ;;  %v371_v5 = vadd.f32 %v4774_v48, %v199_v54 }
 0x1af   :  { %3452 = vmatprep.subr.bf16.mxu1 %v3451_v19  ;;  %3612 = vmatprep.subr.bf16.mxu0 %v3611_v20  ;;  %v741_v19 = vld [vmem:[#allocation8 + $0x918] sm:$0xff]  ;;  %v746_v20 = vld [vmem:[#allocation8 + $0x940] sm:$0xff] }
 0x1b2   :  { %3454 = vmatpush1.bf16.msra.mxu1 %v3453_v29  ;;  %3614 = vmatpush1.bf16.msra.mxu0 %v3613_v30  ;;  %v3471_v29 = vpack.c.bf16 %v746_v20, %v741_v19  ;;  %v3631_v30 = vpack.c.bf16 %v748_v24, %v743_v21  ;;  %v786_v19 = vld [vmem:[#allocation8 + $0xa80] sm:$0xff]  ;;  %v783_v20 = vld [vmem:[#allocation8 + $0xa68] sm:$0xff]  ;;  %v788_v21 = vld [vmem:[#allocation8 + $0xa90] sm:$0xff]  ;;  %v4790_v24 = vmax.f32 %v371_v5, 0.0 }
 0x1b3   :  { %3456 = vmatprep.subr.bf16.mxu1 %v3455_v34  ;;  %3616 = vmatprep.subr.bf16.mxu0 %v3615_v35  ;;  %v751_v34 = vld [vmem:[#allocation8 + $0x968] sm:$0xff]  ;;  %v756_v35 = vld [vmem:[#allocation8 + $0x990] sm:$0xff]  ;;  %v3487_v28 = vpack.c.bf16 %v786_v19, %v781_v18  ;;  %v810_v5 = vld [vmem:[#allocation8 + $0xb40] sm:$0xff] }
 0x1b4   :  { %v828_v18 = vld [vmem:[#allocation8 + $0xbd0] sm:$0xff] }
 0x1b6   :  { %3458 = vmatpush1.bf16.msra.mxu1 %v3457_v37  ;;  %3618 = vmatpush1.bf16.msra.mxu0 %v3617_v44  ;;  %v755_v37 = vld [vmem:[#allocation8 + $0x988] sm:$0xff]  ;;  %v3475_v44 = vpack.c.bf16 %v756_v35, %v751_v34  ;;  %v796_v34 = vld [vmem:[#allocation8 + $0xad0] sm:$0xff]  ;;  %v793_v35 = vld [vmem:[#allocation8 + $0xab8] sm:$0xff] }
 0x1b7   :  { %3460 = vmatprep.subr.bf16.mxu1 %v3459_v47  ;;  %3620 = vmatprep.subr.bf16.mxu0 %v3619_v49  ;;  %v757_v47 = vld [vmem:[#allocation8 + $0x998] sm:$0xff]  ;;  %v3477_v51 = vpack.c.bf16 %v755_v37, %v750_v43  ;;  %v795_v43 = vld [vmem:[#allocation8 + $0xac8] sm:$0xff]  ;;  %v3491_v37 = vpack.c.bf16 %v796_v34, %v791_v32  ;;  %v838_v32 = vld [vmem:[#allocation8 + $0xc20] sm:$0xff]  ;;  %v4797_v34 = vsub.s32 4, %v4749_v14 }
 0x1b8   :  { %v761_v49 = vld [vmem:[#allocation8 + $0x9b8] sm:$0xff]  ;;  %v3637_v56 = vpack.c.bf16 %v757_v47, %v752_v46 }
 0x1b9   :  { %v3479_v59 = vpack.c.bf16 %v766_v50, %v761_v49  ;;  %v797_v46 = vld [vmem:[#allocation8 + $0xad8] sm:$0xff]  ;;  %v806_v49 = vld [vmem:[#allocation8 + $0xb20] sm:$0xff]  ;;  %v803_v50 = vld [vmem:[#allocation8 + $0xb08] sm:$0xff]  ;;  %v207_v14 = vrot.slane %v4754_v16, %v4797_v34 }
 0x1ba   :  { %3462 = vmatpush1.bf16.msra.mxu1 %v3461_v57  ;;  %3622 = vmatpush1.bf16.msra.mxu0 %v3621_v58  ;;  %v760_v57 = vld [vmem:[#allocation8 + $0x9b0] sm:$0xff]  ;;  %v765_v58 = vld [vmem:[#allocation8 + $0x9d8] sm:$0xff] }
 0x1bb   :  { %3464 = vmatprep.subr.bf16.mxu1 %v3463_v61  ;;  %3624 = vmatprep.subr.bf16.mxu0 %v3623_v62  ;;  %v762_v61 = vld [vmem:[#allocation8 + $0x9c0] sm:$0xff]  ;;  %v767_v62 = vld [vmem:[#allocation8 + $0x9e8] sm:$0xff]  ;;  %v3481_v6 = vpack.c.bf16 %v765_v58, %v760_v57  ;;  %v801_v47 = vld [vmem:[#allocation8 + $0xaf8] sm:$0xff]  ;;  %v3655_v58 = vpack.c.bf16 %v808_v52, %v803_v50 }
 0x1bc   :  { %v3495_v57 = vpack.c.bf16 %v806_v49, %v801_v47  ;;  %v843_v47 = vld [vmem:[#allocation8 + $0xc48] sm:$0xff]  ;;  %v848_v49 = vld [vmem:[#allocation8 + $0xc70] sm:$0xff] }
 0x1be   :  { %3466 = vmatpush1.bf16.msra.mxu1 %v3465_v7  ;;  %3626 = vmatpush1.bf16.msra.mxu0 %v3625_v8  ;;  %v3641_v7 = vpack.c.bf16 %v767_v62, %v762_v61  ;;  %v770_v8 = vld [vmem:[#allocation8 + $0xa00] sm:$0xff]  ;;  %v811_v61 = vld [vmem:[#allocation8 + $0xb48] sm:$0xff]  ;;  %v816_v62 = vld [vmem:[#allocation8 + $0xb70] sm:$0xff] }
 0x1bf   :  { %3468 = vmatprep.subr.bf16.mxu1 %v3467_v11  ;;  %3628 = vmatprep.subr.bf16.mxu0 %v3627_v12  ;;  %v3643_v11 = vpack.c.bf16 %v778_v4, %v773_v3  ;;  %v772_v12 = vld [vmem:[#allocation8 + $0xa10] sm:$0xff]  ;;  %v3485_v48 = vpack.c.bf16 %v775_v9, %v770_v8  ;;  %v3659_v8 = vpack.c.bf16 %v818_v2, %v813_v63 }
 0x1c0   :  { %v812_v9 = vld [vmem:[#allocation8 + $0xb50] sm:$0xff]  ;;  %v442_v63 = vadd.f32 %v4782_v22, %v207_v14  ;;  %v489_v14 = vld [vmem:[#allocation8 + $0x138] sm:$0xff] }
 0x1c2   :  { %3470 = vmatpush1.bf16.msra.mxu1 %v3469_v25  ;;  %3630 = vmatpush1.bf16.msra.mxu0 %v3629_v26  ;;  %v3645_v25 = vpack.c.bf16 %v777_v13, %v772_v12  ;;  %v780_v26 = vld [vmem:[#allocation8 + $0xa50] sm:$0xff]  ;;  %v826_v12 = vld [vmem:[#allocation8 + $0xbc0] sm:$0xff]  ;;  %v823_v13 = vld [vmem:[#allocation8 + $0xba8] sm:$0xff] }
 0x1c3   :  { %3472 = vmatprep.subr.bf16.mxu1 %v3471_v29  ;;  %3632 = vmatprep.subr.bf16.mxu0 %v3631_v30  ;;  %v3647_v29 = vpack.c.bf16 %v788_v21, %v783_v20  ;;  %v782_v30 = vld [vmem:[#allocation8 + $0xa60] sm:$0xff]  ;;  %v3489_v38 = vpack.c.bf16 %v785_v27, %v780_v26  ;;  %v820_v21 = vld [vmem:[#allocation8 + $0xb90] sm:$0xff]  ;;  %v3663_v26 = vpack.c.bf16 %v828_v18, %v823_v13  ;;  %v709_v13 = vld [vmem:[#allocation8 + $0x818] sm:$0xff] }
 0x1c4   :  { %v822_v27 = vld [vmem:[#allocation8 + $0xba0] sm:$0xff] }
 0x1c6   :  { %3474 = vmatpush1.bf16.msra.mxu1 %v3473_v41  ;;  %3634 = vmatpush1.bf16.msra.mxu0 %v3633_v42  ;;  %v3649_v41 = vpack.c.bf16 %v787_v31, %v782_v30  ;;  %v790_v42 = vld [vmem:[#allocation8 + $0xaa0] sm:$0xff]  ;;  %v836_v30 = vld [vmem:[#allocation8 + $0xc10] sm:$0xff]  ;;  %v833_v31 = vld [vmem:[#allocation8 + $0xbf8] sm:$0xff] }
 0x1c7   :  { %3476 = vmatprep.subr.bf16.mxu1 %v3475_v44  ;;  %3636 = vmatprep.subr.bf16.mxu0 %v3635_v45  ;;  %v3651_v44 = vpack.c.bf16 %v798_v36, %v793_v35  ;;  %v792_v45 = vld [vmem:[#allocation8 + $0xab0] sm:$0xff]  ;;  %v3493_v53 = vpack.c.bf16 %v795_v43, %v790_v42  ;;  %v3667_v43 = vpack.c.bf16 %v838_v32, %v833_v31 }
 0x1c8   :  { %v3653_v54 = vpack.c.bf16 %v797_v46, %v792_v45  ;;  %v841_v45 = vld [vmem:[#allocation8 + $0xc38] sm:$0xff]  ;;  %v846_v46 = vld [vmem:[#allocation8 + $0xc60] sm:$0xff] }
 0x1ca   :  { %3478 = vmatpush1.bf16.msra.mxu1 %v3477_v51  ;;  %3638 = vmatpush1.bf16.msra.mxu0 %v3637_v56  ;;  %v800_v51 = vld [vmem:[#allocation8 + $0xaf0] sm:$0xff]  ;;  %v805_v56 = vld [vmem:[#allocation8 + $0xb18] sm:$0xff] }
 0x1cb   :  { %3480 = vmatprep.subr.bf16.mxu1 %v3479_v59  ;;  %3640 = vmatprep.subr.bf16.mxu0 %v3639_v60  ;;  %v802_v59 = vld [vmem:[#allocation8 + $0xb00] sm:$0xff]  ;;  %v807_v60 = vld [vmem:[#allocation8 + $0xb28] sm:$0xff]  ;;  %v3497_v3 = vpack.c.bf16 %v805_v56, %v800_v51  ;;  %v3511_v51 = vpack.c.bf16 %v846_v46, %v841_v45  ;;  %v3671_v56 = vpack.c.bf16 %v848_v49, %v843_v47  ;;  %v724_v45 = vld [vmem:[#allocation8 + $0x890] sm:$0xff] }
 0x1cc   :  { %v3657_v4 = vpack.c.bf16 %v807_v60, %v802_v59  ;;  %v534_v59 = vld [vmem:[#allocation8 + $0x2a0] sm:$0xff]  ;;  %v539_v60 = vld [vmem:[#allocation8 + $0x2c8] sm:$0xff]  ;;  %v729_v46 = vld [vmem:[#allocation8 + $0x8b8] sm:$0xff] }
 0x1ce   :  { %3482 = vmatpush1.bf16.msra.mxu1 %v3481_v6  ;;  %3642 = vmatpush1.bf16.msra.mxu0 %v3641_v7  ;;  %v815_v6 = vld [vmem:[#allocation8 + $0xb68] sm:$0xff]  ;;  %v3499_v7 = vpack.c.bf16 %v816_v62, %v811_v61  ;;  %v694_v61 = vld [vmem:[#allocation8 + $0x7a0] sm:$0xff] }
 0x1cf   :  { %3484 = vmatprep.subr.bf16.mxu1 %v3483_v10  ;;  %3644 = vmatprep.subr.bf16.mxu0 %v3643_v11  ;;  %v817_v10 = vld [vmem:[#allocation8 + $0xb78] sm:$0xff]  ;;  %v3501_v19 = vpack.c.bf16 %v815_v6, %v810_v5  ;;  %v699_v62 = vld [vmem:[#allocation8 + $0x7c8] sm:$0xff]  ;;  %v454_v5 = vld [vmem:[#allocation8 + $0x20] sm:$0xff] }
 0x1d0   :  { %v821_v11 = vld [vmem:[#allocation8 + $0xb98] sm:$0xff]  ;;  %v3661_v20 = vpack.c.bf16 %v817_v10, %v812_v9  ;;  %v459_v6 = vld [vmem:[#allocation8 + $0x48] sm:$0xff]  ;;  %v544_v9 = vld [vmem:[#allocation8 + $0x2f0] sm:$0xff]  ;;  %v4802_v10 = vmax.f32 %v442_v63, 0.0 }
 0x1d1   :  { %1013 = vmatmul.mubr.f32.vlgmr.msra.gmra.mrb[2].mxu1 %v4790_v24  ;;  %1226 = vmatmul.mubr.f32.vlgmr.msra.gmra.mrb[4].mxu0 %v4790_v24  ;;  %v3677_v22 = vpack.c.bf16 %v459_v6, %v454_v5  ;;  %v654_v63 = vld [vmem:[#allocation8 + $0x660] sm:$0xff]  ;;  %v744_v5 = vld [vmem:[#allocation8 + $0x930] sm:$0xff]  ;;  %v749_v6 = vld [vmem:[#allocation8 + $0x958] sm:$0xff] }
 0x1d2   :  { %3486 = vmatpush1.bf16.msra.mxu1 %v3485_v48  ;;  %3646 = vmatpush1.bf16.msra.mxu0 %v3645_v25  ;;  %v825_v48 = vld [vmem:[#allocation8 + $0xbb8] sm:$0xff]  ;;  %v3503_v25 = vpack.c.bf16 %v826_v12, %v821_v11  ;;  %v704_v12 = vld [vmem:[#allocation8 + $0x7f0] sm:$0xff] }
 0x1d3   :  { %3488 = vmatprep.subr.bf16.mxu1 %v3487_v28  ;;  %3648 = vmatprep.subr.bf16.mxu0 %v3647_v29  ;;  %v827_v28 = vld [vmem:[#allocation8 + $0xbc8] sm:$0xff]  ;;  %v3505_v35 = vpack.c.bf16 %v825_v48, %v820_v21  ;;  %v549_v11 = vld [vmem:[#allocation8 + $0x318] sm:$0xff]  ;;  %v624_v21 = vld [vmem:[#allocation8 + $0x570] sm:$0xff] }
 0x1d4   :  { %1083 = vmatprep.mubr.f32.mxu1 %v4546_v0  ;;  %1296 = vmatprep.mubr.f32.mxu0 %v4546_v0  ;;  %v831_v29 = vld [vmem:[#allocation8 + $0xbe8] sm:$0xff]  ;;  %v3665_v36 = vpack.c.bf16 %v827_v28, %v822_v27  ;;  %v3679_v48 = vpack.c.bf16 %v549_v11, %v544_v9  ;;  %v554_v27 = vld [vmem:[#allocation8 + $0x340] sm:$0xff]  ;;  %v504_v11 = vld [vmem:[#allocation8 + $0x1b0] sm:$0xff] }
 0x1d5   :  { %v3507_v42 = vpack.c.bf16 %v836_v30, %v831_v29  ;;  %v559_v28 = vld [vmem:[#allocation8 + $0x368] sm:$0xff]  ;;  %v714_v29 = vld [vmem:[#allocation8 + $0x840] sm:$0xff] }
 0x1d6   :  { %3490 = vmatpush1.bf16.msra.mxu1 %v3489_v38  ;;  %3650 = vmatpush1.bf16.msra.mxu0 %v3649_v41  ;;  %v830_v38 = vld [vmem:[#allocation8 + $0xbe0] sm:$0xff]  ;;  %v835_v41 = vld [vmem:[#allocation8 + $0xc08] sm:$0xff] }
 0x1d7   :  { %3492 = vmatprep.subr.bf16.mxu1 %v3491_v37  ;;  %3652 = vmatprep.subr.bf16.mxu0 %v3651_v44  ;;  %v832_v37 = vld [vmem:[#allocation8 + $0xbf0] sm:$0xff]  ;;  %v837_v44 = vld [vmem:[#allocation8 + $0xc18] sm:$0xff]  ;;  %v3509_v50 = vpack.c.bf16 %v835_v41, %v830_v38  ;;  %v719_v30 = vld [vmem:[#allocation8 + $0x868] sm:$0xff] }
 0x1d8   :  { %v3669_v52 = vpack.c.bf16 %v837_v44, %v832_v37  ;;  %v479_v38 = vld [vmem:[#allocation8 + $0xe8] sm:$0xff]  ;;  %v634_v41 = vld [vmem:[#allocation8 + $0x5c0] sm:$0xff]  ;;  %v564_v37 = vld [vmem:[#allocation8 + $0x390] sm:$0xff] }
 0x1d9   :  { %v569_v44 = vld [vmem:[#allocation8 + $0x3b8] sm:$0xff] }
 0x1da   :  { %3494 = vmatpush1.bf16.msra.mxu1 %v3493_v53  ;;  %3654 = vmatpush1.bf16.msra.mxu0 %v3653_v54  ;;  %v840_v53 = vld [vmem:[#allocation8 + $0xc30] sm:$0xff]  ;;  %v845_v54 = vld [vmem:[#allocation8 + $0xc58] sm:$0xff]  ;;  %v3687_v49 = vpack.c.bf16 %v569_v44, %v564_v37 }
 0x1db   :  { %3496 = vmatprep.subr.bf16.mxu1 %v3495_v57  ;;  %3656 = vmatprep.subr.bf16.mxu0 %v3655_v58  ;;  %v842_v57 = vld [vmem:[#allocation8 + $0xc40] sm:$0xff]  ;;  %v847_v58 = vld [vmem:[#allocation8 + $0xc68] sm:$0xff]  ;;  %v3513_v16 = vpack.c.bf16 %v845_v54, %v840_v53  ;;  %v649_v53 = vld [vmem:[#allocation8 + $0x638] sm:$0xff] }
 0x1dc   :  { %v3673_v2 = vpack.c.bf16 %v847_v58, %v842_v57  ;;  %v574_v54 = vld [vmem:[#allocation8 + $0x3e0] sm:$0xff]  ;;  %v739_v57 = vld [vmem:[#allocation8 + $0x908] sm:$0xff]  ;;  %v524_v44 = vld [vmem:[#allocation8 + $0x250] sm:$0xff] }
 0x1de   :  { %3498 = vmatpush1.bf16.msra.mxu1 %v3497_v3  ;;  %3658 = vmatpush1.bf16.msra.mxu0 %v3657_v4  ;;  %v3675_v3 = vpack.c.bf16 %v539_v60, %v534_v59  ;;  %v3707_v4 = vpack.c.bf16 %v699_v62, %v694_v61  ;;  %v494_v61 = vld [vmem:[#allocation8 + $0x160] sm:$0xff]  ;;  %v499_v62 = vld [vmem:[#allocation8 + $0x188] sm:$0xff] }
 0x1df   :  { %3500 = vmatprep.subr.bf16.mxu1 %v3499_v7  ;;  %3660 = vmatprep.subr.bf16.mxu0 %v3659_v8  ;;  %v614_v7 = vld [vmem:[#allocation8 + $0x520] sm:$0xff]  ;;  %v619_v8 = vld [vmem:[#allocation8 + $0x548] sm:$0xff] }
 0x1e0   :  { %v3709_v18 = vpack.c.bf16 %v619_v8, %v614_v7  ;;  %v3693_v7 = vpack.c.bf16 %v499_v62, %v494_v61  ;;  %v789_v61 = vld [vmem:[#allocation8 + $0xa98] sm:$0xff] }
 0x1e2   :  { %3502 = vmatpush1.bf16.msra.mxu1 %v3501_v19  ;;  %3662 = vmatpush1.bf16.msra.mxu0 %v3661_v20  ;;  %v464_v19 = vld [vmem:[#allocation8 + $0x70] sm:$0xff]  ;;  %v469_v20 = vld [vmem:[#allocation8 + $0x98] sm:$0xff] }
 0x1e3   :  { %3504 = vmatprep.subr.bf16.mxu1 %v3503_v25  ;;  %3664 = vmatprep.subr.bf16.mxu0 %v3663_v26  ;;  %v3711_v25 = vpack.c.bf16 %v709_v13, %v704_v12  ;;  %v629_v26 = vld [vmem:[#allocation8 + $0x598] sm:$0xff]  ;;  %v3681_v31 = vpack.c.bf16 %v469_v20, %v464_v19  ;;  %v664_v13 = vld [vmem:[#allocation8 + $0x6b0] sm:$0xff]  ;;  %v594_v19 = vld [vmem:[#allocation8 + $0x480] sm:$0xff] }
 0x1e4   :  { %v3713_v32 = vpack.c.bf16 %v629_v26, %v624_v21  ;;  %v509_v12 = vld [vmem:[#allocation8 + $0x1d8] sm:$0xff]  ;;  %v599_v20 = vld [vmem:[#allocation8 + $0x4a8] sm:$0xff]  ;;  %v754_v21 = vld [vmem:[#allocation8 + $0x980] sm:$0xff] }
 0x1e6   :  { %3506 = vmatpush1.bf16.msra.mxu1 %v3505_v35  ;;  %3666 = vmatpush1.bf16.msra.mxu0 %v3665_v36  ;;  %v3683_v35 = vpack.c.bf16 %v559_v28, %v554_v27  ;;  %v474_v36 = vld [vmem:[#allocation8 + $0xc0] sm:$0xff]  ;;  %v3699_v27 = vpack.c.bf16 %v599_v20, %v594_v19 }
 0x1e7   :  { %3508 = vmatprep.subr.bf16.mxu1 %v3507_v42  ;;  %3668 = vmatprep.subr.bf16.mxu0 %v3667_v43  ;;  %v3715_v42 = vpack.c.bf16 %v719_v30, %v714_v29  ;;  %v639_v43 = vld [vmem:[#allocation8 + $0x5e8] sm:$0xff]  ;;  %v3685_v47 = vpack.c.bf16 %v479_v38, %v474_v36  ;;  %v514_v28 = vld [vmem:[#allocation8 + $0x200] sm:$0xff]  ;;  %v609_v36 = vld [vmem:[#allocation8 + $0x4f8] sm:$0xff] }
 0x1e8   :  { %v519_v29 = vld [vmem:[#allocation8 + $0x228] sm:$0xff]  ;;  %v674_v30 = vld [vmem:[#allocation8 + $0x700] sm:$0xff]  ;;  %v764_v38 = vld [vmem:[#allocation8 + $0x9d0] sm:$0xff] }
 0x1ea   :  { %3510 = vmatpush1.bf16.msra.mxu1 %v3509_v50  ;;  %3670 = vmatpush1.bf16.msra.mxu0 %v3669_v52  ;;  %v644_v50 = vld [vmem:[#allocation8 + $0x610] sm:$0xff]  ;;  %v3719_v52 = vpack.c.bf16 %v729_v46, %v724_v45  ;;  %v529_v45 = vld [vmem:[#allocation8 + $0x278] sm:$0xff] }
 0x1eb   :  { %3512 = vmatprep.subr.bf16.mxu1 %v3511_v51  ;;  %3672 = vmatprep.subr.bf16.mxu0 %v3671_v56  ;;  %v579_v51 = vld [vmem:[#allocation8 + $0x408] sm:$0xff]  ;;  %v734_v56 = vld [vmem:[#allocation8 + $0x8e0] sm:$0xff]  ;;  %v3721_v59 = vpack.c.bf16 %v649_v53, %v644_v50 }
 0x1ec   :  { %v3691_v60 = vpack.c.bf16 %v579_v51, %v574_v54  ;;  %v779_v53 = vld [vmem:[#allocation8 + $0xa48] sm:$0xff] }
 0x1ed   :  { %v1518_v51 = vld [vmem:[#allocation11] sm:$0xff] }
 0x1ee   :  { %3514 = vmatpush1.bf16.msra.mxu1 %v3513_v16  ;;  %3674 = vmatpush1.bf16.msra.mxu0 %v3673_v2  ;;  %v3723_v16 = vpack.c.bf16 %v739_v57, %v734_v56  ;;  %v659_v2 = vld [vmem:[#allocation8 + $0x688] sm:$0xff] }
 0x1ef   :  { %3676 = vmatprep.subr.bf16.mxu1 %v3675_v3  ;;  %3708 = vmatprep.subr.bf16.mxu0 %v3707_v4  ;;  %v584_v3 = vld [vmem:[#allocation8 + $0x430] sm:$0xff]  ;;  %v589_v4 = vld [vmem:[#allocation8 + $0x458] sm:$0xff]  ;;  %v3725_v8 = vpack.c.bf16 %v659_v2, %v654_v63 }
 0x1f0   :  { %v3695_v9 = vpack.c.bf16 %v589_v4, %v584_v3  ;;  %v1523_v56 = vld [vmem:[#allocation11 + $0x28] sm:$0xff]  ;;  %v1533_v2 = vld [vmem:[#allocation11 + $0x78] sm:$0xff] }
 0x1f1   :  { %1084 = vmatmul.mubr.f32.vlgmr.msra.gmra.mrb[2].mxu1 %v4802_v10  ;;  %1297 = vmatmul.mubr.f32.vlgmr.msra.gmra.mrb[4].mxu0 %v4802_v10  ;;  %v3765_v62 = vpack.c.bf16 %v1523_v56, %v1518_v51  ;;  %v1539_v4 = vld [vmem:[#allocation11 + $0xa8] sm:$0xff]  ;;  %v1589_v56 = vld [vmem:[#allocation11 + $0x238] sm:$0xff] }
 0x1f2   :  { %3678 = vmatpush3.bf16.msra.mxu1 %v3677_v22  ;;  %1367 = vmatprep.mubr.f32.mxu1 %v4766_v33  ;;  %v3717_v33 = vpack.c.bf16 %v639_v43, %v634_v41  ;;  %v3727_v22 = vpack.c.bf16 %v749_v6, %v744_v5  ;;  %v769_v41 = vld [vmem:[#allocation8 + $0x9f8] sm:$0xff]  ;;  %v794_v6 = vld [vmem:[#allocation8 + $0xac0] sm:$0xff] }
 0x1f3   :  { %3710 = vmatpush3.bf16.msra.mxu0 %v3709_v18  ;;  %1437 = vmatprep.mubr.f32.mxu0 %v4778_v1  ;;  %v484_v1 = vld [vmem:[#allocation8 + $0x110] sm:$0xff]  ;;  %v669_v18 = vld [vmem:[#allocation8 + $0x6d8] sm:$0xff]  ;;  %v3735_v46 = vpack.c.bf16 %v769_v41, %v764_v38  ;;  %v1574_v41 = vld [vmem:[#allocation11 + $0x1c0] sm:$0xff] }
 0x1f4   :  { %3680 = vmatprep.subr.bf16.mxu1 %v3679_v48  ;;  %3712 = vmatprep.subr.bf16.mxu0 %v3711_v25  ;;  %v3689_v58 = vpack.c.bf16 %v489_v14, %v484_v1  ;;  %v759_v48 = vld [vmem:[#allocation8 + $0x9a8] sm:$0xff]  ;;  %v3697_v25 = vpack.c.bf16 %v509_v12, %v504_v11  ;;  %v3729_v26 = vpack.c.bf16 %v669_v18, %v664_v13  ;;  %v1524_v1 = vld [vmem:[#allocation11 + $0x30] sm:$0xff]  ;;  %v1569_v38 = vld [vmem:[#allocation11 + $0x198] sm:$0xff] }
 0x1f5   :  { %v3705_v14 = vpack.c.bf16 %v529_v45, %v524_v44  ;;  %v1544_v5 = vld [vmem:[#allocation11 + $0xd0] sm:$0xff]  ;;  %v1543_v11 = vld [vmem:[#allocation11 + $0xc8] sm:$0xff]  ;;  %v1554_v13 = vld [vmem:[#allocation11 + $0x120] sm:$0xff]  ;;  %v3783_v44 = vpack.c.bf16 %v1574_v41, %v1569_v38 }
 0x1f6   :  { %3682 = vmatpush3.bf16.msra.mxu1 %v3681_v31  ;;  %v3731_v31 = vpack.c.bf16 %v759_v48, %v754_v21  ;;  %v809_v18 = vld [vmem:[#allocation8 + $0xb38] sm:$0xff] }
 0x1f7   :  { %3714 = vmatpush3.bf16.msra.mxu0 %v3713_v32  ;;  %3684 = vmatprep.subr.bf16.mxu1 %v3683_v35  ;;  %v679_v32 = vld [vmem:[#allocation8 + $0x728] sm:$0xff]  ;;  %v604_v35 = vld [vmem:[#allocation8 + $0x4d0] sm:$0xff]  ;;  %v1553_v48 = vld [vmem:[#allocation11 + $0x118] sm:$0xff] }
 0x1f8   :  { %3716 = vmatprep.subr.bf16.mxu0 %v3715_v42  ;;  %v3701_v42 = vpack.c.bf16 %v519_v29, %v514_v28  ;;  %v3733_v43 = vpack.c.bf16 %v679_v32, %v674_v30  ;;  %v3703_v37 = vpack.c.bf16 %v609_v36, %v604_v35  ;;  %v1548_v21 = vld [vmem:[#allocation11 + $0xf0] sm:$0xff]  ;;  %v814_v28 = vld [vmem:[#allocation8 + $0xb60] sm:$0xff]  ;;  %v819_v29 = vld [vmem:[#allocation8 + $0xb88] sm:$0xff] }
 0x1f9   :  { %v3777_v30 = vpack.c.bf16 %v1553_v48, %v1548_v21  ;;  %v1558_v32 = vld [vmem:[#allocation11 + $0x140] sm:$0xff]  ;;  %v1563_v35 = vld [vmem:[#allocation11 + $0x168] sm:$0xff]  ;;  %v3752_v36 = vpack.c.bf16 %v819_v29, %v814_v28  ;;  %v1568_v45 = vld [vmem:[#allocation11 + $0x190] sm:$0xff] }
 0x1fa   :  { %3686 = vmatpush3.bf16.msra.mxu1 %v3685_v47  ;;  %v684_v47 = vld [vmem:[#allocation8 + $0x750] sm:$0xff]  ;;  %v1530_v21 = vld [vmem:[#allocation11 + $0x60] sm:$0xff]  ;;  %v1545_v41 = vld [vmem:[#allocation11 + $0xd8] sm:$0xff] }
 0x1fb   :  { %3718 = vmatpush3.bf16.msra.mxu0 %v3717_v33  ;;  %3688 = vmatprep.subr.bf16.mxu1 %v3687_v49  ;;  %v689_v33 = vld [vmem:[#allocation8 + $0x778] sm:$0xff]  ;;  %v1519_v49 = vld [vmem:[#allocation11 + $0x8] sm:$0xff] }
 0x1fc   :  { %3720 = vmatprep.subr.bf16.mxu0 %v3719_v52  ;;  %v3737_v50 = vpack.c.bf16 %v689_v33, %v684_v47  ;;  %v774_v52 = vld [vmem:[#allocation8 + $0xa20] sm:$0xff]  ;;  %v3763_v54 = vpack.c.bf16 %v1524_v1, %v1519_v49  ;;  %v1579_v33 = vld [vmem:[#allocation11 + $0x1e8] sm:$0xff]  ;;  %v1584_v49 = vld [vmem:[#allocation11 + $0x210] sm:$0xff] }
 0x1fd   :  { %v3740_v57 = vpack.c.bf16 %v779_v53, %v774_v52  ;;  %v834_v1 = vld [vmem:[#allocation8 + $0xc00] sm:$0xff]  ;;  %v3787_v52 = vpack.c.bf16 %v1584_v49, %v1579_v33  ;;  %v1535_v48 = vld [vmem:[#allocation11 + $0x88] sm:$0xff]  ;;  %v1608_v29 = vld [vmem:[#allocation11 + $0x2d0] sm:$0xff] }
 0x1fe   :  { %3690 = vmatpush3.bf16.msra.mxu1 %v3689_v58  ;;  %v1529_v58 = vld [vmem:[#allocation11 + $0x58] sm:$0xff]  ;;  %v1578_v53 = vld [vmem:[#allocation11 + $0x1e0] sm:$0xff]  ;;  %v1540_v38 = vld [vmem:[#allocation11 + $0xb0] sm:$0xff] }
 0x1ff   :  { %3722 = vmatpush3.bf16.msra.mxu0 %v3721_v59  ;;  %3692 = vmatprep.subr.bf16.mxu1 %v3691_v60  ;;  %v1534_v59 = vld [vmem:[#allocation11 + $0x80] sm:$0xff]  ;;  %v784_v60 = vld [vmem:[#allocation8 + $0xa70] sm:$0xff] }
 0x200   :  { %3724 = vmatprep.subr.bf16.mxu0 %v3723_v16  ;;  %v3767_v63 = vpack.c.bf16 %v1534_v59, %v1529_v58  ;;  %v1528_v16 = vld [vmem:[#allocation11 + $0x50] sm:$0xff]  ;;  %v3743_v3 = vpack.c.bf16 %v789_v61, %v784_v60  ;;  %v1521_v60 = vld [vmem:[#allocation11 + $0x18] sm:$0xff]  ;;  %v1526_v61 = vld [vmem:[#allocation11 + $0x40] sm:$0xff] }
 0x201   :  { %v844_v58 = vld [vmem:[#allocation8 + $0xc50] sm:$0xff]  ;;  %v849_v59 = vld [vmem:[#allocation8 + $0xc78] sm:$0xff]  ;;  %v1634_v33 = vld [vmem:[#allocation11 + $0x3a0] sm:$0xff] }
 0x202   :  { %3694 = vmatpush3.bf16.msra.mxu1 %v3693_v7  ;;  %v799_v7 = vld [vmem:[#allocation8 + $0xae8] sm:$0xff] }
 0x203   :  { %3726 = vmatpush3.bf16.msra.mxu0 %v3725_v8  ;;  %3696 = vmatprep.subr.bf16.mxu1 %v3695_v9  ;;  %v3769_v8 = vpack.c.bf16 %v1533_v2, %v1528_v16  ;;  %v1538_v9 = vld [vmem:[#allocation11 + $0xa0] sm:$0xff]  ;;  %v3746_v12 = vpack.c.bf16 %v799_v7, %v794_v6  ;;  %v1588_v16 = vld [vmem:[#allocation11 + $0x230] sm:$0xff]  ;;  %v1593_v2 = vld [vmem:[#allocation11 + $0x258] sm:$0xff]  ;;  %v3923_v6 = vpack.c.bf16 %v1526_v61, %v1521_v60 }
 0x204   :  { %3728 = vmatprep.subr.bf16.mxu0 %v3727_v22  ;;  %v804_v22 = vld [vmem:[#allocation8 + $0xb10] sm:$0xff]  ;;  %v3773_v19 = vpack.c.bf16 %v1543_v11, %v1538_v9  ;;  %v3793_v11 = vpack.c.bf16 %v1593_v2, %v1588_v16 }
 0x205   :  { %v1520_v7 = vld [vmem:[#allocation11 + $0x10] sm:$0xff] }
 0x206   :  { %3698 = vmatpush3.bf16.msra.mxu1 %v3697_v25  ;;  %v3749_v25 = vpack.c.bf16 %v809_v18, %v804_v22  ;;  %v1536_v9 = vld [vmem:[#allocation11 + $0x90] sm:$0xff]  ;;  %v1609_v18 = vld [vmem:[#allocation11 + $0x2d8] sm:$0xff] }
 0x207   :  { %3730 = vmatpush3.bf16.msra.mxu0 %v3729_v26  ;;  %3700 = vmatprep.subr.bf16.mxu1 %v3699_v27  ;;  %v1559_v26 = vld [vmem:[#allocation11 + $0x148] sm:$0xff]  ;;  %v1564_v27 = vld [vmem:[#allocation11 + $0x170] sm:$0xff] }
 0x208   :  { %3732 = vmatprep.subr.bf16.mxu0 %v3731_v31  ;;  %v3779_v31 = vpack.c.bf16 %v1564_v27, %v1559_v26  ;;  %v1546_v26 = vld [vmem:[#allocation11 + $0xe0] sm:$0xff]  ;;  %v1560_v61 = vld [vmem:[#allocation11 + $0x150] sm:$0xff] }
 0x209   :  { %v1576_v16 = vld [vmem:[#allocation11 + $0x1d0] sm:$0xff] }
 0x20a   :  { %3702 = vmatpush3.bf16.msra.mxu1 %v3701_v42  ;;  %v824_v42 = vld [vmem:[#allocation8 + $0xbb0] sm:$0xff] }
 0x20b   :  { %3734 = vmatpush3.bf16.msra.mxu0 %v3733_v43  ;;  %3704 = vmatprep.subr.bf16.mxu1 %v3703_v37  ;;  %v829_v43 = vld [vmem:[#allocation8 + $0xbd8] sm:$0xff]  ;;  %v3781_v37 = vpack.c.bf16 %v1563_v35, %v1558_v32  ;;  %v1619_v32 = vld [vmem:[#allocation11 + $0x328] sm:$0xff] }
 0x20c   :  { %3736 = vmatprep.subr.bf16.mxu0 %v3735_v46  ;;  %v1573_v46 = vld [vmem:[#allocation11 + $0x1b8] sm:$0xff]  ;;  %v3755_v47 = vpack.c.bf16 %v829_v43, %v824_v42  ;;  %v1624_v35 = vld [vmem:[#allocation11 + $0x350] sm:$0xff]  ;;  %v1551_v42 = vld [vmem:[#allocation11 + $0x108] sm:$0xff] }
 0x20d   :  { %v1556_v43 = vld [vmem:[#allocation11 + $0x130] sm:$0xff] }
 0x20e   :  { %3706 = vmatpush3.bf16.msra.mxu1 %v3705_v14  ;;  %v839_v14 = vld [vmem:[#allocation8 + $0xc28] sm:$0xff]  ;;  %v3935_v49 = vpack.c.bf16 %v1556_v43, %v1551_v42 }
 0x20f   :  { %3738 = vmatpush3.bf16.msra.mxu0 %v3737_v50  ;;  %3739 = vmatprep.subr.bf16.mxu1 %v4548_v55  ;;  %v3785_v50 = vpack.c.bf16 %v1573_v46, %v1568_v45  ;;  %v3758_v51 = vpack.c.bf16 %v839_v14, %v834_v1  ;;  %v1618_v45 = vld [vmem:[#allocation11 + $0x320] sm:$0xff]  ;;  %v3933_v46 = vpack.c.bf16 %v1545_v41, %v1540_v38  ;;  %v1555_v14 = vld [vmem:[#allocation11 + $0x128] sm:$0xff]  ;;  %v1669_v38 = vld [vmem:[#allocation11 + $0x4b8] sm:$0xff] }
 0x210   :  { %3764 = vmatprep.subr.bf16.mxu0 %v3763_v54  ;;  %v1583_v54 = vld [vmem:[#allocation11 + $0x208] sm:$0xff]  ;;  %v1550_v1 = vld [vmem:[#allocation11 + $0x100] sm:$0xff] }
 0x211   :  { %1368 = vmatmul.mubr.f32.vlgmr.msra.gmra.mrb[4].mxu1 %v4770_v40  ;;  %v3771_v40 = vpack.c.bf16 %v1544_v5, %v1539_v4  ;;  %v1599_v4 = vld [vmem:[#allocation11 + $0x288] sm:$0xff]  ;;  %v1604_v5 = vld [vmem:[#allocation11 + $0x2b0] sm:$0xff]  ;;  %v1674_v41 = vld [vmem:[#allocation11 + $0x4e0] sm:$0xff] }
 0x212   :  { %1438 = vmatmul.mubr.f32.vlgmr.msra.gmra.mrb[6].mxu0 %v4790_v24  ;;  %3741 = vmatpush3.bf16.msra.mxu1 %v3740_v57  ;;  %v1549_v24 = vld [vmem:[#allocation11 + $0xf8] sm:$0xff]  ;;  %v1594_v57 = vld [vmem:[#allocation11 + $0x260] sm:$0xff] }
 0x213   :  { %3742 = vmatprep.subr.bf16.mxu1 %v4548_v55  ;;  %3233 = vmatprep.mubr.msk.f32.mxu1 %vm4549_vm4, %v4546_v0  ;;  %v3775_v20 = vpack.c.bf16 %v1554_v13, %v1549_v24  ;;  %v1598_v24 = vld [vmem:[#allocation11 + $0x280] sm:$0xff]  ;;  %v1603_v13 = vld [vmem:[#allocation11 + $0x2a8] sm:$0xff] }
 0x214   :  { %3766 = vmatpush1.bf16.msra.mxu0 %v3765_v62  ;;  %v3789_v62 = vpack.c.bf16 %v1583_v54, %v1578_v53  ;;  %v3797_v27 = vpack.c.bf16 %v1603_v13, %v1598_v24  ;;  %v1586_v24 = vld [vmem:[#allocation11 + $0x220] sm:$0xff] }
 0x215   :  { %3768 = vmatprep.subr.bf16.mxu0 %v3767_v63  ;;  %v3791_v63 = vpack.c.bf16 %v1594_v57, %v1589_v56  ;;  %v1633_v56 = vld [vmem:[#allocation11 + $0x398] sm:$0xff]  ;;  %v3937_v57 = vpack.c.bf16 %v1555_v14, %v1550_v1  ;;  %v1590_v43 = vld [vmem:[#allocation11 + $0x240] sm:$0xff]  ;;  %v1679_v1 = vld [vmem:[#allocation11 + $0x508] sm:$0xff] }
 0x216   :  { %3744 = vmatpush3.bf16.msra.mxu1 %v3743_v3  ;;  %v3761_v3 = vpack.c.bf16 %v849_v59, %v844_v58  ;;  %v1639_v58 = vld [vmem:[#allocation11 + $0x3c8] sm:$0xff]  ;;  %v1644_v59 = vld [vmem:[#allocation11 + $0x3f0] sm:$0xff] }
 0x217   :  { %3745 = vmatprep.subr.bf16.mxu1 %v4548_v55  ;;  %v1684_v14 = vld [vmem:[#allocation11 + $0x530] sm:$0xff] }
 0x218   :  { %3770 = vmatpush1.bf16.msra.mxu0 %v3769_v8  ;;  %v1525_v8 = vld [vmem:[#allocation11 + $0x38] sm:$0xff] }
 0x219   :  { %3772 = vmatprep.subr.bf16.mxu0 %v3771_v40  ;;  %v1531_v40 = vld [vmem:[#allocation11 + $0x68] sm:$0xff]  ;;  %v3925_v22 = vpack.c.bf16 %v1525_v8, %v1520_v7  ;;  %v1649_v7 = vld [vmem:[#allocation11 + $0x418] sm:$0xff]  ;;  %v1654_v8 = vld [vmem:[#allocation11 + $0x440] sm:$0xff] }
 0x21a   :  { %3747 = vmatpush3.bf16.msra.mxu1 %v3746_v12  ;;  %v3795_v12 = vpack.c.bf16 %v1604_v5, %v1599_v4  ;;  %v1638_v4 = vld [vmem:[#allocation11 + $0x3c0] sm:$0xff]  ;;  %v1643_v5 = vld [vmem:[#allocation11 + $0x3e8] sm:$0xff] }
 0x21b   :  { %3748 = vmatprep.subr.bf16.mxu1 %v4548_v55  ;;  %v3813_v13 = vpack.c.bf16 %v1643_v5, %v1638_v4  ;;  %v1625_v4 = vld [vmem:[#allocation11 + $0x358] sm:$0xff]  ;;  %v1631_v5 = vld [vmem:[#allocation11 + $0x388] sm:$0xff] }
 0x21c   :  { %3774 = vmatpush1.bf16.msra.mxu0 %v3773_v19  ;;  %v1614_v19 = vld [vmem:[#allocation11 + $0x300] sm:$0xff] }
 0x21d   :  { %3776 = vmatprep.subr.bf16.mxu0 %v3775_v20  ;;  %v3927_v20 = vpack.c.bf16 %v1536_v9, %v1531_v40  ;;  %v3799_v28 = vpack.c.bf16 %v1614_v19, %v1609_v18  ;;  %v1570_v9 = vld [vmem:[#allocation11 + $0x1a0] sm:$0xff]  ;;  %v1648_v18 = vld [vmem:[#allocation11 + $0x410] sm:$0xff]  ;;  %v1653_v19 = vld [vmem:[#allocation11 + $0x438] sm:$0xff] }
 0x21e   :  { %3750 = vmatpush3.bf16.msra.mxu1 %v3749_v25  ;;  %v1541_v25 = vld [vmem:[#allocation11 + $0xb8] sm:$0xff] }
 0x21f   :  { %3751 = vmatprep.subr.bf16.mxu1 %v4548_v55 }
 0x220   :  { %3778 = vmatpush1.bf16.msra.mxu0 %v3777_v30  ;;  %v1613_v30 = vld [vmem:[#allocation11 + $0x2f8] sm:$0xff] }
 0x221   :  { %3780 = vmatprep.subr.bf16.mxu0 %v3779_v31  ;;  %v3929_v31 = vpack.c.bf16 %v1535_v48, %v1530_v21  ;;  %v1659_v21 = vld [vmem:[#allocation11 + $0x468] sm:$0xff]  ;;  %v1664_v48 = vld [vmem:[#allocation11 + $0x490] sm:$0xff] }
 0x222   :  { %3753 = vmatpush3.bf16.msra.mxu1 %v3752_v36  ;;  %v3931_v36 = vpack.c.bf16 %v1546_v26, %v1541_v25  ;;  %v1580_v26 = vld [vmem:[#allocation11 + $0x1f0] sm:$0xff] }
 0x223   :  { %3754 = vmatprep.subr.bf16.mxu1 %v4548_v55 }
 0x224   :  { %3782 = vmatpush1.bf16.msra.mxu0 %v3781_v37  ;;  %v3801_v37 = vpack.c.bf16 %v1613_v30, %v1608_v29  ;;  %v1596_v29 = vld [vmem:[#allocation11 + $0x270] sm:$0xff]  ;;  %v3817_v30 = vpack.c.bf16 %v1653_v19, %v1648_v18  ;;  %v1645_v18 = vld [vmem:[#allocation11 + $0x3f8] sm:$0xff]  ;;  %v1651_v19 = vld [vmem:[#allocation11 + $0x428] sm:$0xff] }
 0x225   :  { %3784 = vmatprep.subr.bf16.mxu0 %v3783_v44  ;;  %v3803_v44 = vpack.c.bf16 %v1624_v35, %v1619_v32  ;;  %v1658_v32 = vld [vmem:[#allocation11 + $0x460] sm:$0xff]  ;;  %v1663_v35 = vld [vmem:[#allocation11 + $0x488] sm:$0xff] }
 0x226   :  { %3756 = vmatpush3.bf16.msra.mxu1 %v3755_v47  ;;  %v1629_v47 = vld [vmem:[#allocation11 + $0x378] sm:$0xff] }
 0x227   :  { %3757 = vmatprep.subr.bf16.mxu1 %v4548_v55  ;;  %v3807_v54 = vpack.c.bf16 %v1634_v33, %v1629_v47  ;;  %v1668_v47 = vld [vmem:[#allocation11 + $0x4b0] sm:$0xff]  ;;  %v1673_v33 = vld [vmem:[#allocation11 + $0x4d8] sm:$0xff] }
 0x228   :  { %3786 = vmatpush1.bf16.msra.mxu0 %v3785_v50  ;;  %v1561_v50 = vld [vmem:[#allocation11 + $0x158] sm:$0xff] }
 0x229   :  { %3788 = vmatprep.subr.bf16.mxu0 %v3787_v52  ;;  %v1566_v52 = vld [vmem:[#allocation11 + $0x180] sm:$0xff] }
 0x22a   :  { %3759 = vmatpush3.bf16.msra.mxu1 %v3758_v51  ;;  %v1628_v51 = vld [vmem:[#allocation11 + $0x370] sm:$0xff]  ;;  %v3939_v60 = vpack.c.bf16 %v1566_v52, %v1561_v50 }
 0x22b   :  { %3760 = vmatprep.subr.bf16.mxu1 %v4548_v55  ;;  %v3809_v2 = vpack.c.bf16 %v1633_v56, %v1628_v51  ;;  %v1600_v52 = vld [vmem:[#allocation11 + $0x290] sm:$0xff]  ;;  %v3825_v56 = vpack.c.bf16 %v1673_v33, %v1668_v47 }
 0x22c   :  { %3790 = vmatpush1.bf16.msra.mxu0 %v3789_v62  ;;  %v1565_v62 = vld [vmem:[#allocation11 + $0x178] sm:$0xff]  ;;  %v1616_v51 = vld [vmem:[#allocation11 + $0x310] sm:$0xff] }
 0x22d   :  { %3792 = vmatprep.subr.bf16.mxu0 %v3791_v63  ;;  %v1571_v63 = vld [vmem:[#allocation11 + $0x1a8] sm:$0xff] }
 0x22e   :  { %3762 = vmatpush3.bf16.msra.mxu1 %v3761_v3  ;;  %v3811_v3 = vpack.c.bf16 %v1644_v59, %v1639_v58  ;;  %v3943_v40 = vpack.c.bf16 %v1576_v16, %v1571_v63  ;;  %v1626_v63 = vld [vmem:[#allocation11 + $0x360] sm:$0xff] }
 0x22f   :  { %3924 = vmatprep.subr.bf16.mxu1 %v3923_v6  ;;  %v3941_v6 = vpack.c.bf16 %v1565_v62, %v1560_v61  ;;  %v1615_v61 = vld [vmem:[#allocation11 + $0x308] sm:$0xff]  ;;  %v1621_v62 = vld [vmem:[#allocation11 + $0x338] sm:$0xff] }
 0x230   :  { %3794 = vmatpush1.bf16.msra.mxu0 %v3793_v11  ;;  %v1575_v11 = vld [vmem:[#allocation11 + $0x1c8] sm:$0xff] }
 0x231   :  { %3234 = vmatmul.mubr.f32.vlgmr.msra.gmra.mrb[6].mxu1 %v4802_v10  ;;  %3796 = vmatprep.subr.bf16.mxu0 %v3795_v12  ;;  %v1623_v10 = vld [vmem:[#allocation11 + $0x348] sm:$0xff]  ;;  %v1581_v12 = vld [vmem:[#allocation11 + $0x1f8] sm:$0xff] }
 0x232   :  { %3926 = vmatpush1.bf16.msra.mxu1 %v3925_v22  ;;  %v3805_v53 = vpack.c.bf16 %v1623_v10, %v1618_v45  ;;  %v3815_v22 = vpack.c.bf16 %v1654_v8, %v1649_v7  ;;  %v3947_v25 = vpack.c.bf16 %v1586_v24, %v1581_v12  ;;  %v1606_v45 = vld [vmem:[#allocation11 + $0x2c0] sm:$0xff]  ;;  %v3821_v10 = vpack.c.bf16 %v1663_v35, %v1658_v32  ;;  %v1665_v32 = vld [vmem:[#allocation11 + $0x498] sm:$0xff]  ;;  %v1671_v35 = vld [vmem:[#allocation11 + $0x4c8] sm:$0xff] }
 0x233   :  { %3928 = vmatprep.subr.bf16.mxu1 %v3927_v20  ;;  %v3945_v20 = vpack.c.bf16 %v1575_v11, %v1570_v9  ;;  %v1635_v9 = vld [vmem:[#allocation11 + $0x3a8] sm:$0xff]  ;;  %v1641_v11 = vld [vmem:[#allocation11 + $0x3d8] sm:$0xff]  ;;  %v1646_v12 = vld [vmem:[#allocation11 + $0x400] sm:$0xff] }
 0x234   :  { %3798 = vmatpush1.bf16.msra.mxu0 %v3797_v27  ;;  %v1585_v27 = vld [vmem:[#allocation11 + $0x218] sm:$0xff] }
 0x235   :  { %3800 = vmatprep.subr.bf16.mxu0 %v3799_v28  ;;  %v1591_v28 = vld [vmem:[#allocation11 + $0x248] sm:$0xff] }
 0x236   :  { %3930 = vmatpush1.bf16.msra.mxu1 %v3929_v31  ;;  %v3819_v31 = vpack.c.bf16 %v1664_v48, %v1659_v21  ;;  %v3951_v42 = vpack.c.bf16 %v1596_v29, %v1591_v28  ;;  %v1666_v28 = vld [vmem:[#allocation11 + $0x4a0] sm:$0xff] }
 0x237   :  { %3932 = vmatprep.subr.bf16.mxu1 %v3931_v36  ;;  %v3949_v36 = vpack.c.bf16 %v1585_v27, %v1580_v26  ;;  %v1655_v26 = vld [vmem:[#allocation11 + $0x448] sm:$0xff]  ;;  %v1661_v27 = vld [vmem:[#allocation11 + $0x478] sm:$0xff] }
 0x238   :  { %3802 = vmatpush1.bf16.msra.mxu0 %v3801_v37  ;;  %v1595_v37 = vld [vmem:[#allocation11 + $0x268] sm:$0xff] }
 0x239   :  { %3804 = vmatprep.subr.bf16.mxu0 %v3803_v44  ;;  %v1601_v44 = vld [vmem:[#allocation11 + $0x298] sm:$0xff] }
 0x23a   :  { %3934 = vmatpush1.bf16.msra.mxu1 %v3933_v46  ;;  %v3823_v46 = vpack.c.bf16 %v1674_v41, %v1669_v38  ;;  %v3955_v50 = vpack.c.bf16 %v1606_v45, %v1601_v44  ;;  %v1686_v44 = vld [vmem:[#allocation11 + $0x540] sm:$0xff] }
 0x23b   :  { %3936 = vmatprep.subr.bf16.mxu1 %v3935_v49  ;;  %v3953_v49 = vpack.c.bf16 %v1595_v37, %v1590_v43  ;;  %v1675_v43 = vld [vmem:[#allocation11 + $0x4e8] sm:$0xff]  ;;  %v1681_v37 = vld [vmem:[#allocation11 + $0x518] sm:$0xff] }
 0x23c   :  { %3806 = vmatpush1.bf16.msra.mxu0 %v3805_v53  ;;  %v1605_v53 = vld [vmem:[#allocation11 + $0x2b8] sm:$0xff] }
 0x23d   :  { %3808 = vmatprep.subr.bf16.mxu0 %v3807_v54  ;;  %v1611_v54 = vld [vmem:[#allocation11 + $0x2e8] sm:$0xff]  ;;  %v3957_v58 = vpack.c.bf16 %v1605_v53, %v1600_v52 }
 0x23e   :  { %3938 = vmatpush1.bf16.msra.mxu1 %v3937_v57  ;;  %v3827_v57 = vpack.c.bf16 %v1684_v14, %v1679_v1  ;;  %v3959_v59 = vpack.c.bf16 %v1616_v51, %v1611_v54  ;;  %v1683_v51 = vld [vmem:[#allocation11 + $0x528] sm:$0xff] }
 0x23f   :  { %3940 = vmatprep.subr.bf16.mxu1 %v3939_v60  ;;  %v1610_v60 = vld [vmem:[#allocation11 + $0x2e0] sm:$0xff] }
 0x240   :  { %3810 = vmatpush1.bf16.msra.mxu0 %v3809_v2  ;;  %v3961_v16 = vpack.c.bf16 %v1615_v61, %v1610_v60  ;;  %v3963_v2 = vpack.c.bf16 %v1626_v63, %v1621_v62  ;;  %v1694_v61 = vld [vmem:[#allocation11 + $0x580] sm:$0xff]  ;;  %v1691_v62 = vld [vmem:[#allocation11 + $0x568] sm:$0xff]  ;;  %v1696_v63 = vld [vmem:[#allocation11 + $0x590] sm:$0xff] }
 0x241   :  { %3812 = vmatprep.subr.bf16.mxu0 %v3811_v3  ;;  %v1620_v3 = vld [vmem:[#allocation11 + $0x330] sm:$0xff] }
 0x242   :  { %3942 = vmatpush1.bf16.msra.mxu1 %v3941_v6  ;;  %v1636_v6 = vld [vmem:[#allocation11 + $0x3b0] sm:$0xff]  ;;  %v3965_v7 = vpack.c.bf16 %v1625_v4, %v1620_v3 }
 0x243   :  { %3944 = vmatprep.subr.bf16.mxu1 %v3943_v40  ;;  %v3967_v8 = vpack.c.bf16 %v1636_v6, %v1631_v5  ;;  %v1630_v40 = vld [vmem:[#allocation11 + $0x380] sm:$0xff]  ;;  %v1688_v4 = vld [vmem:[#allocation11 + $0x550] sm:$0xff]  ;;  %v1693_v5 = vld [vmem:[#allocation11 + $0x578] sm:$0xff] }
 0x244   :  { %3814 = vmatpush1.bf16.msra.mxu0 %v3813_v13  ;;  %v3969_v24 = vpack.c.bf16 %v1635_v9, %v1630_v40  ;;  %v3971_v13 = vpack.c.bf16 %v1646_v12, %v1641_v11  ;;  %v1699_v40 = vld [vmem:[#allocation11 + $0x5a8] sm:$0xff]  ;;  %v3991_v11 = vpack.c.bf16 %v1696_v63, %v1691_v62  ;;  %v1704_v12 = vld [vmem:[#allocation11 + $0x5d0] sm:$0xff]  ;;  %v1733_v63 = vld [vmem:[#allocation11 + $0x6b8] sm:$0xff] }
 0x245   :  { %3816 = vmatprep.subr.bf16.mxu0 %v3815_v22  ;;  %v1640_v22 = vld [vmem:[#allocation11 + $0x3d0] sm:$0xff] }
 0x246   :  { %3946 = vmatpush1.bf16.msra.mxu1 %v3945_v20  ;;  %v1656_v20 = vld [vmem:[#allocation11 + $0x450] sm:$0xff]  ;;  %v3973_v21 = vpack.c.bf16 %v1645_v18, %v1640_v22  ;;  %v3833_v18 = vpack.c.bf16 %v1693_v5, %v1688_v4  ;;  %v1730_v4 = vld [vmem:[#allocation11 + $0x6a0] sm:$0xff]  ;;  %v1735_v5 = vld [vmem:[#allocation11 + $0x6c8] sm:$0xff] }
 0x247   :  { %3948 = vmatprep.subr.bf16.mxu1 %v3947_v25  ;;  %v3975_v48 = vpack.c.bf16 %v1656_v20, %v1651_v19  ;;  %v1650_v25 = vld [vmem:[#allocation11 + $0x420] sm:$0xff]  ;;  %v1728_v62 = vld [vmem:[#allocation11 + $0x690] sm:$0xff] }
 0x248   :  { %3818 = vmatpush1.bf16.msra.mxu0 %v3817_v30  ;;  %v3977_v29 = vpack.c.bf16 %v1655_v26, %v1650_v25  ;;  %v3979_v30 = vpack.c.bf16 %v1666_v28, %v1661_v27  ;;  %v1698_v20 = vld [vmem:[#allocation11 + $0x5a0] sm:$0xff]  ;;  %v1700_v26 = vld [vmem:[#allocation11 + $0x5b0] sm:$0xff]  ;;  %v1705_v27 = vld [vmem:[#allocation11 + $0x5d8] sm:$0xff] }
 0x249   :  { %3820 = vmatprep.subr.bf16.mxu0 %v3819_v31  ;;  %v1660_v31 = vld [vmem:[#allocation11 + $0x470] sm:$0xff]  ;;  %v1709_v28 = vld [vmem:[#allocation11 + $0x5f8] sm:$0xff] }
 0x24a   :  { %3950 = vmatpush1.bf16.msra.mxu1 %v3949_v36  ;;  %v1676_v36 = vld [vmem:[#allocation11 + $0x4f0] sm:$0xff]  ;;  %v3981_v38 = vpack.c.bf16 %v1665_v32, %v1660_v31 }
 0x24b   :  { %3952 = vmatprep.subr.bf16.mxu1 %v3951_v42  ;;  %v3983_v41 = vpack.c.bf16 %v1676_v36, %v1671_v35  ;;  %v1670_v42 = vld [vmem:[#allocation11 + $0x4c0] sm:$0xff]  ;;  %v1716_v31 = vld [vmem:[#allocation11 + $0x630] sm:$0xff]  ;;  %v3997_v35 = vpack.c.bf16 %v1705_v27, %v1700_v26  ;;  %v1751_v26 = vld [vmem:[#allocation11 + $0x748] sm:$0xff] }
 0x24c   :  { %3822 = vmatpush1.bf16.msra.mxu0 %v3821_v10  ;;  %v3985_v45 = vpack.c.bf16 %v1675_v43, %v1670_v42  ;;  %v3987_v10 = vpack.c.bf16 %v1686_v44, %v1681_v37  ;;  %v1708_v36 = vld [vmem:[#allocation11 + $0x5f0] sm:$0xff]  ;;  %v1710_v43 = vld [vmem:[#allocation11 + $0x600] sm:$0xff]  ;;  %v1715_v37 = vld [vmem:[#allocation11 + $0x628] sm:$0xff] }
 0x24d   :  { %3824 = vmatprep.subr.bf16.mxu0 %v3823_v46  ;;  %v4821_v46 = vld [vmem:[#allocation10] sm:$0x1f]  ;;  %v1719_v44 = vld [vmem:[#allocation11 + $0x648] sm:$0xff]  ;;  %v1756_v27 = vld [vmem:[#allocation11 + $0x770] sm:$0xff] }
 0x24e   :  { %3954 = vmatpush1.bf16.msra.mxu1 %v3953_v49  ;;  %v855_v47 = vrot.slane %v4821_v46, %v4752_v15  ;;  %v859_v33 = vrot.slane %v4821_v46, %v4757_v17  ;;  %v867_v49 = vrot.slane %v4821_v46, %v4764_v23 }
 0x24f   :  { %3956 = vmatprep.subr.bf16.mxu1 %v3955_v50  ;;  %v1678_v50 = vld [vmem:[#allocation11 + $0x500] sm:$0xff] }
 0x250   :  { %3826 = vmatpush1.bf16.msra.mxu0 %v3825_v56  ;;  %v1680_v56 = vld [vmem:[#allocation11 + $0x510] sm:$0xff] }
 0x251   :  { %3828 = vmatprep.subr.bf16.mxu0 %v3827_v57  ;;  %v1685_v57 = vld [vmem:[#allocation11 + $0x538] sm:$0xff] }
 0x252   :  { %3958 = vmatpush1.bf16.msra.mxu1 %v3957_v58  ;;  %v3989_v3 = vpack.c.bf16 %v1685_v57, %v1680_v56  ;;  %v1729_v56 = vld [vmem:[#allocation11 + $0x698] sm:$0xff]  ;;  %v1734_v57 = vld [vmem:[#allocation11 + $0x6c0] sm:$0xff] }
 0x253   :  { %3960 = vmatprep.subr.bf16.mxu1 %v3959_v59  ;;  %v1689_v59 = vld [vmem:[#allocation11 + $0x558] sm:$0xff] }
 0x254   :  { %v3831_v9 = vpack.c.bf16 %v1694_v61, %v1689_v59  ;;  %v1736_v59 = vld [vmem:[#allocation11 + $0x6d0] sm:$0xff] }
 0x256   :  { %3962 = vmatpush1.bf16.msra.mxu1 %v3961_v16 }
 0x257   :  { %3964 = vmatprep.subr.bf16.mxu1 %v3963_v2  ;;  %v3829_v2 = vpack.c.bf16 %v1683_v51, %v1678_v50  ;;  %v1723_v50 = vld [vmem:[#allocation11 + $0x668] sm:$0xff]  ;;  %v1725_v51 = vld [vmem:[#allocation11 + $0x678] sm:$0xff] }
 0x25a   :  { %3966 = vmatpush1.bf16.msra.mxu1 %v3965_v7  ;;  %v1690_v7 = vld [vmem:[#allocation11 + $0x560] sm:$0xff] }
 0x25b   :  { %3968 = vmatprep.subr.bf16.mxu1 %v3967_v8  ;;  %v1695_v8 = vld [vmem:[#allocation11 + $0x588] sm:$0xff] }
 0x25c   :  { %v3993_v19 = vpack.c.bf16 %v1695_v8, %v1690_v7  ;;  %v1739_v7 = vld [vmem:[#allocation11 + $0x6e8] sm:$0xff]  ;;  %v1744_v8 = vld [vmem:[#allocation11 + $0x710] sm:$0xff] }
 0x25e   :  { %3970 = vmatpush1.bf16.msra.mxu1 %v3969_v24  ;;  %v1701_v24 = vld [vmem:[#allocation11 + $0x5b8] sm:$0xff] }
 0x25f   :  { %3972 = vmatprep.subr.bf16.mxu1 %v3971_v13  ;;  %v1706_v13 = vld [vmem:[#allocation11 + $0x5e0] sm:$0xff] }
 0x260   :  { %v3995_v25 = vpack.c.bf16 %v1706_v13, %v1701_v24  ;;  %v1738_v24 = vld [vmem:[#allocation11 + $0x6e0] sm:$0xff]  ;;  %v1743_v13 = vld [vmem:[#allocation11 + $0x708] sm:$0xff] }
 0x262   :  { %3974 = vmatpush1.bf16.msra.mxu1 %v3973_v21  ;;  %v1703_v21 = vld [vmem:[#allocation11 + $0x5c8] sm:$0xff] }
 0x263   :  { %3976 = vmatprep.subr.bf16.mxu1 %v3975_v48  ;;  %v3835_v48 = vpack.c.bf16 %v1704_v12, %v1699_v40  ;;  %v3837_v32 = vpack.c.bf16 %v1703_v21, %v1698_v20  ;;  %v1741_v40 = vld [vmem:[#allocation11 + $0x6f8] sm:$0xff]  ;;  %v4009_v12 = vpack.c.bf16 %v1735_v5, %v1730_v4  ;;  %v1740_v20 = vld [vmem:[#allocation11 + $0x6f0] sm:$0xff] }
 0x264   :  { %v1745_v21 = vld [vmem:[#allocation11 + $0x718] sm:$0xff]  ;;  %v1768_v4 = vld [vmem:[#allocation11 + $0x7d0] sm:$0xff] }
 0x265   :  { %v1773_v5 = vld [vmem:[#allocation11 + $0x7f8] sm:$0xff] }
 0x266   :  { %3978 = vmatpush1.bf16.msra.mxu1 %v3977_v29  ;;  %v1714_v29 = vld [vmem:[#allocation11 + $0x620] sm:$0xff] }
 0x267   :  { %3980 = vmatprep.subr.bf16.mxu1 %v3979_v30  ;;  %v1711_v30 = vld [vmem:[#allocation11 + $0x608] sm:$0xff] }
 0x268   :  { %v3999_v42 = vpack.c.bf16 %v1716_v31, %v1711_v30  ;;  %v1748_v30 = vld [vmem:[#allocation11 + $0x730] sm:$0xff]  ;;  %v1753_v31 = vld [vmem:[#allocation11 + $0x758] sm:$0xff] }
 0x26a   :  { %3982 = vmatpush1.bf16.msra.mxu1 %v3981_v38  ;;  %v1713_v38 = vld [vmem:[#allocation11 + $0x618] sm:$0xff] }
 0x26b   :  { %3984 = vmatprep.subr.bf16.mxu1 %v3983_v41  ;;  %v3839_v41 = vpack.c.bf16 %v1714_v29, %v1709_v28  ;;  %v3853_v28 = vpack.c.bf16 %v1743_v13, %v1738_v24  ;;  %v4013_v29 = vpack.c.bf16 %v1745_v21, %v1740_v20  ;;  %v1781_v24 = vld [vmem:[#allocation11 + $0x838] sm:$0xff]  ;;  %v1786_v13 = vld [vmem:[#allocation11 + $0x860] sm:$0xff] }
 0x26c   :  { %v1778_v21 = vld [vmem:[#allocation11 + $0x820] sm:$0xff] }
 0x26e   :  { %3986 = vmatpush1.bf16.msra.mxu1 %v3985_v45  ;;  %v1724_v45 = vld [vmem:[#allocation11 + $0x670] sm:$0xff] }
 0x26f   :  { %3988 = vmatprep.subr.bf16.mxu1 %v3987_v10  ;;  %v1721_v10 = vld [vmem:[#allocation11 + $0x658] sm:$0xff] }
 0x2c4   :  { %v1085_v1 = vpop.f32.mrb[2].mxu1  ;;  %v4829_v14 = vpop.f32.mrb[4].mxu0 }
 0x2c5   :  { %v4259_v52 = vadd.f32 %v1085_v1, %v855_v47  ;;  %v1087_v53 = vpop.f32.mrb[3].mxu1  ;;  %v1300_v54 = vpop.f32.mrb[5].mxu0  ;;  %v1726_v47 = vld [vmem:[#allocation11 + $0x680] sm:$0xff] }
 0x2c6   :  { %v4260_v58 = vadd.f32 %v1087_v53, %v859_v33  ;;  %v4262_v60 = vadd.f32 %v1300_v54, %v867_v49  ;;  %v3841_v33 = vpack.c.bf16 %v1713_v38, %v1708_v36  ;;  %v4001_v49 = vpack.c.bf16 %v1715_v37, %v1710_v43  ;;  %v1718_v1 = vld [vmem:[#allocation11 + $0x640] sm:$0xff]  ;;  %v1720_v54 = vld [vmem:[#allocation11 + $0x650] sm:$0xff]  ;;  %v1755_v38 = vld [vmem:[#allocation11 + $0x768] sm:$0xff] }
 0x2c7   :  { %v4833_v6 = vmax.f32 %v4259_v52, 0.0  ;;  %v3843_v52 = vpack.c.bf16 %v1724_v45, %v1719_v44  ;;  %v4003_v53 = vpack.c.bf16 %v1726_v47, %v1721_v10  ;;  %v4005_v61 = vpack.c.bf16 %v1725_v51, %v1720_v54  ;;  %v1750_v36 = vld [vmem:[#allocation11 + $0x740] sm:$0xff]  ;;  %v1761_v43 = vld [vmem:[#allocation11 + $0x798] sm:$0xff]  ;;  %v1760_v54 = vld [vmem:[#allocation11 + $0x790] sm:$0xff] }
 0x2c8   :  { %v4831_v16 = vmax.f32 %v4260_v58, 0.0  ;;  %v4837_v22 = vmax.f32 %v4262_v60, 0.0  ;;  %v1731_v58 = vld [vmem:[#allocation11 + $0x6a8] sm:$0xff]  ;;  %v3845_v60 = vpack.c.bf16 %v1723_v50, %v1718_v1  ;;  %v1766_v37 = vld [vmem:[#allocation11 + $0x7c0] sm:$0xff]  ;;  %v871_v45 = vrot.slane %v4821_v46, %v4797_v34  ;;  %v1765_v51 = vld [vmem:[#allocation11 + $0x7b8] sm:$0xff] }
 0x2c9   :  { %v3857_v10 = vpack.c.bf16 %v1753_v31, %v1748_v30  ;;  %v4017_v47 = vpack.c.bf16 %v1755_v38, %v1750_v36  ;;  %v1794_v30 = vld [vmem:[#allocation11 + $0x8a0] sm:$0xff]  ;;  %v1791_v31 = vld [vmem:[#allocation11 + $0x888] sm:$0xff]  ;;  %v1788_v38 = vld [vmem:[#allocation11 + $0x870] sm:$0xff] }
 0x2ca   :  { %2009 = vmatprep.mubr.f32.mxu0 %v4831_v16  ;;  %2222 = vmatprep.mubr.f32.mxu1 %v4831_v16 }
 0x2cb   :  { %2010 = vmatmul.mubr.f32.vlgmr.msra.gmra.mrb[8].mxu0 %v4833_v6  ;;  %2223 = vmatmul.mubr.f32.vlgmr.msra.gmra.mrb[8].mxu1 %v4833_v6 }
 0x2cc   :  { %3830 = vmatpush1.bf16.msra.mxu0 %v3829_v2  ;;  %3990 = vmatpush1.bf16.msra.mxu1 %v3989_v3  ;;  %v3847_v2 = vpack.c.bf16 %v1734_v57, %v1729_v56  ;;  %v4007_v3 = vpack.c.bf16 %v1736_v59, %v1731_v58  ;;  %v1769_v56 = vld [vmem:[#allocation11 + $0x7d8] sm:$0xff]  ;;  %v1774_v59 = vld [vmem:[#allocation11 + $0x800] sm:$0xff] }
 0x2cd   :  { %2080 = vmatprep.mubr.f32.mxu0 %v4837_v22  ;;  %2293 = vmatprep.mubr.f32.mxu1 %v4837_v22 }
 0x2ce   :  { %3832 = vmatprep.subr.bf16.mxu0 %v3831_v9  ;;  %3992 = vmatprep.subr.bf16.mxu1 %v3991_v11  ;;  %v1746_v9 = vld [vmem:[#allocation11 + $0x720] sm:$0xff]  ;;  %v3849_v11 = vpack.c.bf16 %v1733_v63, %v1728_v62 }
 0x2d0   :  { %3834 = vmatpush1.bf16.msra.mxu0 %v3833_v18  ;;  %3994 = vmatpush1.bf16.msra.mxu1 %v3993_v19  ;;  %v3851_v18 = vpack.c.bf16 %v1744_v8, %v1739_v7  ;;  %v4011_v19 = vpack.c.bf16 %v1746_v9, %v1741_v40  ;;  %v3863_v7 = vpack.c.bf16 %v1774_v59, %v1769_v56  ;;  %v1770_v40 = vld [vmem:[#allocation11 + $0x7e0] sm:$0xff]  ;;  %v1775_v9 = vld [vmem:[#allocation11 + $0x808] sm:$0xff]  ;;  %v1805_v56 = vld [vmem:[#allocation11 + $0x8f8] sm:$0xff] }
 0x2d1   :  { %3836 = vmatprep.subr.bf16.mxu0 %v3835_v48  ;;  %3996 = vmatprep.subr.bf16.mxu1 %v3995_v25  ;;  %v1749_v48 = vld [vmem:[#allocation11 + $0x738] sm:$0xff]  ;;  %v1754_v25 = vld [vmem:[#allocation11 + $0x760] sm:$0xff]  ;;  %v4025_v20 = vpack.c.bf16 %v1775_v9, %v1770_v40  ;;  %v1811_v59 = vld [vmem:[#allocation11 + $0x928] sm:$0xff] }
 0x2d2   :  { %v1824_v40 = vld [vmem:[#allocation11 + $0x990] sm:$0xff]  ;;  %v1821_v9 = vld [vmem:[#allocation11 + $0x978] sm:$0xff] }
 0x2d4   :  { %3838 = vmatpush1.bf16.msra.mxu0 %v3837_v32  ;;  %3998 = vmatpush1.bf16.msra.mxu1 %v3997_v35  ;;  %v3855_v32 = vpack.c.bf16 %v1754_v25, %v1749_v48  ;;  %v4015_v35 = vpack.c.bf16 %v1756_v27, %v1751_v26  ;;  %v1783_v48 = vld [vmem:[#allocation11 + $0x848] sm:$0xff]  ;;  %v4027_v26 = vpack.c.bf16 %v1786_v13, %v1781_v24  ;;  %v1780_v27 = vld [vmem:[#allocation11 + $0x830] sm:$0xff]  ;;  %v1818_v13 = vld [vmem:[#allocation11 + $0x960] sm:$0xff] }
 0x2d5   :  { %3840 = vmatprep.subr.bf16.mxu0 %v3839_v41  ;;  %4000 = vmatprep.subr.bf16.mxu1 %v3999_v42  ;;  %v1759_v41 = vld [vmem:[#allocation11 + $0x788] sm:$0xff]  ;;  %v1764_v42 = vld [vmem:[#allocation11 + $0x7b0] sm:$0xff] }
 0x2d8   :  { %3842 = vmatpush1.bf16.msra.mxu0 %v3841_v33  ;;  %4002 = vmatpush1.bf16.msra.mxu1 %v4001_v49  ;;  %v1758_v33 = vld [vmem:[#allocation11 + $0x780] sm:$0xff]  ;;  %v1763_v49 = vld [vmem:[#allocation11 + $0x7a8] sm:$0xff] }
 0x2d9   :  { %3844 = vmatprep.subr.bf16.mxu0 %v3843_v52  ;;  %4004 = vmatprep.subr.bf16.mxu1 %v4003_v53  ;;  %v3859_v52 = vpack.c.bf16 %v1764_v42, %v1759_v41  ;;  %v4019_v53 = vpack.c.bf16 %v1766_v37, %v1761_v43  ;;  %v1793_v41 = vld [vmem:[#allocation11 + $0x898] sm:$0xff]  ;;  %v1790_v37 = vld [vmem:[#allocation11 + $0x880] sm:$0xff] }
 0x2dc   :  { %3846 = vmatpush1.bf16.msra.mxu0 %v3845_v60  ;;  %4006 = vmatpush1.bf16.msra.mxu1 %v4005_v61  ;;  %v1771_v60 = vld [vmem:[#allocation11 + $0x7e8] sm:$0xff]  ;;  %v1776_v61 = vld [vmem:[#allocation11 + $0x810] sm:$0xff] }
 0x2dd   :  { %3848 = vmatprep.subr.bf16.mxu0 %v3847_v2  ;;  %4008 = vmatprep.subr.bf16.mxu1 %v4007_v3  ;;  %v3861_v2 = vpack.c.bf16 %v1763_v49, %v1758_v33  ;;  %v4021_v3 = vpack.c.bf16 %v1765_v51, %v1760_v54  ;;  %v4023_v8 = vpack.c.bf16 %v1776_v61, %v1771_v60  ;;  %v1806_v33 = vld [vmem:[#allocation11 + $0x900] sm:$0xff]  ;;  %v1800_v51 = vld [vmem:[#allocation11 + $0x8d0] sm:$0xff] }
 0x2de   :  { %v3873_v49 = vpack.c.bf16 %v1793_v41, %v1788_v38  ;;  %v1816_v60 = vld [vmem:[#allocation11 + $0x950] sm:$0xff]  ;;  %v863_v38 = vrot.slane %v4821_v46, %v4785_v39 }
 0x2e0   :  { %3850 = vmatpush1.bf16.msra.mxu0 %v3849_v11  ;;  %4010 = vmatpush1.bf16.msra.mxu1 %v4009_v12  ;;  %v1779_v11 = vld [vmem:[#allocation11 + $0x828] sm:$0xff]  ;;  %v1784_v12 = vld [vmem:[#allocation11 + $0x850] sm:$0xff] }
 0x2e1   :  { %3852 = vmatprep.subr.bf16.mxu0 %v3851_v18  ;;  %4012 = vmatprep.subr.bf16.mxu1 %v4011_v19  ;;  %v3865_v19 = vpack.c.bf16 %v1773_v5, %v1768_v4  ;;  %v3867_v25 = vpack.c.bf16 %v1784_v12, %v1779_v11  ;;  %v4039_v4 = vpack.c.bf16 %v1816_v60, %v1811_v59  ;;  %v1810_v5 = vld [vmem:[#allocation11 + $0x920] sm:$0xff]  ;;  %v1851_v60 = vld [vmem:[#allocation11 + $0xa68] sm:$0xff] }
 0x2e2   :  { %v1826_v11 = vld [vmem:[#allocation11 + $0x9a0] sm:$0xff] }
 0x2e3   :  { %v1854_v59 = vld [vmem:[#allocation11 + $0xa80] sm:$0xff] }
 0x2e4   :  { %3854 = vmatpush1.bf16.msra.mxu0 %v3853_v28  ;;  %4014 = vmatpush1.bf16.msra.mxu1 %v4013_v29  ;;  %v2953_v44 = vpop.f32.mrb[4].mxu1  ;;  %v1785_v28 = vld [vmem:[#allocation11 + $0x858] sm:$0xff] }
 0x2e5   :  { %v2988_v1 = vpop.f32.mrb[6].mxu0  ;;  %v2954_v50 = vpop.f32.mrb[5].mxu1  ;;  %3856 = vmatprep.subr.bf16.mxu0 %v3855_v32  ;;  %4016 = vmatprep.subr.bf16.mxu1 %v4015_v35  ;;  %v1789_v29 = vld [vmem:[#allocation11 + $0x878] sm:$0xff]  ;;  %v1796_v32 = vld [vmem:[#allocation11 + $0x8b0] sm:$0xff]  ;;  %v3869_v35 = vpack.c.bf16 %v1783_v48, %v1778_v21  ;;  %v4029_v36 = vpack.c.bf16 %v1785_v28, %v1780_v27  ;;  %v4043_v21 = vpack.c.bf16 %v1826_v11, %v1821_v9  ;;  %v1834_v27 = vld [vmem:[#allocation11 + $0x9e0] sm:$0xff] }
 0x2e6   :  { %v2955_v57 = vadd.f32 %v2954_v50, %v2953_v44  ;;  %v2989_v58 = vpop.f32.mrb[7].mxu0  ;;  %v3871_v42 = vpack.c.bf16 %v1794_v30, %v1789_v29  ;;  %v4031_v43 = vpack.c.bf16 %v1796_v32, %v1791_v31  ;;  %v1795_v44 = vld [vmem:[#allocation11 + $0x8a8] sm:$0xff]  ;;  %v1798_v50 = vld [vmem:[#allocation11 + $0x8c0] sm:$0xff]  ;;  %v1820_v48 = vld [vmem:[#allocation11 + $0x970] sm:$0xff] }
 0x2e7   :  { %v2990_v62 = vadd.f32 %v2989_v58, %v2988_v1  ;;  %v4033_v1 = vpack.c.bf16 %v1795_v44, %v1790_v37  ;;  %v1814_v58 = vld [vmem:[#allocation11 + $0x940] sm:$0xff]  ;;  %v1831_v28 = vld [vmem:[#allocation11 + $0x9c8] sm:$0xff]  ;;  %v1836_v29 = vld [vmem:[#allocation11 + $0x9f0] sm:$0xff] }
 0x2e8   :  { %v1370_v63 = vadd.f32 %v2955_v57, %v871_v45  ;;  %3858 = vmatpush1.bf16.msra.mxu0 %v3857_v10  ;;  %4018 = vmatpush1.bf16.msra.mxu1 %v4017_v47  ;;  %v1799_v45 = vld [vmem:[#allocation11 + $0x8c8] sm:$0xff]  ;;  %v1804_v10 = vld [vmem:[#allocation11 + $0x8f0] sm:$0xff]  ;;  %v1801_v47 = vld [vmem:[#allocation11 + $0x8d8] sm:$0xff] }
 0x2e9   :  { %3860 = vmatprep.subr.bf16.mxu0 %v3859_v52  ;;  %4020 = vmatprep.subr.bf16.mxu1 %v4019_v53  ;;  %v1803_v52 = vld [vmem:[#allocation11 + $0x8e8] sm:$0xff]  ;;  %v3875_v53 = vpack.c.bf16 %v1804_v10, %v1799_v45  ;;  %v4035_v54 = vpack.c.bf16 %v1806_v33, %v1801_v47  ;;  %v1809_v57 = vld [vmem:[#allocation11 + $0x918] sm:$0xff]  ;;  %v1828_v32 = vld [vmem:[#allocation11 + $0x9b0] sm:$0xff] }
 0x2ea   :  { %v4845_v18 = vadd.f32 %v2990_v62, %v1370_v63  ;;  %v3877_v61 = vpack.c.bf16 %v1803_v52, %v1798_v50  ;;  %v4037_v62 = vpack.c.bf16 %v1805_v56, %v1800_v51  ;;  %v1808_v63 = vld [vmem:[#allocation11 + $0x910] sm:$0xff]  ;;  %v1839_v37 = vld [vmem:[#allocation11 + $0xa08] sm:$0xff]  ;;  %v1841_v45 = vld [vmem:[#allocation11 + $0xa18] sm:$0xff] }
 0x2eb   :  { %v1844_v44 = vld [vmem:[#allocation11 + $0xa30] sm:$0xff]  ;;  %v1846_v10 = vld [vmem:[#allocation11 + $0xa40] sm:$0xff]  ;;  %v1843_v52 = vld [vmem:[#allocation11 + $0xa28] sm:$0xff] }
 0x2ec   :  { %3862 = vmatpush1.bf16.msra.mxu0 %v3861_v2  ;;  %4022 = vmatpush1.bf16.msra.mxu1 %v4021_v3  ;;  %v1813_v2 = vld [vmem:[#allocation11 + $0x938] sm:$0xff]  ;;  %v3879_v3 = vpack.c.bf16 %v1814_v58, %v1809_v57  ;;  %v1838_v50 = vld [vmem:[#allocation11 + $0xa00] sm:$0xff]  ;;  %v4051_v51 = vpack.c.bf16 %v1846_v10, %v1841_v45  ;;  %v1840_v56 = vld [vmem:[#allocation11 + $0xa10] sm:$0xff] }
 0x2ed   :  { %3864 = vmatprep.subr.bf16.mxu0 %v3863_v7  ;;  %4024 = vmatprep.subr.bf16.mxu1 %v4023_v8  ;;  %v1815_v7 = vld [vmem:[#allocation11 + $0x948] sm:$0xff]  ;;  %v3881_v12 = vpack.c.bf16 %v1813_v2, %v1808_v63  ;;  %v1845_v57 = vld [vmem:[#allocation11 + $0xa38] sm:$0xff]  ;;  %v1848_v2 = vld [vmem:[#allocation11 + $0xa50] sm:$0xff] }
 0x2ee   :  { %v1819_v8 = vld [vmem:[#allocation11 + $0x968] sm:$0xff]  ;;  %v4041_v24 = vpack.c.bf16 %v1815_v7, %v1810_v5  ;;  %v1849_v58 = vld [vmem:[#allocation11 + $0xa58] sm:$0xff]  ;;  %v4053_v63 = vpack.c.bf16 %v1845_v57, %v1840_v56  ;;  %v1850_v5 = vld [vmem:[#allocation11 + $0xa60] sm:$0xff] }
 0x2ef   :  { %v1855_v7 = vld [vmem:[#allocation11 + $0xa88] sm:$0xff]  ;;  %v1861_v9 = vld [vmem:[#allocation11 + $0xab8] sm:$0xff]  ;;  %v1866_v11 = vld [vmem:[#allocation11 + $0xae0] sm:$0xff] }
 0x2f0   :  { %3866 = vmatpush1.bf16.msra.mxu0 %v3865_v19  ;;  %4026 = vmatpush1.bf16.msra.mxu1 %v4025_v20  ;;  %v1823_v19 = vld [vmem:[#allocation11 + $0x988] sm:$0xff]  ;;  %v3883_v20 = vpack.c.bf16 %v1824_v40, %v1819_v8  ;;  %v1864_v40 = vld [vmem:[#allocation11 + $0xad0] sm:$0xff]  ;;  %v1886_v45 = vld [vmem:[#allocation11 + $0xb80] sm:$0xff] }
 0x2f1   :  { %3868 = vmatprep.subr.bf16.mxu0 %v3867_v25  ;;  %4028 = vmatprep.subr.bf16.mxu1 %v4027_v26  ;;  %v1825_v25 = vld [vmem:[#allocation11 + $0x998] sm:$0xff]  ;;  %v3885_v30 = vpack.c.bf16 %v1823_v19, %v1818_v13  ;;  %v1859_v8 = vld [vmem:[#allocation11 + $0xaa8] sm:$0xff]  ;;  %v1858_v13 = vld [vmem:[#allocation11 + $0xaa0] sm:$0xff] }
 0x2f2   :  { %v1829_v26 = vld [vmem:[#allocation11 + $0x9b8] sm:$0xff]  ;;  %v4045_v31 = vpack.c.bf16 %v1825_v25, %v1820_v48  ;;  %v1863_v19 = vld [vmem:[#allocation11 + $0xac8] sm:$0xff]  ;;  %v1860_v48 = vld [vmem:[#allocation11 + $0xab0] sm:$0xff] }
 0x2f3   :  { %v3887_v41 = vpack.c.bf16 %v1834_v27, %v1829_v26  ;;  %v1865_v25 = vld [vmem:[#allocation11 + $0xad8] sm:$0xff]  ;;  %v1874_v27 = vld [vmem:[#allocation11 + $0xb20] sm:$0xff]  ;;  %v1891_v56 = vld [vmem:[#allocation11 + $0xba8] sm:$0xff] }
 0x2f4   :  { %3870 = vmatpush1.bf16.msra.mxu0 %v3869_v35  ;;  %4030 = vmatpush1.bf16.msra.mxu1 %v4029_v36  ;;  %v1833_v35 = vld [vmem:[#allocation11 + $0x9d8] sm:$0xff]  ;;  %v1830_v36 = vld [vmem:[#allocation11 + $0x9c0] sm:$0xff]  ;;  %v1896_v57 = vld [vmem:[#allocation11 + $0xbd0] sm:$0xff] }
 0x2f5   :  { %3872 = vmatprep.subr.bf16.mxu0 %v3871_v42  ;;  %4032 = vmatprep.subr.bf16.mxu1 %v4031_v43  ;;  %v4047_v42 = vpack.c.bf16 %v1836_v29, %v1831_v28  ;;  %v1835_v43 = vld [vmem:[#allocation11 + $0x9e8] sm:$0xff]  ;;  %v3889_v33 = vpack.c.bf16 %v1833_v35, %v1828_v32  ;;  %v1869_v26 = vld [vmem:[#allocation11 + $0xaf8] sm:$0xff]  ;;  %v1876_v29 = vld [vmem:[#allocation11 + $0xb30] sm:$0xff] }
 0x2f6   :  { %v1871_v28 = vld [vmem:[#allocation11 + $0xb08] sm:$0xff]  ;;  %v1868_v32 = vld [vmem:[#allocation11 + $0xaf0] sm:$0xff]  ;;  %v1873_v35 = vld [vmem:[#allocation11 + $0xb18] sm:$0xff] }
 0x2f7   :  { %v3905_v10 = vpack.c.bf16 %v1873_v35, %v1868_v32  ;;  %v1910_v32 = vld [vmem:[#allocation11 + $0xc40] sm:$0xff]  ;;  %v1915_v35 = vld [vmem:[#allocation11 + $0xc68] sm:$0xff] }
 0x2f8   :  { %3874 = vmatpush1.bf16.msra.mxu0 %v3873_v49  ;;  %4034 = vmatpush1.bf16.msra.mxu1 %v4033_v1  ;;  %v4049_v49 = vpack.c.bf16 %v1835_v43, %v1830_v36  ;;  %v3891_v1 = vpack.c.bf16 %v1844_v44, %v1839_v37  ;;  %v3903_v36 = vpack.c.bf16 %v1874_v27, %v1869_v26  ;;  %v1879_v43 = vld [vmem:[#allocation11 + $0xb48] sm:$0xff]  ;;  %v1884_v37 = vld [vmem:[#allocation11 + $0xb70] sm:$0xff]  ;;  %v1881_v44 = vld [vmem:[#allocation11 + $0xb58] sm:$0xff] }
 0x2f9   :  { %3876 = vmatprep.subr.bf16.mxu0 %v3875_v53  ;;  %4036 = vmatprep.subr.bf16.mxu1 %v4035_v54  ;;  %v4261_v53 = vadd.f32 %v4829_v14, %v863_v38  ;;  %v4063_v38 = vpack.c.bf16 %v1876_v29, %v1871_v28  ;;  %v1908_v28 = vld [vmem:[#allocation11 + $0xc30] sm:$0xff]  ;;  %v1913_v29 = vld [vmem:[#allocation11 + $0xc58] sm:$0xff] }
 0x2fb   :  { %v4853_v14 = vmax.f32 %v4261_v53, 0.0  ;;  %v1885_v53 = vld [vmem:[#allocation11 + $0xb78] sm:$0xff] }
 0x2fc   :  { %3878 = vmatpush1.bf16.msra.mxu0 %v3877_v61  ;;  %4038 = vmatpush1.bf16.msra.mxu1 %v4037_v62  ;;  %v1856_v61 = vld [vmem:[#allocation11 + $0xa90] sm:$0xff]  ;;  %v3893_v62 = vpack.c.bf16 %v1843_v52, %v1838_v50  ;;  %v4067_v50 = vpack.c.bf16 %v1886_v45, %v1881_v44 }
 0x2fd   :  { %3880 = vmatprep.subr.bf16.mxu0 %v3879_v3  ;;  %4040 = vmatprep.subr.bf16.mxu1 %v4039_v4  ;;  %v1853_v3 = vld [vmem:[#allocation11 + $0xa78] sm:$0xff]  ;;  %v4055_v4 = vpack.c.bf16 %v1856_v61, %v1851_v60  ;;  %v1880_v52 = vld [vmem:[#allocation11 + $0xb50] sm:$0xff] }
 0x2fe   :  { %v1888_v60 = vld [vmem:[#allocation11 + $0xb90] sm:$0xff]  ;;  %v1893_v61 = vld [vmem:[#allocation11 + $0xbb8] sm:$0xff] }
 0x300   :  { %3882 = vmatpush1.bf16.msra.mxu0 %v3881_v12  ;;  %4042 = vmatpush1.bf16.msra.mxu1 %v4041_v24  ;;  %v3897_v12 = vpack.c.bf16 %v1853_v3, %v1848_v2  ;;  %v4057_v24 = vpack.c.bf16 %v1855_v7, %v1850_v5  ;;  %v1890_v2 = vld [vmem:[#allocation11 + $0xba0] sm:$0xff]  ;;  %v1895_v3 = vld [vmem:[#allocation11 + $0xbc8] sm:$0xff]  ;;  %v1901_v5 = vld [vmem:[#allocation11 + $0xbf8] sm:$0xff] }
 0x301   :  { %3884 = vmatprep.subr.bf16.mxu0 %v3883_v20  ;;  %4044 = vmatprep.subr.bf16.mxu1 %v4043_v21  ;;  %v3899_v20 = vpack.c.bf16 %v1864_v40, %v1859_v8  ;;  %v4059_v21 = vpack.c.bf16 %v1866_v11, %v1861_v9  ;;  %v1906_v7 = vld [vmem:[#allocation11 + $0xc20] sm:$0xff]  ;;  %v3913_v8 = vpack.c.bf16 %v1893_v61, %v1888_v60  ;;  %v1903_v11 = vld [vmem:[#allocation11 + $0xc08] sm:$0xff] }
 0x302   :  { %v4073_v40 = vpack.c.bf16 %v1895_v3, %v1890_v2  ;;  %v1898_v9 = vld [vmem:[#allocation11 + $0xbe0] sm:$0xff]  ;;  %v1627_v2 = vld [vmem:[#allocation11 + $0x368] sm:$0xff] }
 0x303   :  { %v3917_v26 = vpack.c.bf16 %v1903_v11, %v1898_v9  ;;  %v1782_v3 = vld [vmem:[#allocation11 + $0x840] sm:$0xff]  ;;  %v1707_v11 = vld [vmem:[#allocation11 + $0x5e8] sm:$0xff] }
 0x304   :  { %3886 = vmatpush1.bf16.msra.mxu0 %v3885_v30  ;;  %4046 = vmatpush1.bf16.msra.mxu1 %v4045_v31  ;;  %v1509_v47 = vpop.f32.mrb[6].mxu1  ;;  %v3901_v30 = vpack.c.bf16 %v1863_v19, %v1858_v13  ;;  %v4061_v31 = vpack.c.bf16 %v1865_v25, %v1860_v48  ;;  %v1900_v13 = vld [vmem:[#allocation11 + $0xbf0] sm:$0xff]  ;;  %v1905_v19 = vld [vmem:[#allocation11 + $0xc18] sm:$0xff]  ;;  %v1911_v48 = vld [vmem:[#allocation11 + $0xc48] sm:$0xff] }
 0x305   :  { %v4851_v46 = vadd.f32 %v1509_v47, %v4845_v18  ;;  %v3235_v54 = vpop.f32.mrb[7].mxu1  ;;  %3888 = vmatprep.subr.bf16.mxu0 %v3887_v41  ;;  %4048 = vmatprep.subr.bf16.mxu1 %v4047_v42  ;;  %v3895_v18 = vpack.c.bf16 %v1854_v59, %v1849_v58  ;;  %v1870_v41 = vld [vmem:[#allocation11 + $0xb00] sm:$0xff]  ;;  %v1875_v42 = vld [vmem:[#allocation11 + $0xb28] sm:$0xff]  ;;  %v4069_v59 = vpack.c.bf16 %v1885_v53, %v1880_v52  ;;  %v1916_v25 = vld [vmem:[#allocation11 + $0xc70] sm:$0xff] }
 0x306   :  { %v4065_v47 = vpack.c.bf16 %v1875_v42, %v1870_v41  ;;  %v1889_v54 = vld [vmem:[#allocation11 + $0xb98] sm:$0xff]  ;;  %v4077_v27 = vpack.c.bf16 %v1905_v19, %v1900_v13  ;;  %v1762_v41 = vld [vmem:[#allocation11 + $0x7a0] sm:$0xff]  ;;  %v1767_v42 = vld [vmem:[#allocation11 + $0x7c8] sm:$0xff] }
 0x307   :  { %v4115_v45 = vpack.c.bf16 %v1767_v42, %v1762_v41  ;;  %v1772_v52 = vld [vmem:[#allocation11 + $0x7f0] sm:$0xff]  ;;  %v1777_v53 = vld [vmem:[#allocation11 + $0x818] sm:$0xff]  ;;  %v1567_v41 = vld [vmem:[#allocation11 + $0x188] sm:$0xff] }
 0x308   :  { %3890 = vmatpush1.bf16.msra.mxu0 %v3889_v33  ;;  %4050 = vmatpush1.bf16.msra.mxu1 %v4049_v49  ;;  %v1878_v33 = vld [vmem:[#allocation11 + $0xb40] sm:$0xff]  ;;  %v1883_v49 = vld [vmem:[#allocation11 + $0xb68] sm:$0xff]  ;;  %v4119_v61 = vpack.c.bf16 %v1777_v53, %v1772_v52  ;;  %v1792_v13 = vld [vmem:[#allocation11 + $0x890] sm:$0xff] }
 0x309   :  { %3892 = vmatprep.subr.bf16.mxu0 %v3891_v1  ;;  %4052 = vmatprep.subr.bf16.mxu1 %v4051_v51  ;;  %v3907_v1 = vpack.c.bf16 %v1884_v37, %v1879_v43  ;;  %v1894_v51 = vld [vmem:[#allocation11 + $0xbc0] sm:$0xff]  ;;  %v3909_v58 = vpack.c.bf16 %v1883_v49, %v1878_v33  ;;  %v3921_v43 = vpack.c.bf16 %v1913_v29, %v1908_v28  ;;  %v1687_v49 = vld [vmem:[#allocation11 + $0x548] sm:$0xff]  ;;  %v1797_v19 = vld [vmem:[#allocation11 + $0x8b8] sm:$0xff] }
 0x30a   :  { %v4081_v37 = vpack.c.bf16 %v1915_v35, %v1910_v32  ;;  %v1682_v33 = vld [vmem:[#allocation11 + $0x520] sm:$0xff]  ;;  %v1647_v29 = vld [vmem:[#allocation11 + $0x408] sm:$0xff]  ;;  %v1577_v52 = vld [vmem:[#allocation11 + $0x1d8] sm:$0xff] }
 0x30b   :  { %2081 = vmatmul.mubr.f32.vlgmr.msra.gmra.mrb[8].mxu0 %v4853_v14  ;;  %2294 = vmatmul.mubr.f32.vlgmr.msra.gmra.mrb[8].mxu1 %v4853_v14  ;;  %v1642_v28 = vld [vmem:[#allocation11 + $0x3e0] sm:$0xff]  ;;  %v1732_v53 = vld [vmem:[#allocation11 + $0x6b0] sm:$0xff] }
 0x30c   :  { %3894 = vmatpush1.bf16.msra.mxu0 %v3893_v62  ;;  %4054 = vmatpush1.bf16.msra.mxu1 %v4053_v63  ;;  %v3911_v62 = vpack.c.bf16 %v1894_v51, %v1889_v54  ;;  %v4071_v63 = vpack.c.bf16 %v1896_v57, %v1891_v56  ;;  %v4860_v51 = vmax.f32 %v4851_v46, 0.0  ;;  %v4117_v56 = vpack.c.bf16 %v1687_v49, %v1682_v33  ;;  %v1532_v57 = vld [vmem:[#allocation11 + $0x70] sm:$0xff]  ;;  %v1722_v42 = vld [vmem:[#allocation11 + $0x660] sm:$0xff] }
 0x30d   :  { %3896 = vmatprep.subr.bf16.mxu0 %v3895_v18  ;;  %4056 = vmatprep.subr.bf16.mxu1 %v4055_v4  ;;  %v1899_v18 = vld [vmem:[#allocation11 + $0xbe8] sm:$0xff]  ;;  %v1904_v4 = vld [vmem:[#allocation11 + $0xc10] sm:$0xff] }
 0x30e   :  { %2151 = vmatprep.mubr.f32.mxu0 %v4546_v0  ;;  %2364 = vmatprep.mubr.f32.mxu1 %v4546_v0 }
 0x310   :  { %3898 = vmatpush1.bf16.msra.mxu0 %v3897_v12  ;;  %4058 = vmatpush1.bf16.msra.mxu1 %v4057_v24  ;;  %v3915_v12 = vpack.c.bf16 %v1904_v4, %v1899_v18  ;;  %v4075_v24 = vpack.c.bf16 %v1906_v7, %v1901_v5  ;;  %v1787_v18 = vld [vmem:[#allocation11 + $0x868] sm:$0xff]  ;;  %v1542_v7 = vld [vmem:[#allocation11 + $0xc0] sm:$0xff] }
 0x311   :  { %3900 = vmatprep.subr.bf16.mxu0 %v3899_v20  ;;  %4060 = vmatprep.subr.bf16.mxu1 %v4059_v21  ;;  %v1909_v20 = vld [vmem:[#allocation11 + $0xc38] sm:$0xff]  ;;  %v1914_v21 = vld [vmem:[#allocation11 + $0xc60] sm:$0xff]  ;;  %v4123_v9 = vpack.c.bf16 %v1787_v18, %v1782_v3  ;;  %v1587_v3 = vld [vmem:[#allocation11 + $0x228] sm:$0xff] }
 0x312   :  { %v1742_v18 = vld [vmem:[#allocation11 + $0x700] sm:$0xff] }
 0x314   :  { %3902 = vmatpush1.bf16.msra.mxu0 %v3901_v30  ;;  %4062 = vmatpush1.bf16.msra.mxu1 %v4061_v31  ;;  %v3919_v30 = vpack.c.bf16 %v1914_v21, %v1909_v20  ;;  %v4079_v31 = vpack.c.bf16 %v1916_v25, %v1911_v48  ;;  %v1557_v48 = vld [vmem:[#allocation11 + $0x138] sm:$0xff]  ;;  %v1712_v25 = vld [vmem:[#allocation11 + $0x610] sm:$0xff] }
 0x315   :  { %3904 = vmatprep.subr.bf16.mxu0 %v3903_v36  ;;  %4064 = vmatprep.subr.bf16.mxu1 %v4063_v38  ;;  %v1602_v36 = vld [vmem:[#allocation11 + $0x2a0] sm:$0xff]  ;;  %v1607_v38 = vld [vmem:[#allocation11 + $0x2c8] sm:$0xff] }
 0x316   :  { %v4083_v44 = vpack.c.bf16 %v1607_v38, %v1602_v36  ;;  %v4099_v36 = vpack.c.bf16 %v1647_v29, %v1642_v28  ;;  %v1562_v38 = vld [vmem:[#allocation11 + $0x160] sm:$0xff] }
 0x317   :  { %v4101_v33 = vpack.c.bf16 %v1567_v41, %v1562_v38  ;;  %v2586_v29 = vld [vmem:[#allocation14] sm:$0xff]  ;;  %v1857_v38 = vld [vmem:[#allocation11 + $0xa98] sm:$0xff] }
 0x318   :  { %3906 = vmatpush1.bf16.msra.mxu0 %v3905_v10  ;;  %4066 = vmatpush1.bf16.msra.mxu1 %v4065_v47  ;;  %v1522_v10 = vld [vmem:[#allocation11 + $0x20] sm:$0xff]  ;;  %v1527_v47 = vld [vmem:[#allocation11 + $0x48] sm:$0xff] }
 0x319   :  { %3908 = vmatprep.subr.bf16.mxu0 %v3907_v1  ;;  %4068 = vmatprep.subr.bf16.mxu1 %v4067_v50  ;;  %v1612_v1 = vld [vmem:[#allocation11 + $0x2f0] sm:$0xff]  ;;  %v1617_v50 = vld [vmem:[#allocation11 + $0x318] sm:$0xff]  ;;  %v4085_v54 = vpack.c.bf16 %v1527_v47, %v1522_v10 }
 0x31a   :  { %v4087_v60 = vpack.c.bf16 %v1617_v50, %v1612_v1  ;;  %v1812_v10 = vld [vmem:[#allocation11 + $0x930] sm:$0xff]  ;;  %v1817_v47 = vld [vmem:[#allocation11 + $0x958] sm:$0xff] }
 0x31b   :  { %v1572_v50 = vld [vmem:[#allocation11 + $0x1b0] sm:$0xff] }
 0x31c   :  { %3910 = vmatpush1.bf16.msra.mxu0 %v3909_v58  ;;  %4070 = vmatpush1.bf16.msra.mxu1 %v4069_v59  ;;  %v1537_v58 = vld [vmem:[#allocation11 + $0x98] sm:$0xff]  ;;  %v1692_v59 = vld [vmem:[#allocation11 + $0x570] sm:$0xff] }
 0x31d   :  { %3912 = vmatprep.subr.bf16.mxu0 %v3911_v62  ;;  %4072 = vmatprep.subr.bf16.mxu1 %v4071_v63  ;;  %v1697_v62 = vld [vmem:[#allocation11 + $0x598] sm:$0xff]  ;;  %v1622_v63 = vld [vmem:[#allocation11 + $0x340] sm:$0xff]  ;;  %v4089_v46 = vpack.c.bf16 %v1537_v58, %v1532_v57  ;;  %v1667_v58 = vld [vmem:[#allocation11 + $0x4a8] sm:$0xff] }
 0x31e   :  { %v4121_v4 = vpack.c.bf16 %v1697_v62, %v1692_v59  ;;  %v4091_v5 = vpack.c.bf16 %v1627_v2, %v1622_v63  ;;  %v1662_v57 = vld [vmem:[#allocation11 + $0x480] sm:$0xff] }
 0x31f   :  { %v1822_v59 = vld [vmem:[#allocation11 + $0x980] sm:$0xff]  ;;  %v4107_v63 = vpack.c.bf16 %v1667_v58, %v1662_v57 }
 0x320   :  { %3914 = vmatpush1.bf16.msra.mxu0 %v3913_v8  ;;  %4074 = vmatpush1.bf16.msra.mxu1 %v4073_v40  ;;  %v1547_v8 = vld [vmem:[#allocation11 + $0xe8] sm:$0xff]  ;;  %v1702_v40 = vld [vmem:[#allocation11 + $0x5c0] sm:$0xff] }
 0x321   :  { %3916 = vmatprep.subr.bf16.mxu0 %v3915_v12  ;;  %4076 = vmatprep.subr.bf16.mxu1 %v4075_v24  ;;  %v1632_v12 = vld [vmem:[#allocation11 + $0x390] sm:$0xff]  ;;  %v1637_v24 = vld [vmem:[#allocation11 + $0x3b8] sm:$0xff]  ;;  %v4093_v20 = vpack.c.bf16 %v1547_v8, %v1542_v7  ;;  %v1582_v2 = vld [vmem:[#allocation11 + $0x200] sm:$0xff] }
 0x322   :  { %v4095_v21 = vpack.c.bf16 %v1637_v24, %v1632_v12  ;;  %v1677_v7 = vld [vmem:[#allocation11 + $0x4f8] sm:$0xff]  ;;  %v1832_v8 = vld [vmem:[#allocation11 + $0x9d0] sm:$0xff] }
 0x323   :  { %v1592_v24 = vld [vmem:[#allocation11 + $0x250] sm:$0xff] }
 0x324   :  { %3918 = vmatpush1.bf16.msra.mxu0 %v3917_v26  ;;  %4078 = vmatpush1.bf16.msra.mxu1 %v4077_v27  ;;  %v4127_v26 = vpack.c.bf16 %v1797_v19, %v1792_v13  ;;  %v1717_v27 = vld [vmem:[#allocation11 + $0x638] sm:$0xff] }
 0x325   :  { %3920 = vmatprep.subr.bf16.mxu0 %v3919_v30  ;;  %4080 = vmatprep.subr.bf16.mxu1 %v4079_v31  ;;  %v1802_v30 = vld [vmem:[#allocation11 + $0x8e0] sm:$0xff]  ;;  %v1807_v31 = vld [vmem:[#allocation11 + $0x908] sm:$0xff]  ;;  %v4129_v35 = vpack.c.bf16 %v1717_v27, %v1712_v25  ;;  %v1597_v13 = vld [vmem:[#allocation11 + $0x278] sm:$0xff] }
 0x326   :  { %v1847_v27 = vld [vmem:[#allocation11 + $0xa48] sm:$0xff] }
 0x328   :  { %3922 = vmatpush1.bf16.msra.mxu0 %v3921_v43  ;;  %4082 = vmatpush1.bf16.msra.mxu1 %v4081_v37  ;;  %v4131_v43 = vpack.c.bf16 %v1807_v31, %v1802_v30  ;;  %v1727_v37 = vld [vmem:[#allocation11 + $0x688] sm:$0xff] }
 0x329   :  { %4084 = vmatprep.subr.bf16.mxu0 %v4083_v44  ;;  %4116 = vmatprep.subr.bf16.mxu1 %v4115_v45  ;;  %v1652_v44 = vld [vmem:[#allocation11 + $0x430] sm:$0xff]  ;;  %v1657_v45 = vld [vmem:[#allocation11 + $0x458] sm:$0xff]  ;;  %v4133_v49 = vpack.c.bf16 %v1727_v37, %v1722_v42 }
 0x32a   :  { %v4103_v1 = vpack.c.bf16 %v1657_v45, %v1652_v44  ;;  %v2587_v30 = vld [vmem:[#allocation14 + $0x8] sm:$0xff]  ;;  %v2589_v37 = vld [vmem:[#allocation14 + $0x18] sm:$0xff]  ;;  %v2606_v45 = vld [vmem:[#allocation14 + $0xa0] sm:$0xff] }
 0x32b   :  { %2152 = vmatmul.mubr.f32.vlgmr.msra.gmra.mrb[8].mxu0 %v4860_v51  ;;  %2365 = vmatmul.mubr.f32.vlgmr.msra.gmra.mrb[8].mxu1 %v4860_v51  ;;  %v4173_v41 = vpack.c.bf16 %v2587_v30, %v2586_v29  ;;  %v1917_v29 = vld [vmem:[#allocation11 + $0xc78] sm:$0xff]  ;;  %v2634_v30 = vld [vmem:[#allocation14 + $0x180] sm:$0xff] }
 0x32c   :  { %4086 = vmatpush3.bf16.msra.mxu0 %v4085_v54  ;;  %2435 = vmatprep.mubr.f32.mxu0 %v4831_v16  ;;  %v4125_v16 = vpack.c.bf16 %v1707_v11, %v1702_v40  ;;  %v4135_v54 = vpack.c.bf16 %v1817_v47, %v1812_v10  ;;  %v1837_v40 = vld [vmem:[#allocation11 + $0x9f8] sm:$0xff]  ;;  %v2607_v10 = vld [vmem:[#allocation14 + $0xa8] sm:$0xff]  ;;  %v1862_v47 = vld [vmem:[#allocation11 + $0xac0] sm:$0xff] }
 0x32d   :  { %4118 = vmatpush3.bf16.msra.mxu1 %v4117_v56  ;;  %2505 = vmatprep.mubr.f32.mxu1 %v4837_v22  ;;  %v1552_v22 = vld [vmem:[#allocation11 + $0x110] sm:$0xff]  ;;  %v1737_v56 = vld [vmem:[#allocation11 + $0x6d8] sm:$0xff]  ;;  %v4143_v19 = vpack.c.bf16 %v1837_v40, %v1832_v8 }
 0x32e   :  { %4088 = vmatprep.subr.bf16.mxu0 %v4087_v60  ;;  %4120 = vmatprep.subr.bf16.mxu1 %v4119_v61  ;;  %v4097_v32 = vpack.c.bf16 %v1557_v48, %v1552_v22  ;;  %v1827_v60 = vld [vmem:[#allocation11 + $0x9a8] sm:$0xff]  ;;  %v4105_v61 = vpack.c.bf16 %v1577_v52, %v1572_v50  ;;  %v4137_v62 = vpack.c.bf16 %v1737_v56, %v1732_v53  ;;  %v2609_v53 = vld [vmem:[#allocation14 + $0xb8] sm:$0xff]  ;;  %v2612_v8 = vld [vmem:[#allocation14 + $0xd0] sm:$0xff] }
 0x32f   :  { %v2603_v22 = vld [vmem:[#allocation14 + $0x88] sm:$0xff]  ;;  %v4113_v48 = vpack.c.bf16 %v1597_v13, %v1592_v24  ;;  %v1877_v56 = vld [vmem:[#allocation11 + $0xb38] sm:$0xff] }
 0x330   :  { %4090 = vmatpush3.bf16.msra.mxu0 %v4089_v46  ;;  %v4139_v46 = vpack.c.bf16 %v1827_v60, %v1822_v59  ;;  %v2591_v50 = vld [vmem:[#allocation14 + $0x28] sm:$0xff]  ;;  %v2592_v59 = vld [vmem:[#allocation14 + $0x30] sm:$0xff]  ;;  %v2593_v60 = vld [vmem:[#allocation14 + $0x38] sm:$0xff] }
 0x331   :  { %4122 = vmatpush3.bf16.msra.mxu1 %v4121_v4  ;;  %4092 = vmatprep.subr.bf16.mxu0 %v4091_v5  ;;  %v1747_v4 = vld [vmem:[#allocation11 + $0x728] sm:$0xff]  ;;  %v1672_v5 = vld [vmem:[#allocation11 + $0x4d0] sm:$0xff]  ;;  %v2613_v40 = vld [vmem:[#allocation14 + $0xd8] sm:$0xff] }
 0x332   :  { %4124 = vmatprep.subr.bf16.mxu1 %v4123_v9  ;;  %v4109_v9 = vpack.c.bf16 %v1587_v3, %v1582_v2  ;;  %v4141_v11 = vpack.c.bf16 %v1747_v4, %v1742_v18  ;;  %v4111_v12 = vpack.c.bf16 %v1677_v7, %v1672_v5  ;;  %v1882_v2 = vld [vmem:[#allocation11 + $0xb60] sm:$0xff]  ;;  %v1887_v3 = vld [vmem:[#allocation11 + $0xb88] sm:$0xff]  ;;  %v4185_v18 = vpack.c.bf16 %v2593_v60, %v2592_v59  ;;  %v2596_v13 = vld [vmem:[#allocation14 + $0x50] sm:$0xff] }
 0x333   :  { %v2594_v4 = vld [vmem:[#allocation14 + $0x40] sm:$0xff]  ;;  %v2595_v5 = vld [vmem:[#allocation14 + $0x48] sm:$0xff]  ;;  %v4160_v7 = vpack.c.bf16 %v1887_v3, %v1882_v2  ;;  %v4191_v24 = vpack.c.bf16 %v2613_v40, %v2612_v8 }
 0x334   :  { %4094 = vmatpush3.bf16.msra.mxu0 %v4093_v20  ;;  %v1752_v20 = vld [vmem:[#allocation11 + $0x750] sm:$0xff]  ;;  %v2626_v60 = vld [vmem:[#allocation14 + $0x140] sm:$0xff] }
 0x335   :  { %4126 = vmatpush3.bf16.msra.mxu1 %v4125_v16  ;;  %4096 = vmatprep.subr.bf16.mxu0 %v4095_v21  ;;  %v1757_v16 = vld [vmem:[#allocation11 + $0x778] sm:$0xff]  ;;  %v2602_v21 = vld [vmem:[#allocation14 + $0x80] sm:$0xff]  ;;  %v2599_v40 = vld [vmem:[#allocation14 + $0x68] sm:$0xff] }
 0x336   :  { %4128 = vmatprep.subr.bf16.mxu1 %v4127_v26  ;;  %v4145_v25 = vpack.c.bf16 %v1757_v16, %v1752_v20  ;;  %v1842_v26 = vld [vmem:[#allocation11 + $0xa20] sm:$0xff]  ;;  %v4171_v28 = vpack.c.bf16 %v2603_v22, %v2602_v21  ;;  %v2615_v21 = vld [vmem:[#allocation14 + $0xe8] sm:$0xff] }
 0x337   :  { %v4148_v31 = vpack.c.bf16 %v1847_v27, %v1842_v26  ;;  %v2614_v16 = vld [vmem:[#allocation14 + $0xe0] sm:$0xff] }
 0x338   :  { %4098 = vmatpush3.bf16.msra.mxu0 %v4097_v32  ;;  %v2604_v32 = vld [vmem:[#allocation14 + $0x90] sm:$0xff]  ;;  %v1902_v22 = vld [vmem:[#allocation11 + $0xc00] sm:$0xff]  ;;  %v4195_v26 = vpack.c.bf16 %v2615_v21, %v2614_v16 }
 0x339   :  { %4130 = vmatpush3.bf16.msra.mxu1 %v4129_v35  ;;  %4100 = vmatprep.subr.bf16.mxu0 %v4099_v36  ;;  %v2605_v35 = vld [vmem:[#allocation14 + $0x98] sm:$0xff]  ;;  %v1852_v36 = vld [vmem:[#allocation11 + $0xa70] sm:$0xff]  ;;  %v2598_v8 = vld [vmem:[#allocation14 + $0x60] sm:$0xff] }
 0x33a   :  { %4132 = vmatprep.subr.bf16.mxu1 %v4131_v43  ;;  %v4175_v42 = vpack.c.bf16 %v2605_v35, %v2604_v32  ;;  %v2588_v43 = vld [vmem:[#allocation14 + $0x10] sm:$0xff]  ;;  %v4151_v44 = vpack.c.bf16 %v1857_v38, %v1852_v36  ;;  %v2618_v36 = vld [vmem:[#allocation14 + $0x100] sm:$0xff]  ;;  %v2619_v38 = vld [vmem:[#allocation14 + $0x108] sm:$0xff] }
 0x33c   :  { %4102 = vmatpush3.bf16.msra.mxu0 %v4101_v33  ;;  %v1867_v33 = vld [vmem:[#allocation11 + $0xae8] sm:$0xff] }
 0x33d   :  { %4134 = vmatpush3.bf16.msra.mxu1 %v4133_v49  ;;  %4104 = vmatprep.subr.bf16.mxu0 %v4103_v1  ;;  %v4177_v49 = vpack.c.bf16 %v2589_v37, %v2588_v43  ;;  %v2590_v1 = vld [vmem:[#allocation14 + $0x20] sm:$0xff]  ;;  %v4154_v52 = vpack.c.bf16 %v1867_v33, %v1862_v47  ;;  %v4205_v43 = vpack.c.bf16 %v2619_v38, %v2618_v36  ;;  %v2639_v47 = vld [vmem:[#allocation14 + $0x1a8] sm:$0xff] }
 0x33e   :  { %4136 = vmatprep.subr.bf16.mxu1 %v4135_v54  ;;  %v1872_v54 = vld [vmem:[#allocation11 + $0xb10] sm:$0xff]  ;;  %v4181_v57 = vpack.c.bf16 %v2591_v50, %v2590_v1 }
 0x33f   :  { %v2623_v1 = vld [vmem:[#allocation14 + $0x128] sm:$0xff]  ;;  %v2640_v50 = vld [vmem:[#allocation14 + $0x1b0] sm:$0xff] }
 0x340   :  { %4106 = vmatpush3.bf16.msra.mxu0 %v4105_v61  ;;  %v4157_v61 = vpack.c.bf16 %v1877_v56, %v1872_v54  ;;  %v2624_v54 = vld [vmem:[#allocation14 + $0x130] sm:$0xff]  ;;  %v2625_v56 = vld [vmem:[#allocation14 + $0x138] sm:$0xff] }
 0x341   :  { %4138 = vmatpush3.bf16.msra.mxu1 %v4137_v62  ;;  %4108 = vmatprep.subr.bf16.mxu0 %v4107_v63  ;;  %v2610_v62 = vld [vmem:[#allocation14 + $0xc0] sm:$0xff]  ;;  %v2611_v63 = vld [vmem:[#allocation14 + $0xc8] sm:$0xff]  ;;  %v4217_v59 = vpack.c.bf16 %v2625_v56, %v2624_v54  ;;  %v2656_v56 = vld [vmem:[#allocation14 + $0x230] sm:$0xff] }
 0x342   :  { %4140 = vmatprep.subr.bf16.mxu1 %v4139_v46  ;;  %v4187_v46 = vpack.c.bf16 %v2611_v63, %v2610_v62  ;;  %v2644_v62 = vld [vmem:[#allocation14 + $0x1d0] sm:$0xff]  ;;  %v2645_v63 = vld [vmem:[#allocation14 + $0x1d8] sm:$0xff] }
 0x343   :  { %v4223_v3 = vpack.c.bf16 %v2645_v63, %v2644_v62  ;;  %v2662_v63 = vld [vmem:[#allocation14 + $0x260] sm:$0xff] }
 0x344   :  { %4110 = vmatpush3.bf16.msra.mxu0 %v4109_v9  ;;  %v1892_v9 = vld [vmem:[#allocation11 + $0xbb0] sm:$0xff] }
 0x345   :  { %4142 = vmatpush3.bf16.msra.mxu1 %v4141_v11  ;;  %4112 = vmatprep.subr.bf16.mxu0 %v4111_v12  ;;  %v1897_v11 = vld [vmem:[#allocation11 + $0xbd8] sm:$0xff]  ;;  %v4189_v12 = vpack.c.bf16 %v2595_v5, %v2594_v4  ;;  %v2646_v4 = vld [vmem:[#allocation14 + $0x1e0] sm:$0xff]  ;;  %v2647_v5 = vld [vmem:[#allocation14 + $0x1e8] sm:$0xff] }
 0x346   :  { %4144 = vmatprep.subr.bf16.mxu1 %v4143_v19  ;;  %v2597_v19 = vld [vmem:[#allocation14 + $0x58] sm:$0xff]  ;;  %v4163_v20 = vpack.c.bf16 %v1897_v11, %v1892_v9  ;;  %v4227_v9 = vpack.c.bf16 %v2647_v5, %v2646_v4  ;;  %v4197_v11 = vpack.c.bf16 %v2599_v40, %v2598_v8 }
 0x348   :  { %4114 = vmatpush3.bf16.msra.mxu0 %v4113_v48  ;;  %v1907_v48 = vld [vmem:[#allocation11 + $0xc28] sm:$0xff] }
 0x349   :  { %4146 = vmatpush3.bf16.msra.mxu1 %v4145_v25  ;;  %4147 = vmatprep.subr.bf16.mxu0 %v4548_v55  ;;  %v4193_v25 = vpack.c.bf16 %v2597_v19, %v2596_v13  ;;  %v4166_v27 = vpack.c.bf16 %v1907_v48, %v1902_v22  ;;  %v2616_v13 = vld [vmem:[#allocation14 + $0xf0] sm:$0xff]  ;;  %v2617_v19 = vld [vmem:[#allocation14 + $0xf8] sm:$0xff] }
 0x34a   :  { %4172 = vmatprep.subr.bf16.mxu1 %v4171_v28  ;;  %v1912_v28 = vld [vmem:[#allocation11 + $0xc50] sm:$0xff]  ;;  %v4199_v21 = vpack.c.bf16 %v2617_v19, %v2616_v13  ;;  %v2649_v22 = vld [vmem:[#allocation14 + $0x1f8] sm:$0xff] }
 0x34b   :  { %2436 = vmatmul.mubr.f32.vlgmr.msra.gmra.mrb[10].mxu0 %v4833_v6  ;;  %v4179_v6 = vpack.c.bf16 %v2607_v10, %v2606_v45  ;;  %v4169_v32 = vpack.c.bf16 %v1917_v29, %v1912_v28  ;;  %v2621_v45 = vld [vmem:[#allocation14 + $0x118] sm:$0xff]  ;;  %v2638_v10 = vld [vmem:[#allocation14 + $0x1a0] sm:$0xff]  ;;  %v2600_v48 = vld [vmem:[#allocation14 + $0x70] sm:$0xff] }
 0x34c   :  { %2506 = vmatmul.mubr.f32.vlgmr.msra.gmra.mrb[10].mxu1 %v4853_v14  ;;  %4149 = vmatpush3.bf16.msra.mxu0 %v4148_v31  ;;  %v2608_v14 = vld [vmem:[#allocation14 + $0xb0] sm:$0xff]  ;;  %v2635_v31 = vld [vmem:[#allocation14 + $0x188] sm:$0xff]  ;;  %v2633_v29 = vld [vmem:[#allocation14 + $0x178] sm:$0xff] }
 0x34d   :  { %4150 = vmatprep.subr.bf16.mxu0 %v4548_v55  ;;  %3268 = vmatprep.mubr.msk.f32.mxu0 %vm4549_vm4, %v4546_v0  ;;  %v4183_v58 = vpack.c.bf16 %v2609_v53, %v2608_v14  ;;  %v4203_v35 = vpack.c.bf16 %v2635_v31, %v2634_v30  ;;  %v2632_v28 = vld [vmem:[#allocation14 + $0x170] sm:$0xff]  ;;  %v4880_v31 = vld [vmem:[#allocation13] sm:$0x1f] }
 0x34e   :  { %4174 = vmatpush3.bf16.msra.mxu1 %v4173_v41  ;;  %v2636_v41 = vld [vmem:[#allocation14 + $0x190] sm:$0xff]  ;;  %v4233_v30 = vpack.c.bf16 %v2633_v29, %v2632_v28  ;;  %v1927_v36 = vrot.slane %v4880_v31, %v4757_v17  ;;  %v1935_v38 = vrot.slane %v4880_v31, %v4764_v23  ;;  %v2653_v17 = vld [vmem:[#allocation14 + $0x218] sm:$0xff]  ;;  %v1939_v5 = vrot.slane %v4880_v31, %v4797_v34  ;;  %v2911_v34 = vld [vmem:[#allocation16] ss:$0 sm:$0xff] }
 0x34f   :  { %4176 = vmatprep.subr.bf16.mxu1 %v4175_v42  ;;  %v2637_v42 = vld [vmem:[#allocation14 + $0x198] sm:$0xff] }
 0x350   :  { %4152 = vmatpush3.bf16.msra.mxu0 %v4151_v44  ;;  %v4207_v37 = vpack.c.bf16 %v2637_v42, %v2636_v41  ;;  %v2620_v44 = vld [vmem:[#allocation14 + $0x110] sm:$0xff] }
 0x351   :  { %4153 = vmatprep.subr.bf16.mxu0 %v4548_v55  ;;  %v4209_v33 = vpack.c.bf16 %v2621_v45, %v2620_v44 }
 0x352   :  { %4178 = vmatpush3.bf16.msra.mxu1 %v4177_v49  ;;  %v4211_v49 = vpack.c.bf16 %v2639_v47, %v2638_v10  ;;  %v2650_v10 = vld [vmem:[#allocation14 + $0x200] sm:$0xff]  ;;  %v2651_v47 = vld [vmem:[#allocation14 + $0x208] sm:$0xff] }
 0x353   :  { %4180 = vmatprep.subr.bf16.mxu1 %v4179_v6  ;;  %v2622_v6 = vld [vmem:[#allocation14 + $0x120] sm:$0xff] }
 0x354   :  { %4155 = vmatpush3.bf16.msra.mxu0 %v4154_v52  ;;  %v2641_v52 = vld [vmem:[#allocation14 + $0x1b8] sm:$0xff]  ;;  %v4213_v14 = vpack.c.bf16 %v2623_v1, %v2622_v6  ;;  %v4236_v1 = vpack.c.bf16 %v2651_v47, %v2650_v10 }
 0x355   :  { %4156 = vmatprep.subr.bf16.mxu0 %v4548_v55  ;;  %v4215_v53 = vpack.c.bf16 %v2641_v52, %v2640_v50  ;;  %v2652_v52 = vld [vmem:[#allocation14 + $0x210] sm:$0xff] }
 0x356   :  { %4182 = vmatpush3.bf16.msra.mxu1 %v4181_v57  ;;  %v2642_v57 = vld [vmem:[#allocation14 + $0x1c0] sm:$0xff]  ;;  %v4239_v23 = vpack.c.bf16 %v2653_v17, %v2652_v52 }
 0x357   :  { %4184 = vmatprep.subr.bf16.mxu1 %v4183_v58  ;;  %v2643_v58 = vld [vmem:[#allocation14 + $0x1c8] sm:$0xff] }
 0x358   :  { %4158 = vmatpush3.bf16.msra.mxu0 %v4157_v61  ;;  %v2627_v61 = vld [vmem:[#allocation14 + $0x148] sm:$0xff] }
 0x359   :  { %4159 = vmatprep.subr.bf16.mxu0 %v4548_v55  ;;  %v4221_v2 = vpack.c.bf16 %v2627_v61, %v2626_v60  ;;  %v2661_v61 = vld [vmem:[#allocation14 + $0x258] sm:$0xff] }
 0x35a   :  { %4186 = vmatpush3.bf16.msra.mxu1 %v4185_v18  ;;  %v2628_v18 = vld [vmem:[#allocation14 + $0x150] sm:$0xff] }
 0x35b   :  { %4188 = vmatprep.subr.bf16.mxu1 %v4187_v46  ;;  %v2629_v46 = vld [vmem:[#allocation14 + $0x158] sm:$0xff] }
 0x35c   :  { %4161 = vmatpush3.bf16.msra.mxu0 %v4160_v7  ;;  %v4225_v7 = vpack.c.bf16 %v2629_v46, %v2628_v18  ;;  %v2664_v18 = vld [vmem:[#allocation14 + $0x270] sm:$0xff]  ;;  %v2665_v46 = vld [vmem:[#allocation14 + $0x278] sm:$0xff] }
 0x35d   :  { %4162 = vmatprep.subr.bf16.mxu0 %v4548_v55 }
 0x35e   :  { %4190 = vmatpush3.bf16.msra.mxu1 %v4189_v12  ;;  %v2630_v12 = vld [vmem:[#allocation14 + $0x160] sm:$0xff] }
 0x35f   :  { %4192 = vmatprep.subr.bf16.mxu1 %v4191_v24  ;;  %v2631_v24 = vld [vmem:[#allocation14 + $0x168] sm:$0xff] }
 0x360   :  { %4164 = vmatpush3.bf16.msra.mxu0 %v4163_v20  ;;  %v2648_v20 = vld [vmem:[#allocation14 + $0x1f0] sm:$0xff]  ;;  %v4229_v16 = vpack.c.bf16 %v2631_v24, %v2630_v12 }
 0x361   :  { %4165 = vmatprep.subr.bf16.mxu0 %v4548_v55 }
 0x362   :  { %4194 = vmatpush3.bf16.msra.mxu1 %v4193_v25  ;;  %v2601_v25 = vld [vmem:[#allocation14 + $0x78] sm:$0xff] }
 0x363   :  { %4196 = vmatprep.subr.bf16.mxu1 %v4195_v26  ;;  %v4231_v26 = vpack.c.bf16 %v2649_v22, %v2648_v20 }
 0x364   :  { %4167 = vmatpush3.bf16.msra.mxu0 %v4166_v27  ;;  %v4201_v27 = vpack.c.bf16 %v2601_v25, %v2600_v48 }
 0x365   :  { %4168 = vmatprep.subr.bf16.mxu0 %v4548_v55 }
 0x366   :  { %4198 = vmatpush3.bf16.msra.mxu1 %v4197_v11 }
 0x367   :  { %4200 = vmatprep.subr.bf16.mxu1 %v4199_v21 }
 0x368   :  { %4170 = vmatpush3.bf16.msra.mxu0 %v4169_v32  ;;  %v1923_v32 = vrot.slane %v4880_v31, %v4752_v15 }
 0x369   :  { %4204 = vmatprep.subr.bf16.mxu0 %v4203_v35  ;;  %v1931_v35 = vrot.slane %v4880_v31, %v4785_v39 }
 0x36a   :  { %4202 = vmatpush3.bf16.msra.mxu1 %v4201_v27 }
 0x36b   :  { %3269 = vmatmul.mubr.f32.vlgmr.msra.gmra.mrb[12].mxu0 %v4860_v51  ;;  %v4219_v51 = vpack.c.bf16 %v2643_v58, %v2642_v57  ;;  %4235 = vmatprep.subr.bf16.mxu1 %v4548_v55  ;;  %v2657_v57 = vld [vmem:[#allocation14 + $0x238] sm:$0xff] }
 0x36c   :  { %4206 = vmatpush3.bf16.msra.mxu0 %v4205_v43  ;;  %v4245_v58 = vpack.c.bf16 %v2657_v57, %v2656_v56 }
 0x36d   :  { %4208 = vmatprep.subr.bf16.mxu0 %v4207_v37 }
 0x370   :  { %4210 = vmatpush3.bf16.msra.mxu0 %v4209_v33 }
 0x371   :  { %4212 = vmatprep.subr.bf16.mxu0 %v4211_v49 }
 0x374   :  { %4214 = vmatpush3.bf16.msra.mxu0 %v4213_v14  ;;  %v2654_v14 = vld [vmem:[#allocation14 + $0x220] sm:$0xff] }
 0x375   :  { %4216 = vmatprep.subr.bf16.mxu0 %v4215_v53  ;;  %v2655_v53 = vld [vmem:[#allocation14 + $0x228] sm:$0xff] }
 0x376   :  { %v4242_v54 = vpack.c.bf16 %v2655_v53, %v2654_v14 }
 0x378   :  { %4218 = vmatpush3.bf16.msra.mxu0 %v4217_v59  ;;  %v2658_v59 = vld [vmem:[#allocation14 + $0x240] sm:$0xff] }
 0x379   :  { %4220 = vmatprep.subr.bf16.mxu0 %v4219_v51  ;;  %v2659_v51 = vld [vmem:[#allocation14 + $0x248] sm:$0xff] }
 0x37a   :  { %v4248_v60 = vpack.c.bf16 %v2659_v51, %v2658_v59 }
 0x37c   :  { %4222 = vmatpush3.bf16.msra.mxu0 %v4221_v2  ;;  %v2663_v2 = vld [vmem:[#allocation14 + $0x268] sm:$0xff] }
 0x37d   :  { %4224 = vmatprep.subr.bf16.mxu0 %v4223_v3  ;;  %v4254_v3 = vpack.c.bf16 %v2663_v2, %v2662_v63 }
 0x380   :  { %4226 = vmatpush3.bf16.msra.mxu0 %v4225_v7  ;;  %v4257_v7 = vpack.c.bf16 %v2665_v46, %v2664_v18 }
 0x381   :  { %4228 = vmatprep.subr.bf16.mxu0 %v4227_v9 }
 0x384   :  { %4230 = vmatpush3.bf16.msra.mxu0 %v4229_v16 }
 0x385   :  { %4232 = vmatprep.subr.bf16.mxu0 %v4231_v26 }
 0x388   :  { %4234 = vmatpush3.bf16.msra.mxu0 %v4233_v30 }
 0x3fe   :  { %v2153_v41 = vpop.f32.mrb[8].mxu0  ;;  %v2366_v42 = vpop.f32.mrb[8].mxu1 }
 0x3ff   :  { %v4263_v43 = vadd.f32 %v2153_v41, %v1923_v32  ;;  %v4265_v37 = vadd.f32 %v2366_v42, %v1931_v35  ;;  %v2155_v44 = vpop.f32.mrb[9].mxu0  ;;  %v2368_v45 = vpop.f32.mrb[9].mxu1 }
 0x400   :  { %v4264_v33 = vadd.f32 %v2155_v44, %v1927_v36  ;;  %v4266_v49 = vadd.f32 %v2368_v45, %v1935_v38 }
 0x401   :  { %v2581_v39 = vmax.f32 %v4263_v43, 0.0  ;;  %v2583_v50 = vmax.f32 %v4265_v37, 0.0 }
 0x402   :  { %v2582_v15 = vmax.f32 %v4264_v33, 0.0  ;;  %v2584_v6 = vmax.f32 %v4266_v49, 0.0 }
 0x404   :  { %2737 = vmatprep.mubr.f32.mxu1 %v2582_v15  ;;  %2807 = vmatprep.mubr.f32.mxu0 %v2584_v6 }
 0x405   :  { %2738 = vmatmul.mubr.f32.vlgmr.msra.gmra.mrb[12].mxu1 %v2581_v39  ;;  %2808 = vmatmul.mubr.f32.vlgmr.msra.gmra.mrb[14].mxu0 %v2583_v50 }
 0x406   :  { %4237 = vmatpush3.bf16.msra.mxu1 %v4236_v1  ;;  %3303 = vmatprep.mubr.msk.f32.mxu1 %vm4549_vm4, %v4546_v0  ;;  %v2660_v0 = vld [vmem:[#allocation14 + $0x250] sm:$0xff] }
 0x407   :  { %4238 = vmatprep.subr.bf16.mxu1 %v4548_v55  ;;  %v4251_v62 = vpack.c.bf16 %v2661_v61, %v2660_v0 }
 0x40a   :  { %4240 = vmatpush3.bf16.msra.mxu1 %v4239_v23 }
 0x40b   :  { %4241 = vmatprep.subr.bf16.mxu1 %v4548_v55 }
 0x40e   :  { %4243 = vmatpush3.bf16.msra.mxu1 %v4242_v54 }
 0x40f   :  { %4244 = vmatprep.subr.bf16.mxu1 %v4548_v55 }
 0x412   :  { %4246 = vmatpush3.bf16.msra.mxu1 %v4245_v58 }
 0x413   :  { %4247 = vmatprep.subr.bf16.mxu1 %v4548_v55 }
 0x416   :  { %4249 = vmatpush3.bf16.msra.mxu1 %v4248_v60 }
 0x417   :  { %4250 = vmatprep.subr.bf16.mxu1 %v4548_v55 }
 0x41a   :  { %4252 = vmatpush3.bf16.msra.mxu1 %v4251_v62 }
 0x41b   :  { %4253 = vmatprep.subr.bf16.mxu1 %v4548_v55 }
 0x41e   :  { %v3040_v4 = vpop.f32.mrb[10].mxu0  ;;  %4255 = vmatpush3.bf16.msra.mxu1 %v4254_v3 }
 0x41f   :  { %v3075_v8 = vpop.f32.mrb[10].mxu1  ;;  %v3041_v40 = vpop.f32.mrb[11].mxu0  ;;  %4256 = vmatprep.subr.bf16.mxu1 %v4548_v55 }
 0x420   :  { %v3042_v9 = vadd.f32 %v3041_v40, %v3040_v4  ;;  %v3076_v11 = vpop.f32.mrb[11].mxu1 }
 0x421   :  { %v3077_v12 = vadd.f32 %v3076_v11, %v3075_v8 }
 0x422   :  { %v2438_v24 = vadd.f32 %v3042_v9, %v1939_v5  ;;  %4258 = vmatpush3.bf16.msra.mxu1 %v4257_v7 }
 0x424   :  { %v2508_v13 = vadd.f32 %v3077_v12, %v2438_v24 }
 0x43e   :  { %v2577_v19 = vpop.f32.mrb[12].mxu0 }
 0x43f   :  { %v2578_v20 = vadd.f32 %v2577_v19, %v2508_v13  ;;  %v3270_v16 = vpop.f32.mrb[13].mxu0 }
 0x441   :  { %v2585_v21 = vmax.f32 %v2578_v20, 0.0 }
 0x443   :  { %3304 = vmatmul.mubr.f32.vlgmr.msra.gmra.mrb[14].mxu1 %v2585_v21 }
 0x4d8   :  { %v3127_v22 = vpop.f32.mrb[12].mxu1  ;;  %v3162_v48 = vpop.f32.mrb[14].mxu0 }
 0x4d9   :  { %v3128_v25 = vpop.f32.mrb[13].mxu1  ;;  %v3163_v26 = vpop.f32.mrb[15].mxu0 }
 0x4da   :  { %v3129_v27 = vadd.f32 %v3128_v25, %v3127_v22  ;;  %v3164_v28 = vadd.f32 %v3163_v26, %v3162_v48 }
 0x4dc   :  { %v2740_v29 = vadd.f32 %v3129_v27, %v2911_v34 }
 0x4de   :  { %v2810_v55 = vadd.f32 %v3164_v28, %v2740_v29 }
 0x516   :  { %v2879_v30 = vpop.f32.mrb[14].mxu1 }
 0x517   :  { %v2880_v31 = vadd.f32 %v2879_v30, %v2810_v55  ;;  %v3305_v32 = vpop.f32.mrb[15].mxu1 }
 0x519   :  { %2883 = vst [vmem:[#allocation17] sm:$0xff] %v2880_v31 }
 0x51a   :  { %4510 = shalt.err (!%p4507_p6)
}
 0x51b   :  { %s4511_s28 = scalar_lea.hbm %s4922_s9, 128 }
 0x51c   :  { %p4512_p7 = scmp.ne.s32.totalorder %s4922_s9, %s4511_s28  ;;  %p4515_p8 = scmp.lt.u32.totalorder %s4511_s28, %s4922_s9 }
 0x51e   :  { %p4517_p9 = pnand %p4515_p8, %p4512_p7 }
 0x520   :  { %4520 = shalt.err (!%p4517_p9)
}
 0x521   :  { %2893 = dma.vmem_to_hbm [thread:$0]  %s2891_s27, 128, %s4922_s9, [#allocation4]  }
 0x522   :  { %4531 = dma.done.wait [#allocation4], 128  }
 0x523   :  { %4532 = vsyncadd [#allocation4], 4294967168 }
 0x524   :  { %2897 = vsyncpa [#allocation3], 1 }
 0x525   :  { %2898 = vsyncpa [#allocation6], 1 }
 0x526   :  { %2899 = vsyncpa [#allocation9], 1 }
 0x527   :  { %2900 = vsyncpa [#allocation12], 1 }
 0x528   :  { %2901 = vsyncpa [#allocation15], 1 }
 0x529   :  { %2902 = vsyncpa [#allocation4], 1 }

</bundles_post_ra>
